<compile_context>
chip_gen: v6e
topology: v6e:2x2x1
jax: 0.10.0
libtpu: 0.0.40
codegen_flags: <defaults>
</compile_context>

<pallas_src>
import jax
import jax.numpy as jnp
from jax.experimental import pallas as pl
from jax.experimental.pallas import tpu as pltpu

_B = 8  # images per grid step (multiple of 8 keeps every row slice sublane-aligned)


# ---------------------------------------------------------------------------
# The fused Pallas kernel (one grid step == B images, everything in VMEM)
# Row layout of every activation matrix: row = h*B + b ; lanes = w*C + c.
# ---------------------------------------------------------------------------
def _make_kernel(B):
    f32 = jnp.float32

    def kernel(x_ref, w1r_ref, sh1_ref, w2r_ref, sh2_ref,
               se1_ref, so1_ref, se2_ref, so2_ref,
               f1w_ref, f1b_ref, f2w_ref, f2b_ref,
               o_ref,
               c1_s, hm1_s, p1_s, c2_s, hm2_s, p2_s):
        # ---- layer1: 3x3 conv (1->16), BN folded, + ReLU: 3 block-Toeplitz dots ----
        # c1[h*B+b, w*16+co] = sum_i  xpad[(h+i)*B+b, :] @ W1r[i]
        c1_s[...] = jnp.dot(x_ref[0, 0:16 * B, :], w1r_ref[0],
                            preferred_element_type=f32)
        for i in range(1, 3):
            c1_s[...] += jnp.dot(x_ref[0, i * B:(i + 16) * B, :], w1r_ref[i],
                                 preferred_element_type=f32)
        c1_s[...] = jnp.maximum(c1_s[...] + sh1_ref[...], 0.0)

        # ---- maxpool 2x2 #1: H-pairs elementwise, W-pairs via 0/1 selection matmuls ----
        for h2 in range(8):
            hm1_s[h2 * B:(h2 + 1) * B, :] = jnp.maximum(
                c1_s[(2 * h2) * B:(2 * h2 + 1) * B, :],
                c1_s[(2 * h2 + 1) * B:(2 * h2 + 2) * B, :])
        hm1 = hm1_s[...]                                     # (8B, 256)
        p1_s[...] = jnp.maximum(
            jnp.dot(hm1, se1_ref[...], preferred_element_type=f32),
            jnp.dot(hm1, so1_ref[...], preferred_element_type=f32))   # (8B, 128)

        # ---- layer2: 3x3 conv (16->32), BN folded, + ReLU: 3 block-Toeplitz dots ----
        c2_s[...] = jnp.dot(p1_s[0:6 * B, :], w2r_ref[0],
                            preferred_element_type=f32)
        for i in range(1, 3):
            c2_s[...] += jnp.dot(p1_s[i * B:(i + 6) * B, :], w2r_ref[i],
                                 preferred_element_type=f32)
        c2_s[...] = jnp.maximum(c2_s[...] + sh2_ref[...], 0.0)        # (6B, 192)

        # ---- maxpool 2x2 #2 ----
        for h2 in range(3):
            hm2_s[h2 * B:(h2 + 1) * B, :] = jnp.maximum(
                c2_s[(2 * h2) * B:(2 * h2 + 1) * B, :],
                c2_s[(2 * h2 + 1) * B:(2 * h2 + 2) * B, :])
        hm2 = hm2_s[...]                                     # (3B, 192)
        p2_s[...] = jnp.maximum(
            jnp.dot(hm2, se2_ref[...], preferred_element_type=f32),
            jnp.dot(hm2, so2_ref[...], preferred_element_type=f32))   # (3B, 96)

        # ---- fc1 (+bias) as 3 batched dots (rows become the image index b), then fc2 ----
        # TODO(synk): nn.Dropout2d(0.2) is identity in eval mode; not applied.
        hacc = jnp.zeros((B, 640), f32)
        for hh in range(3):
            hacc = hacc + jnp.dot(p2_s[hh * B:(hh + 1) * B, :], f1w_ref[hh],
                                  preferred_element_type=f32)
        hacc = hacc + f1b_ref[...]                           # (B, 640), cols 600+ are 0
        o_ref[...] = (jnp.dot(hacc, f2w_ref[...], preferred_element_type=f32)
                      + f2b_ref[...])                        # (B, 16)

    return kernel


# ---------------------------------------------------------------------------
# Wrapper: BN folding, block-Toeplitz / selection-matrix construction (trace
# time, tiny) + a single pallas_call over batch blocks.
# ---------------------------------------------------------------------------
def convnet_forward(params, x_nchw, block_b=_B):
    f32 = jnp.float32
    eps = 1e-5
    N = x_nchw.shape[0]
    B = block_b
    G = max(1, -(-N // B))          # grid length (batch blocks)
    Np = G * B

    # ---- fold BN scale into conv weights; shift = beta + (conv_bias - mean)*scale ----
    s1 = params["bn1_gamma"] / jnp.sqrt(params["bn1_var"] + eps)               # (16,)
    w1f = params["w1"][:, 0] * s1[:, None, None]                               # (16,3,3)
    shift1 = params["bn1_beta"] + (params["b1"] - params["bn1_mean"]) * s1
    s2 = params["bn2_gamma"] / jnp.sqrt(params["bn2_var"] + eps)               # (32,)
    w2f = params["w2"] * s2[:, None, None, None]                               # (32,16,3,3)
    shift2 = params["bn2_beta"] + (params["b2"] - params["bn2_mean"]) * s2

    # ---- block-Toeplitz conv matrices: one (K, W*Cout) matrix per kernel row i ----
    # W1r[i][w', w*16+co] = w1f[co, i, w'-w]   (w' in 0..17, w in 0..15)
    oh1 = (jnp.arange(18)[None, None, :] ==
           (jnp.arange(16)[:, None, None] + jnp.arange(3)[None, :, None])).astype(f32)
    W1r = jnp.einsum("wjr,ijc->irwc", oh1, w1f.transpose(1, 2, 0)).reshape(3, 18, 256)
    sh1 = jnp.tile(shift1, 16).reshape(1, 256)
    # W2r[i][w'*16+ci, w*32+co] = w2f[co, ci, i, w'-w]   (w' in 0..7, w in 0..5)
    oh2 = (jnp.arange(8)[None, None, :] ==
           (jnp.arange(6)[:, None, None] + jnp.arange(3)[None, :, None])).astype(f32)
    W2r = jnp.einsum("wjr,ijkc->irkwc", oh2, w2f.transpose(2, 3, 1, 0)).reshape(3, 128, 192)
    sh2 = jnp.tile(shift2, 6).reshape(1, 192)

    # ---- 0/1 selection matrices for the W half of each 2x2 maxpool (slab-wide) ----
    def _sel(wout, win, c, odd):
        pick = (jnp.arange(win)[:, None] == 2 * jnp.arange(wout)[None, :] + odd).astype(f32)
        return jnp.einsum("ab,cd->acbd", pick, jnp.eye(c, dtype=f32)).reshape(win * c, wout * c)
    se1, so1 = _sel(8, 16, 16, 0), _sel(8, 16, 16, 1)       # (256, 128)
    se2, so2 = _sel(3, 6, 32, 0), _sel(3, 6, 32, 1)         # (192,  96)

    # ---- fc weights: regroup fc1 rows (PyTorch c*9+h*3+w) to (h, w*32+co); pad 600->640 ----
    f1w = params["fc1_w"].reshape(32, 3, 3, 600).transpose(1, 2, 0, 3).reshape(3, 96, 600)
    f1w = jnp.pad(f1w, ((0, 0), (0, 0), (0, 40))).astype(f32)                  # (3, 96, 640)
    f1b = jnp.pad(params["fc1_b"], (0, 40)).reshape(1, 640).astype(f32)
    f2w = jnp.pad(params["fc2_w"], ((0, 40), (0, 0))).astype(f32)              # (640, 16)
    f2b = params["fc2_b"].reshape(1, 16).astype(f32)

    # ---- input: NCHW -> zero-pad spatial (conv1 padding=1), pad batch to G*B,
    # and re-lay out each block as rows = h*B + b (h-major, b-minor) ----
    xp = jnp.pad(x_nchw[:, 0].astype(f32), ((0, Np - N), (1, 1), (1, 1)))      # (Np,18,18)
    xr = xp.reshape(G, B, 18, 18).transpose(0, 2, 1, 3).reshape(G, 18 * B, 18)

    def _const(shape):
        return pl.BlockSpec(shape, lambda g: (0,) * len(shape))

    out = pl.pallas_call(
        _make_kernel(B),
        out_shape=jax.ShapeDtypeStruct((Np, 16), f32),
        grid_spec=pltpu.PrefetchScalarGridSpec(
            num_scalar_prefetch=0,
            grid=(G,),
            in_specs=[
                pl.BlockSpec((1, 18 * B, 18), lambda g: (g, 0, 0)),  # input block
                _const((3, 18, 256)),          # conv1 block-Toeplitz (BN folded)
                _const((1, 256)),              # shift1 (lane-tiled)
                _const((3, 128, 192)),         # conv2 block-Toeplitz (BN folded)
                _const((1, 192)),              # shift2 (lane-tiled)
                _const((256, 128)),            # pool1 select even
                _const((256, 128)),            # pool1 select odd
                _const((192, 96)),             # pool2 select even
                _const((192, 96)),             # pool2 select odd
                _const((3, 96, 640)),          # fc1 weight (regrouped, padded)
                _const((1, 640)),              # fc1 bias (padded)
                _const((640, 16)),             # fc2 weight (padded rows)
                _const((1, 16)),               # fc2 bias
            ],
            out_specs=pl.BlockSpec((B, 16), lambda g: (g, 0)),
            scratch_shapes=[
                pltpu.VMEM((16 * B, 256), f32),   # conv1+BN+ReLU   (rows h*B+b)
                pltpu.VMEM((8 * B, 256), f32),    # pool1 H-pair max
                pltpu.VMEM((8 * B, 128), f32),    # pool1 output
                pltpu.VMEM((6 * B, 192), f32),    # conv2+BN+ReLU
                pltpu.VMEM((3 * B, 192), f32),    # pool2 H-pair max
                pltpu.VMEM((3 * B, 96), f32),     # pool2 output
            ]),
        compiler_params=pltpu.CompilerParams(
            dimension_semantics=("parallel",)),   # v7x: blocks split across 2 TCs
    )(xr, W1r, sh1, W2r, sh2, se1, so1, se2, so2, f1w, f1b, f2w, f2b)
    return out[:N]


# ---------------------------------------------------------------------------
# Parameters (random, deterministic) — matches the module up to documented fixes
# ---------------------------------------------------------------------------
def init_params(key, flat_dim):
    ks = jax.random.split(key, 16)
    p = {}
    # layer1: Conv2d(1 -> 16, k=3, pad=1) + BatchNorm + ReLU + MaxPool(2)
    p["w1"] = 0.10 * jax.random.normal(ks[0], (16, 1, 3, 3), jnp.float32)
    p["b1"] = 0.10 * jax.random.normal(ks[1], (16,), jnp.float32)
    # TODO(synk): reference declares BatchNorm2d(32) for a 16-channel tensor
    # (runtime error in PyTorch); BN is sized to the conv output instead.
    p["bn1_gamma"] = 1.0 + 0.1 * jax.random.normal(ks[2], (16,), jnp.float32)
    p["bn1_beta"] = 0.1 * jax.random.normal(ks[3], (16,), jnp.float32)
    p["bn1_mean"] = 0.1 * jax.random.normal(ks[4], (16,), jnp.float32)
    p["bn1_var"] = 1.0 + jnp.abs(jax.random.normal(ks[5], (16,), jnp.float32))
    # layer2: Conv2d(16 -> 32, k=3, pad=0) + BatchNorm + ReLU + MaxPool(2)
    p["w2"] = 0.05 * jax.random.normal(ks[6], (32, 16, 3, 3), jnp.float32)
    p["b2"] = 0.10 * jax.random.normal(ks[7], (32,), jnp.float32)
    # TODO(synk): reference declares BatchNorm2d(64) for a 32-channel tensor.
    p["bn2_gamma"] = 1.0 + 0.1 * jax.random.normal(ks[8], (32,), jnp.float32)
    p["bn2_beta"] = 0.1 * jax.random.normal(ks[9], (32,), jnp.float32)
    p["bn2_mean"] = 0.1 * jax.random.normal(ks[10], (32,), jnp.float32)
    p["bn2_var"] = 1.0 + jnp.abs(jax.random.normal(ks[11], (32,), jnp.float32))
    # TODO(synk): reference fc1 has in_features=122112 (implies a much larger
    # spectrogram input); fc1 is sized to the actual flattened dim here.
    p["fc1_w"] = 0.05 * jax.random.normal(ks[12], (flat_dim, 600), jnp.float32)
    p["fc1_b"] = 0.05 * jax.random.normal(ks[13], (600,), jnp.float32)
    p["fc2_w"] = 0.05 * jax.random.normal(ks[14], (600, 16), jnp.float32)
    p["fc2_b"] = 0.05 * jax.random.normal(ks[15], (16,), jnp.float32)
    # TODO(synk): reference also defines fc3, but it is unused in forward().
    return p


# ---------------------------------------------------------------------------
# Pure-JAX (non-Pallas) reference, used only to validate the fused kernel
# ---------------------------------------------------------------------------
def _reference_forward(params, x):
    eps = 1e-5
    hi = jax.lax.Precision.HIGHEST

    def block(x, w, b, g, beta, mean, var, pad):
        y = jax.lax.conv_general_dilated(
            x, w, (1, 1), [(pad, pad), (pad, pad)],
            dimension_numbers=("NCHW", "OIHW", "NCHW"), precision=hi)
        y = y + b[None, :, None, None]
        y = (y - mean[None, :, None, None]) / jnp.sqrt(var[None, :, None, None] + eps)
        y = y * g[None, :, None, None] + beta[None, :, None, None]
        y = jnp.maximum(y, 0.0)
        return jax.lax.reduce_window(y, -jnp.inf, jax.lax.max,
                                     (1, 1, 2, 2), (1, 1, 2, 2), "VALID")

    y = block(x, params["w1"], params["b1"], params["bn1_gamma"], params["bn1_beta"],
              params["bn1_mean"], params["bn1_var"], pad=1)
    y = block(y, params["w2"], params["b2"], params["bn2_gamma"], params["bn2_beta"],
              params["bn2_mean"], params["bn2_var"], pad=0)
    flat = y.reshape(y.shape[0], -1)                      # NCHW flatten order
    h = jnp.dot(flat, params["fc1_w"], precision=hi) + params["fc1_b"]
    return jnp.dot(h, params["fc2_w"], precision=hi) + params["fc2_b"]


if __name__ == "__main__":
    key = jax.random.PRNGKey(0)
    kx, kp = jax.random.split(key)

    # Small input consistent with the module: NCHW, 1 input channel.
    x = jax.random.normal(kx, (2, 1, 16, 16), jnp.float32)

    # 16x16 -> conv(pad=1) 16x16 -> pool 8x8 -> conv 6x6 -> pool 3x3 ; 32*3*3
    flat_dim = 32 * 3 * 3
    params = init_params(kp, flat_dim)

    out = jax.block_until_ready(convnet_forward(params, x))
    assert out.shape == (2, 16) and out.dtype == jnp.float32

    ref = jax.block_until_ready(_reference_forward(params, x))
    err = float(jnp.max(jnp.abs(out - ref)))
    assert err < 5e-2, f"mismatch vs pure-JAX reference: max abs err = {err}"

    print("KERNEL_OK")
</pallas_src>

<mosaic_0001>
module attributes {stable_mosaic.version = 11 : i64} {
  func.func @kernel(%arg0: i32, %arg1: memref<1x144x18xf32, #tpu.memory_space<vmem>>, %arg2: memref<3x18x256xf32, #tpu.memory_space<vmem>>, %arg3: memref<1x256xf32, #tpu.memory_space<vmem>>, %arg4: memref<3x128x192xf32, #tpu.memory_space<vmem>>, %arg5: memref<1x192xf32, #tpu.memory_space<vmem>>, %arg6: memref<256x128xf32, #tpu.memory_space<vmem>>, %arg7: memref<256x128xf32, #tpu.memory_space<vmem>>, %arg8: memref<192x96xf32, #tpu.memory_space<vmem>>, %arg9: memref<192x96xf32, #tpu.memory_space<vmem>>, %arg10: memref<3x96x640xf32, #tpu.memory_space<vmem>>, %arg11: memref<1x640xf32, #tpu.memory_space<vmem>>, %arg12: memref<640x16xf32, #tpu.memory_space<vmem>>, %arg13: memref<1x16xf32, #tpu.memory_space<vmem>>, %arg14: memref<8x16xf32, #tpu.memory_space<vmem>>, %arg15: memref<128x256xf32, #tpu.memory_space<vmem>>, %arg16: memref<64x256xf32, #tpu.memory_space<vmem>>, %arg17: memref<64x128xf32, #tpu.memory_space<vmem>>, %arg18: memref<48x192xf32, #tpu.memory_space<vmem>>, %arg19: memref<24x192xf32, #tpu.memory_space<vmem>>, %arg20: memref<24x96xf32, #tpu.memory_space<vmem>>) attributes {dimension_semantics = [#tpu.dimension_semantics<parallel>], iteration_bounds = array<i64: 1>, scalar_prefetch = 0 : i64, scratch_operands = 6 : i64, tpu.core_type = #tpu.core_type<tc>, window_params = [{transform_indices = @transform_0, window_bounds = array<i64: 1, 144, 18>}, {pipeline_mode = #tpu.pipeline_mode<synchronous>, transform_indices = @transform_1, window_bounds = array<i64: 3, 18, 256>}, {pipeline_mode = #tpu.pipeline_mode<synchronous>, transform_indices = @transform_2, window_bounds = array<i64: 1, 256>}, {pipeline_mode = #tpu.pipeline_mode<synchronous>, transform_indices = @transform_3, window_bounds = array<i64: 3, 128, 192>}, {pipeline_mode = #tpu.pipeline_mode<synchronous>, transform_indices = @transform_4, window_bounds = array<i64: 1, 192>}, {pipeline_mode = #tpu.pipeline_mode<synchronous>, transform_indices = @transform_5, window_bounds = array<i64: 256, 128>}, {pipeline_mode = #tpu.pipeline_mode<synchronous>, transform_indices = @transform_6, window_bounds = array<i64: 256, 128>}, {pipeline_mode = #tpu.pipeline_mode<synchronous>, transform_indices = @transform_7, window_bounds = array<i64: 192, 96>}, {pipeline_mode = #tpu.pipeline_mode<synchronous>, transform_indices = @transform_8, window_bounds = array<i64: 192, 96>}, {pipeline_mode = #tpu.pipeline_mode<synchronous>, transform_indices = @transform_9, window_bounds = array<i64: 3, 96, 640>}, {pipeline_mode = #tpu.pipeline_mode<synchronous>, transform_indices = @transform_10, window_bounds = array<i64: 1, 640>}, {pipeline_mode = #tpu.pipeline_mode<synchronous>, transform_indices = @transform_11, window_bounds = array<i64: 640, 16>}, {pipeline_mode = #tpu.pipeline_mode<synchronous>, transform_indices = @transform_12, window_bounds = array<i64: 1, 16>}, {transform_indices = @transform_13, window_bounds = array<i64: 8, 16>}]} {
    %c0 = arith.constant 0 : index
    %c0_0 = arith.constant 0 : index
    %c0_1 = arith.constant 0 : index
    %0 = vector.load %arg1[%c0, %c0_0, %c0_1] : memref<1x144x18xf32, #tpu.memory_space<vmem>>, vector<1x128x18xf32>
    %1 = vector.shape_cast %0 : vector<1x128x18xf32> to vector<128x18xf32>
    %c0_2 = arith.constant 0 : index
    %c0_3 = arith.constant 0 : index
    %c0_4 = arith.constant 0 : index
    %2 = vector.load %arg2[%c0_2, %c0_3, %c0_4] : memref<3x18x256xf32, #tpu.memory_space<vmem>>, vector<1x18x256xf32>
    %3 = vector.shape_cast %2 : vector<1x18x256xf32> to vector<18x256xf32>
    %cst = arith.constant dense<0.000000e+00> : vector<128x256xf32>
    %4 = tpu.matmul %1, %3, %cst {dimension_numbers = #tpu.dot_dimension_numbers<[1], [0], [0], [1], [0, 0, 1, 1], [], []>} : vector<128x18xf32>, vector<18x256xf32>, vector<128x256xf32> -> vector<128x256xf32>
    %c0_5 = arith.constant 0 : index
    %c0_6 = arith.constant 0 : index
    %5 = vector.load %arg15[%c0_5, %c0_6] : memref<128x256xf32, #tpu.memory_space<vmem>>, vector<128x256xf32>
    tpu.vector_store %arg15[%c0_5, %c0_6], %4 {strides = array<i32>} : memref<128x256xf32, #tpu.memory_space<vmem>>, vector<128x256xf32>,
    %c0_7 = arith.constant 0 : index
    %c0_8 = arith.constant 0 : index
    %6 = vector.load %arg15[%c0_7, %c0_8] : memref<128x256xf32, #tpu.memory_space<vmem>>, vector<128x256xf32>
    %c0_9 = arith.constant 0 : index
    %c8 = arith.constant 8 : index
    %c0_10 = arith.constant 0 : index
    %7 = vector.load %arg1[%c0_9, %c8, %c0_10] : memref<1x144x18xf32, #tpu.memory_space<vmem>>, vector<1x128x18xf32>
    %8 = vector.shape_cast %7 : vector<1x128x18xf32> to vector<128x18xf32>
    %c1 = arith.constant 1 : index
    %c0_11 = arith.constant 0 : index
    %c0_12 = arith.constant 0 : index
    %9 = vector.load %arg2[%c1, %c0_11, %c0_12] : memref<3x18x256xf32, #tpu.memory_space<vmem>>, vector<1x18x256xf32>
    %10 = vector.shape_cast %9 : vector<1x18x256xf32> to vector<18x256xf32>
    %cst_13 = arith.constant dense<0.000000e+00> : vector<128x256xf32>
    %11 = tpu.matmul %8, %10, %cst_13 {dimension_numbers = #tpu.dot_dimension_numbers<[1], [0], [0], [1], [0, 0, 1, 1], [], []>} : vector<128x18xf32>, vector<18x256xf32>, vector<128x256xf32> -> vector<128x256xf32>
    %12 = arith.addf %6, %11 : vector<128x256xf32>
    %c0_14 = arith.constant 0 : index
    %c0_15 = arith.constant 0 : index
    %13 = vector.load %arg15[%c0_14, %c0_15] : memref<128x256xf32, #tpu.memory_space<vmem>>, vector<128x256xf32>
    tpu.vector_store %arg15[%c0_14, %c0_15], %12 {strides = array<i32>} : memref<128x256xf32, #tpu.memory_space<vmem>>, vector<128x256xf32>,
    %c0_16 = arith.constant 0 : index
    %c0_17 = arith.constant 0 : index
    %14 = vector.load %arg15[%c0_16, %c0_17] : memref<128x256xf32, #tpu.memory_space<vmem>>, vector<128x256xf32>
    %c0_18 = arith.constant 0 : index
    %c16 = arith.constant 16 : index
    %c0_19 = arith.constant 0 : index
    %15 = vector.load %arg1[%c0_18, %c16, %c0_19] : memref<1x144x18xf32, #tpu.memory_space<vmem>>, vector<1x128x18xf32>
    %16 = vector.shape_cast %15 : vector<1x128x18xf32> to vector<128x18xf32>
    %c2 = arith.constant 2 : index
    %c0_20 = arith.constant 0 : index
    %c0_21 = arith.constant 0 : index
    %17 = vector.load %arg2[%c2, %c0_20, %c0_21] : memref<3x18x256xf32, #tpu.memory_space<vmem>>, vector<1x18x256xf32>
    %18 = vector.shape_cast %17 : vector<1x18x256xf32> to vector<18x256xf32>
    %cst_22 = arith.constant dense<0.000000e+00> : vector<128x256xf32>
    %19 = tpu.matmul %16, %18, %cst_22 {dimension_numbers = #tpu.dot_dimension_numbers<[1], [0], [0], [1], [0, 0, 1, 1], [], []>} : vector<128x18xf32>, vector<18x256xf32>, vector<128x256xf32> -> vector<128x256xf32>
    %20 = arith.addf %14, %19 : vector<128x256xf32>
    %c0_23 = arith.constant 0 : index
    %c0_24 = arith.constant 0 : index
    %21 = vector.load %arg15[%c0_23, %c0_24] : memref<128x256xf32, #tpu.memory_space<vmem>>, vector<128x256xf32>
    tpu.vector_store %arg15[%c0_23, %c0_24], %20 {strides = array<i32>} : memref<128x256xf32, #tpu.memory_space<vmem>>, vector<128x256xf32>,
    %c0_25 = arith.constant 0 : index
    %c0_26 = arith.constant 0 : index
    %22 = vector.load %arg15[%c0_25, %c0_26] : memref<128x256xf32, #tpu.memory_space<vmem>>, vector<128x256xf32>
    %c0_27 = arith.constant 0 : index
    %c0_28 = arith.constant 0 : index
    %23 = vector.load %arg3[%c0_27, %c0_28] : memref<1x256xf32, #tpu.memory_space<vmem>>, vector<1x256xf32>
    %24 = vector.broadcast %23 : vector<1x256xf32> to vector<128x256xf32>
    %25 = arith.addf %22, %24 : vector<128x256xf32>
    %cst_29 = arith.constant 0.000000e+00 : f32
    %26 = vector.broadcast %cst_29 : f32 to vector<128x256xf32>
    %27 = arith.maximumf %25, %26 : vector<128x256xf32>
    %c0_30 = arith.constant 0 : index
    %c0_31 = arith.constant 0 : index
    %28 = vector.load %arg15[%c0_30, %c0_31] : memref<128x256xf32, #tpu.memory_space<vmem>>, vector<128x256xf32>
    tpu.vector_store %arg15[%c0_30, %c0_31], %27 {strides = array<i32>} : memref<128x256xf32, #tpu.memory_space<vmem>>, vector<128x256xf32>,
    %c0_32 = arith.constant 0 : index
    %c0_33 = arith.constant 0 : index
    %29 = vector.load %arg15[%c0_32, %c0_33] : memref<128x256xf32, #tpu.memory_space<vmem>>, vector<8x256xf32>
    %c8_34 = arith.constant 8 : index
    %c0_35 = arith.constant 0 : index
    %30 = vector.load %arg15[%c8_34, %c0_35] : memref<128x256xf32, #tpu.memory_space<vmem>>, vector<8x256xf32>
    %31 = arith.maximumf %29, %30 : vector<8x256xf32>
    %c0_36 = arith.constant 0 : index
    %c0_37 = arith.constant 0 : index
    %32 = vector.load %arg16[%c0_36, %c0_37] : memref<64x256xf32, #tpu.memory_space<vmem>>, vector<8x256xf32>
    tpu.vector_store %arg16[%c0_36, %c0_37], %31 {strides = array<i32>} : memref<64x256xf32, #tpu.memory_space<vmem>>, vector<8x256xf32>,
    %c16_38 = arith.constant 16 : index
    %c0_39 = arith.constant 0 : index
    %33 = vector.load %arg15[%c16_38, %c0_39] : memref<128x256xf32, #tpu.memory_space<vmem>>, vector<8x256xf32>
    %c24 = arith.constant 24 : index
    %c0_40 = arith.constant 0 : index
    %34 = vector.load %arg15[%c24, %c0_40] : memref<128x256xf32, #tpu.memory_space<vmem>>, vector<8x256xf32>
    %35 = arith.maximumf %33, %34 : vector<8x256xf32>
    %c8_41 = arith.constant 8 : index
    %c0_42 = arith.constant 0 : index
    %36 = vector.load %arg16[%c8_41, %c0_42] : memref<64x256xf32, #tpu.memory_space<vmem>>, vector<8x256xf32>
    tpu.vector_store %arg16[%c8_41, %c0_42], %35 {strides = array<i32>} : memref<64x256xf32, #tpu.memory_space<vmem>>, vector<8x256xf32>,
    %c32 = arith.constant 32 : index
    %c0_43 = arith.constant 0 : index
    %37 = vector.load %arg15[%c32, %c0_43] : memref<128x256xf32, #tpu.memory_space<vmem>>, vector<8x256xf32>
    %c40 = arith.constant 40 : index
    %c0_44 = arith.constant 0 : index
    %38 = vector.load %arg15[%c40, %c0_44] : memref<128x256xf32, #tpu.memory_space<vmem>>, vector<8x256xf32>
    %39 = arith.maximumf %37, %38 : vector<8x256xf32>
    %c16_45 = arith.constant 16 : index
    %c0_46 = arith.constant 0 : index
    %40 = vector.load %arg16[%c16_45, %c0_46] : memref<64x256xf32, #tpu.memory_space<vmem>>, vector<8x256xf32>
    tpu.vector_store %arg16[%c16_45, %c0_46], %39 {strides = array<i32>} : memref<64x256xf32, #tpu.memory_space<vmem>>, vector<8x256xf32>,
    %c48 = arith.constant 48 : index
    %c0_47 = arith.constant 0 : index
    %41 = vector.load %arg15[%c48, %c0_47] : memref<128x256xf32, #tpu.memory_space<vmem>>, vector<8x256xf32>
    %c56 = arith.constant 56 : index
    %c0_48 = arith.constant 0 : index
    %42 = vector.load %arg15[%c56, %c0_48] : memref<128x256xf32, #tpu.memory_space<vmem>>, vector<8x256xf32>
    %43 = arith.maximumf %41, %42 : vector<8x256xf32>
    %c24_49 = arith.constant 24 : index
    %c0_50 = arith.constant 0 : index
    %44 = vector.load %arg16[%c24_49, %c0_50] : memref<64x256xf32, #tpu.memory_space<vmem>>, vector<8x256xf32>
    tpu.vector_store %arg16[%c24_49, %c0_50], %43 {strides = array<i32>} : memref<64x256xf32, #tpu.memory_space<vmem>>, vector<8x256xf32>,
    %c64 = arith.constant 64 : index
    %c0_51 = arith.constant 0 : index
    %45 = vector.load %arg15[%c64, %c0_51] : memref<128x256xf32, #tpu.memory_space<vmem>>, vector<8x256xf32>
    %c72 = arith.constant 72 : index
    %c0_52 = arith.constant 0 : index
    %46 = vector.load %arg15[%c72, %c0_52] : memref<128x256xf32, #tpu.memory_space<vmem>>, vector<8x256xf32>
    %47 = arith.maximumf %45, %46 : vector<8x256xf32>
    %c32_53 = arith.constant 32 : index
    %c0_54 = arith.constant 0 : index
    %48 = vector.load %arg16[%c32_53, %c0_54] : memref<64x256xf32, #tpu.memory_space<vmem>>, vector<8x256xf32>
    tpu.vector_store %arg16[%c32_53, %c0_54], %47 {strides = array<i32>} : memref<64x256xf32, #tpu.memory_space<vmem>>, vector<8x256xf32>,
    %c80 = arith.constant 80 : index
    %c0_55 = arith.constant 0 : index
    %49 = vector.load %arg15[%c80, %c0_55] : memref<128x256xf32, #tpu.memory_space<vmem>>, vector<8x256xf32>
    %c88 = arith.constant 88 : index
    %c0_56 = arith.constant 0 : index
    %50 = vector.load %arg15[%c88, %c0_56] : memref<128x256xf32, #tpu.memory_space<vmem>>, vector<8x256xf32>
    %51 = arith.maximumf %49, %50 : vector<8x256xf32>
    %c40_57 = arith.constant 40 : index
    %c0_58 = arith.constant 0 : index
    %52 = vector.load %arg16[%c40_57, %c0_58] : memref<64x256xf32, #tpu.memory_space<vmem>>, vector<8x256xf32>
    tpu.vector_store %arg16[%c40_57, %c0_58], %51 {strides = array<i32>} : memref<64x256xf32, #tpu.memory_space<vmem>>, vector<8x256xf32>,
    %c96 = arith.constant 96 : index
    %c0_59 = arith.constant 0 : index
    %53 = vector.load %arg15[%c96, %c0_59] : memref<128x256xf32, #tpu.memory_space<vmem>>, vector<8x256xf32>
    %c104 = arith.constant 104 : index
    %c0_60 = arith.constant 0 : index
    %54 = vector.load %arg15[%c104, %c0_60] : memref<128x256xf32, #tpu.memory_space<vmem>>, vector<8x256xf32>
    %55 = arith.maximumf %53, %54 : vector<8x256xf32>
    %c48_61 = arith.constant 48 : index
    %c0_62 = arith.constant 0 : index
    %56 = vector.load %arg16[%c48_61, %c0_62] : memref<64x256xf32, #tpu.memory_space<vmem>>, vector<8x256xf32>
    tpu.vector_store %arg16[%c48_61, %c0_62], %55 {strides = array<i32>} : memref<64x256xf32, #tpu.memory_space<vmem>>, vector<8x256xf32>,
    %c112 = arith.constant 112 : index
    %c0_63 = arith.constant 0 : index
    %57 = vector.load %arg15[%c112, %c0_63] : memref<128x256xf32, #tpu.memory_space<vmem>>, vector<8x256xf32>
    %c120 = arith.constant 120 : index
    %c0_64 = arith.constant 0 : index
    %58 = vector.load %arg15[%c120, %c0_64] : memref<128x256xf32, #tpu.memory_space<vmem>>, vector<8x256xf32>
    %59 = arith.maximumf %57, %58 : vector<8x256xf32>
    %c56_65 = arith.constant 56 : index
    %c0_66 = arith.constant 0 : index
    %60 = vector.load %arg16[%c56_65, %c0_66] : memref<64x256xf32, #tpu.memory_space<vmem>>, vector<8x256xf32>
    tpu.vector_store %arg16[%c56_65, %c0_66], %59 {strides = array<i32>} : memref<64x256xf32, #tpu.memory_space<vmem>>, vector<8x256xf32>,
    %c0_67 = arith.constant 0 : index
    %c0_68 = arith.constant 0 : index
    %61 = vector.load %arg16[%c0_67, %c0_68] : memref<64x256xf32, #tpu.memory_space<vmem>>, vector<64x256xf32>
    %c0_69 = arith.constant 0 : index
    %c0_70 = arith.constant 0 : index
    %62 = vector.load %arg6[%c0_69, %c0_70] : memref<256x128xf32, #tpu.memory_space<vmem>>, vector<256x128xf32>
    %cst_71 = arith.constant dense<0.000000e+00> : vector<64x128xf32>
    %63 = tpu.matmul %61, %62, %cst_71 {dimension_numbers = #tpu.dot_dimension_numbers<[1], [0], [0], [1], [0, 0, 1, 1], [], []>} : vector<64x256xf32>, vector<256x128xf32>, vector<64x128xf32> -> vector<64x128xf32>
    %c0_72 = arith.constant 0 : index
    %c0_73 = arith.constant 0 : index
    %64 = vector.load %arg7[%c0_72, %c0_73] : memref<256x128xf32, #tpu.memory_space<vmem>>, vector<256x128xf32>
    %cst_74 = arith.constant dense<0.000000e+00> : vector<64x128xf32>
    %65 = tpu.matmul %61, %64, %cst_74 {dimension_numbers = #tpu.dot_dimension_numbers<[1], [0], [0], [1], [0, 0, 1, 1], [], []>} : vector<64x256xf32>, vector<256x128xf32>, vector<64x128xf32> -> vector<64x128xf32>
    %66 = arith.maximumf %63, %65 : vector<64x128xf32>
    %c0_75 = arith.constant 0 : index
    %c0_76 = arith.constant 0 : index
    %67 = vector.load %arg17[%c0_75, %c0_76] : memref<64x128xf32, #tpu.memory_space<vmem>>, vector<64x128xf32>
    tpu.vector_store %arg17[%c0_75, %c0_76], %66 {strides = array<i32>} : memref<64x128xf32, #tpu.memory_space<vmem>>, vector<64x128xf32>,
    %c0_77 = arith.constant 0 : index
    %c0_78 = arith.constant 0 : index
    %68 = vector.load %arg17[%c0_77, %c0_78] : memref<64x128xf32, #tpu.memory_space<vmem>>, vector<48x128xf32>
    %c0_79 = arith.constant 0 : index
    %c0_80 = arith.constant 0 : index
    %c0_81 = arith.constant 0 : index
    %69 = vector.load %arg4[%c0_79, %c0_80, %c0_81] : memref<3x128x192xf32, #tpu.memory_space<vmem>>, vector<1x128x192xf32>
    %70 = vector.shape_cast %69 : vector<1x128x192xf32> to vector<128x192xf32>
    %cst_82 = arith.constant dense<0.000000e+00> : vector<48x192xf32>
    %71 = tpu.matmul %68, %70, %cst_82 {dimension_numbers = #tpu.dot_dimension_numbers<[1], [0], [0], [1], [0, 0, 1, 1], [], []>} : vector<48x128xf32>, vector<128x192xf32>, vector<48x192xf32> -> vector<48x192xf32>
    %c0_83 = arith.constant 0 : index
    %c0_84 = arith.constant 0 : index
    %72 = vector.load %arg18[%c0_83, %c0_84] : memref<48x192xf32, #tpu.memory_space<vmem>>, vector<48x192xf32>
    tpu.vector_store %arg18[%c0_83, %c0_84], %71 {strides = array<i32>} : memref<48x192xf32, #tpu.memory_space<vmem>>, vector<48x192xf32>,
    %c0_85 = arith.constant 0 : index
    %c0_86 = arith.constant 0 : index
    %73 = vector.load %arg18[%c0_85, %c0_86] : memref<48x192xf32, #tpu.memory_space<vmem>>, vector<48x192xf32>
    %c8_87 = arith.constant 8 : index
    %c0_88 = arith.constant 0 : index
    %74 = vector.load %arg17[%c8_87, %c0_88] : memref<64x128xf32, #tpu.memory_space<vmem>>, vector<48x128xf32>
    %c1_89 = arith.constant 1 : index
    %c0_90 = arith.constant 0 : index
    %c0_91 = arith.constant 0 : index
    %75 = vector.load %arg4[%c1_89, %c0_90, %c0_91] : memref<3x128x192xf32, #tpu.memory_space<vmem>>, vector<1x128x192xf32>
    %76 = vector.shape_cast %75 : vector<1x128x192xf32> to vector<128x192xf32>
    %cst_92 = arith.constant dense<0.000000e+00> : vector<48x192xf32>
    %77 = tpu.matmul %74, %76, %cst_92 {dimension_numbers = #tpu.dot_dimension_numbers<[1], [0], [0], [1], [0, 0, 1, 1], [], []>} : vector<48x128xf32>, vector<128x192xf32>, vector<48x192xf32> -> vector<48x192xf32>
    %78 = arith.addf %73, %77 : vector<48x192xf32>
    %c0_93 = arith.constant 0 : index
    %c0_94 = arith.constant 0 : index
    %79 = vector.load %arg18[%c0_93, %c0_94] : memref<48x192xf32, #tpu.memory_space<vmem>>, vector<48x192xf32>
    tpu.vector_store %arg18[%c0_93, %c0_94], %78 {strides = array<i32>} : memref<48x192xf32, #tpu.memory_space<vmem>>, vector<48x192xf32>,
    %c0_95 = arith.constant 0 : index
    %c0_96 = arith.constant 0 : index
    %80 = vector.load %arg18[%c0_95, %c0_96] : memref<48x192xf32, #tpu.memory_space<vmem>>, vector<48x192xf32>
    %c16_97 = arith.constant 16 : index
    %c0_98 = arith.constant 0 : index
    %81 = vector.load %arg17[%c16_97, %c0_98] : memref<64x128xf32, #tpu.memory_space<vmem>>, vector<48x128xf32>
    %c2_99 = arith.constant 2 : index
    %c0_100 = arith.constant 0 : index
    %c0_101 = arith.constant 0 : index
    %82 = vector.load %arg4[%c2_99, %c0_100, %c0_101] : memref<3x128x192xf32, #tpu.memory_space<vmem>>, vector<1x128x192xf32>
    %83 = vector.shape_cast %82 : vector<1x128x192xf32> to vector<128x192xf32>
    %cst_102 = arith.constant dense<0.000000e+00> : vector<48x192xf32>
    %84 = tpu.matmul %81, %83, %cst_102 {dimension_numbers = #tpu.dot_dimension_numbers<[1], [0], [0], [1], [0, 0, 1, 1], [], []>} : vector<48x128xf32>, vector<128x192xf32>, vector<48x192xf32> -> vector<48x192xf32>
    %85 = arith.addf %80, %84 : vector<48x192xf32>
    %c0_103 = arith.constant 0 : index
    %c0_104 = arith.constant 0 : index
    %86 = vector.load %arg18[%c0_103, %c0_104] : memref<48x192xf32, #tpu.memory_space<vmem>>, vector<48x192xf32>
    tpu.vector_store %arg18[%c0_103, %c0_104], %85 {strides = array<i32>} : memref<48x192xf32, #tpu.memory_space<vmem>>, vector<48x192xf32>,
    %c0_105 = arith.constant 0 : index
    %c0_106 = arith.constant 0 : index
    %87 = vector.load %arg18[%c0_105, %c0_106] : memref<48x192xf32, #tpu.memory_space<vmem>>, vector<48x192xf32>
    %c0_107 = arith.constant 0 : index
    %c0_108 = arith.constant 0 : index
    %88 = vector.load %arg5[%c0_107, %c0_108] : memref<1x192xf32, #tpu.memory_space<vmem>>, vector<1x192xf32>
    %89 = vector.broadcast %88 : vector<1x192xf32> to vector<48x192xf32>
    %90 = arith.addf %87, %89 : vector<48x192xf32>
    %cst_109 = arith.constant 0.000000e+00 : f32
    %91 = vector.broadcast %cst_109 : f32 to vector<48x192xf32>
    %92 = arith.maximumf %90, %91 : vector<48x192xf32>
    %c0_110 = arith.constant 0 : index
    %c0_111 = arith.constant 0 : index
    %93 = vector.load %arg18[%c0_110, %c0_111] : memref<48x192xf32, #tpu.memory_space<vmem>>, vector<48x192xf32>
    tpu.vector_store %arg18[%c0_110, %c0_111], %92 {strides = array<i32>} : memref<48x192xf32, #tpu.memory_space<vmem>>, vector<48x192xf32>,
    %c0_112 = arith.constant 0 : index
    %c0_113 = arith.constant 0 : index
    %94 = vector.load %arg18[%c0_112, %c0_113] : memref<48x192xf32, #tpu.memory_space<vmem>>, vector<8x192xf32>
    %c8_114 = arith.constant 8 : index
    %c0_115 = arith.constant 0 : index
    %95 = vector.load %arg18[%c8_114, %c0_115] : memref<48x192xf32, #tpu.memory_space<vmem>>, vector<8x192xf32>
    %96 = arith.maximumf %94, %95 : vector<8x192xf32>
    %c0_116 = arith.constant 0 : index
    %c0_117 = arith.constant 0 : index
    %97 = vector.load %arg19[%c0_116, %c0_117] : memref<24x192xf32, #tpu.memory_space<vmem>>, vector<8x192xf32>
    tpu.vector_store %arg19[%c0_116, %c0_117], %96 {strides = array<i32>} : memref<24x192xf32, #tpu.memory_space<vmem>>, vector<8x192xf32>,
    %c16_118 = arith.constant 16 : index
    %c0_119 = arith.constant 0 : index
    %98 = vector.load %arg18[%c16_118, %c0_119] : memref<48x192xf32, #tpu.memory_space<vmem>>, vector<8x192xf32>
    %c24_120 = arith.constant 24 : index
    %c0_121 = arith.constant 0 : index
    %99 = vector.load %arg18[%c24_120, %c0_121] : memref<48x192xf32, #tpu.memory_space<vmem>>, vector<8x192xf32>
    %100 = arith.maximumf %98, %99 : vector<8x192xf32>
    %c8_122 = arith.constant 8 : index
    %c0_123 = arith.constant 0 : index
    %101 = vector.load %arg19[%c8_122, %c0_123] : memref<24x192xf32, #tpu.memory_space<vmem>>, vector<8x192xf32>
    tpu.vector_store %arg19[%c8_122, %c0_123], %100 {strides = array<i32>} : memref<24x192xf32, #tpu.memory_space<vmem>>, vector<8x192xf32>,
    %c32_124 = arith.constant 32 : index
    %c0_125 = arith.constant 0 : index
    %102 = vector.load %arg18[%c32_124, %c0_125] : memref<48x192xf32, #tpu.memory_space<vmem>>, vector<8x192xf32>
    %c40_126 = arith.constant 40 : index
    %c0_127 = arith.constant 0 : index
    %103 = vector.load %arg18[%c40_126, %c0_127] : memref<48x192xf32, #tpu.memory_space<vmem>>, vector<8x192xf32>
    %104 = arith.maximumf %102, %103 : vector<8x192xf32>
    %c16_128 = arith.constant 16 : index
    %c0_129 = arith.constant 0 : index
    %105 = vector.load %arg19[%c16_128, %c0_129] : memref<24x192xf32, #tpu.memory_space<vmem>>, vector<8x192xf32>
    tpu.vector_store %arg19[%c16_128, %c0_129], %104 {strides = array<i32>} : memref<24x192xf32, #tpu.memory_space<vmem>>, vector<8x192xf32>,
    %c0_130 = arith.constant 0 : index
    %c0_131 = arith.constant 0 : index
    %106 = vector.load %arg19[%c0_130, %c0_131] : memref<24x192xf32, #tpu.memory_space<vmem>>, vector<24x192xf32>
    %c0_132 = arith.constant 0 : index
    %c0_133 = arith.constant 0 : index
    %107 = vector.load %arg8[%c0_132, %c0_133] : memref<192x96xf32, #tpu.memory_space<vmem>>, vector<192x96xf32>
    %cst_134 = arith.constant dense<0.000000e+00> : vector<24x96xf32>
    %108 = tpu.matmul %106, %107, %cst_134 {dimension_numbers = #tpu.dot_dimension_numbers<[1], [0], [0], [1], [0, 0, 1, 1], [], []>} : vector<24x192xf32>, vector<192x96xf32>, vector<24x96xf32> -> vector<24x96xf32>
    %c0_135 = arith.constant 0 : index
    %c0_136 = arith.constant 0 : index
    %109 = vector.load %arg9[%c0_135, %c0_136] : memref<192x96xf32, #tpu.memory_space<vmem>>, vector<192x96xf32>
    %cst_137 = arith.constant dense<0.000000e+00> : vector<24x96xf32>
    %110 = tpu.matmul %106, %109, %cst_137 {dimension_numbers = #tpu.dot_dimension_numbers<[1], [0], [0], [1], [0, 0, 1, 1], [], []>} : vector<24x192xf32>, vector<192x96xf32>, vector<24x96xf32> -> vector<24x96xf32>
    %111 = arith.maximumf %108, %110 : vector<24x96xf32>
    %c0_138 = arith.constant 0 : index
    %c0_139 = arith.constant 0 : index
    %112 = vector.load %arg20[%c0_138, %c0_139] : memref<24x96xf32, #tpu.memory_space<vmem>>, vector<24x96xf32>
    tpu.vector_store %arg20[%c0_138, %c0_139], %111 {strides = array<i32>} : memref<24x96xf32, #tpu.memory_space<vmem>>, vector<24x96xf32>,
    %cst_140 = arith.constant 0.000000e+00 : f32
    %113 = vector.broadcast %cst_140 : f32 to vector<8x640xf32>
    %c0_141 = arith.constant 0 : index
    %c0_142 = arith.constant 0 : index
    %114 = vector.load %arg20[%c0_141, %c0_142] : memref<24x96xf32, #tpu.memory_space<vmem>>, vector<8x96xf32>
    %c0_143 = arith.constant 0 : index
    %c0_144 = arith.constant 0 : index
    %c0_145 = arith.constant 0 : index
    %115 = vector.load %arg10[%c0_143, %c0_144, %c0_145] : memref<3x96x640xf32, #tpu.memory_space<vmem>>, vector<1x96x640xf32>
    %116 = vector.shape_cast %115 : vector<1x96x640xf32> to vector<96x640xf32>
    %cst_146 = arith.constant dense<0.000000e+00> : vector<8x640xf32>
    %117 = tpu.matmul %114, %116, %cst_146 {dimension_numbers = #tpu.dot_dimension_numbers<[1], [0], [0], [1], [0, 0, 1, 1], [], []>} : vector<8x96xf32>, vector<96x640xf32>, vector<8x640xf32> -> vector<8x640xf32>
    %118 = arith.addf %113, %117 : vector<8x640xf32>
    %c8_147 = arith.constant 8 : index
    %c0_148 = arith.constant 0 : index
    %119 = vector.load %arg20[%c8_147, %c0_148] : memref<24x96xf32, #tpu.memory_space<vmem>>, vector<8x96xf32>
    %c1_149 = arith.constant 1 : index
    %c0_150 = arith.constant 0 : index
    %c0_151 = arith.constant 0 : index
    %120 = vector.load %arg10[%c1_149, %c0_150, %c0_151] : memref<3x96x640xf32, #tpu.memory_space<vmem>>, vector<1x96x640xf32>
    %121 = vector.shape_cast %120 : vector<1x96x640xf32> to vector<96x640xf32>
    %cst_152 = arith.constant dense<0.000000e+00> : vector<8x640xf32>
    %122 = tpu.matmul %119, %121, %cst_152 {dimension_numbers = #tpu.dot_dimension_numbers<[1], [0], [0], [1], [0, 0, 1, 1], [], []>} : vector<8x96xf32>, vector<96x640xf32>, vector<8x640xf32> -> vector<8x640xf32>
    %123 = arith.addf %118, %122 : vector<8x640xf32>
    %c16_153 = arith.constant 16 : index
    %c0_154 = arith.constant 0 : index
    %124 = vector.load %arg20[%c16_153, %c0_154] : memref<24x96xf32, #tpu.memory_space<vmem>>, vector<8x96xf32>
    %c2_155 = arith.constant 2 : index
    %c0_156 = arith.constant 0 : index
    %c0_157 = arith.constant 0 : index
    %125 = vector.load %arg10[%c2_155, %c0_156, %c0_157] : memref<3x96x640xf32, #tpu.memory_space<vmem>>, vector<1x96x640xf32>
    %126 = vector.shape_cast %125 : vector<1x96x640xf32> to vector<96x640xf32>
    %cst_158 = arith.constant dense<0.000000e+00> : vector<8x640xf32>
    %127 = tpu.matmul %124, %126, %cst_158 {dimension_numbers = #tpu.dot_dimension_numbers<[1], [0], [0], [1], [0, 0, 1, 1], [], []>} : vector<8x96xf32>, vector<96x640xf32>, vector<8x640xf32> -> vector<8x640xf32>
    %128 = arith.addf %123, %127 : vector<8x640xf32>
    %c0_159 = arith.constant 0 : index
    %c0_160 = arith.constant 0 : index
    %129 = vector.load %arg11[%c0_159, %c0_160] : memref<1x640xf32, #tpu.memory_space<vmem>>, vector<1x640xf32>
    %130 = vector.broadcast %129 : vector<1x640xf32> to vector<8x640xf32>
    %131 = arith.addf %128, %130 : vector<8x640xf32>
    %c0_161 = arith.constant 0 : index
    %c0_162 = arith.constant 0 : index
    %132 = vector.load %arg12[%c0_161, %c0_162] : memref<640x16xf32, #tpu.memory_space<vmem>>, vector<640x16xf32>
    %cst_163 = arith.constant dense<0.000000e+00> : vector<8x16xf32>
    %133 = tpu.matmul %131, %132, %cst_163 {dimension_numbers = #tpu.dot_dimension_numbers<[1], [0], [0], [1], [0, 0, 1, 1], [], []>} : vector<8x640xf32>, vector<640x16xf32>, vector<8x16xf32> -> vector<8x16xf32>
    %c0_164 = arith.constant 0 : index
    %c0_165 = arith.constant 0 : index
    %134 = vector.load %arg13[%c0_164, %c0_165] : memref<1x16xf32, #tpu.memory_space<vmem>>, vector<1x16xf32>
    %135 = vector.broadcast %134 : vector<1x16xf32> to vector<8x16xf32>
    %136 = arith.addf %133, %135 : vector<8x16xf32>
    %c0_166 = arith.constant 0 : index
    %c0_167 = arith.constant 0 : index
    %137 = vector.load %arg14[%c0_166, %c0_167] : memref<8x16xf32, #tpu.memory_space<vmem>>, vector<8x16xf32>
    tpu.vector_store %arg14[%c0_166, %c0_167], %136 {strides = array<i32>} : memref<8x16xf32, #tpu.memory_space<vmem>>, vector<8x16xf32>,
    return
  }
  func.func @transform_0(%arg0: i32) -> (i32, i32, i32) {
    %c0_i32 = arith.constant 0 : i32
    %c0_i32_0 = arith.constant 0 : i32
    %c0_i32_1 = arith.constant 0 : i32
    return %arg0, %c0_i32, %c0_i32_0 : i32, i32, i32
  }
  func.func @transform_1(%arg0: i32) -> (i32, i32, i32) {
    %c0_i32 = arith.constant 0 : i32
    %c0_i32_0 = arith.constant 0 : i32
    %c0_i32_1 = arith.constant 0 : i32
    %c0_i32_2 = arith.constant 0 : i32
    return %c0_i32, %c0_i32_0, %c0_i32_1 : i32, i32, i32
  }
  func.func @transform_2(%arg0: i32) -> (i32, i32) {
    %c0_i32 = arith.constant 0 : i32
    %c0_i32_0 = arith.constant 0 : i32
    %c0_i32_1 = arith.constant 0 : i32
    return %c0_i32, %c0_i32_0 : i32, i32
  }
  func.func @transform_3(%arg0: i32) -> (i32, i32, i32) {
    %c0_i32 = arith.constant 0 : i32
    %c0_i32_0 = arith.constant 0 : i32
    %c0_i32_1 = arith.constant 0 : i32
    %c0_i32_2 = arith.constant 0 : i32
    return %c0_i32, %c0_i32_0, %c0_i32_1 : i32, i32, i32
  }
  func.func @transform_4(%arg0: i32) -> (i32, i32) {
    %c0_i32 = arith.constant 0 : i32
    %c0_i32_0 = arith.constant 0 : i32
    %c0_i32_1 = arith.constant 0 : i32
    return %c0_i32, %c0_i32_0 : i32, i32
  }
  func.func @transform_5(%arg0: i32) -> (i32, i32) {
    %c0_i32 = arith.constant 0 : i32
    %c0_i32_0 = arith.constant 0 : i32
    %c0_i32_1 = arith.constant 0 : i32
    return %c0_i32, %c0_i32_0 : i32, i32
  }
  func.func @transform_6(%arg0: i32) -> (i32, i32) {
    %c0_i32 = arith.constant 0 : i32
    %c0_i32_0 = arith.constant 0 : i32
    %c0_i32_1 = arith.constant 0 : i32
    return %c0_i32, %c0_i32_0 : i32, i32
  }
  func.func @transform_7(%arg0: i32) -> (i32, i32) {
    %c0_i32 = arith.constant 0 : i32
    %c0_i32_0 = arith.constant 0 : i32
    %c0_i32_1 = arith.constant 0 : i32
    return %c0_i32, %c0_i32_0 : i32, i32
  }
  func.func @transform_8(%arg0: i32) -> (i32, i32) {
    %c0_i32 = arith.constant 0 : i32
    %c0_i32_0 = arith.constant 0 : i32
    %c0_i32_1 = arith.constant 0 : i32
    return %c0_i32, %c0_i32_0 : i32, i32
  }
  func.func @transform_9(%arg0: i32) -> (i32, i32, i32) {
    %c0_i32 = arith.constant 0 : i32
    %c0_i32_0 = arith.constant 0 : i32
    %c0_i32_1 = arith.constant 0 : i32
    %c0_i32_2 = arith.constant 0 : i32
    return %c0_i32, %c0_i32_0, %c0_i32_1 : i32, i32, i32
  }
  func.func @transform_10(%arg0: i32) -> (i32, i32) {
    %c0_i32 = arith.constant 0 : i32
    %c0_i32_0 = arith.constant 0 : i32
    %c0_i32_1 = arith.constant 0 : i32
    return %c0_i32, %c0_i32_0 : i32, i32
  }
  func.func @transform_11(%arg0: i32) -> (i32, i32) {
    %c0_i32 = arith.constant 0 : i32
    %c0_i32_0 = arith.constant 0 : i32
    %c0_i32_1 = arith.constant 0 : i32
    return %c0_i32, %c0_i32_0 : i32, i32
  }
  func.func @transform_12(%arg0: i32) -> (i32, i32) {
    %c0_i32 = arith.constant 0 : i32
    %c0_i32_0 = arith.constant 0 : i32
    %c0_i32_1 = arith.constant 0 : i32
    return %c0_i32, %c0_i32_0 : i32, i32
  }
  func.func @transform_13(%arg0: i32) -> (i32, i32) {
    %c0_i32 = arith.constant 0 : i32
    %c0_i32_0 = arith.constant 0 : i32
    return %arg0, %c0_i32 : i32, i32
  }
}

</mosaic_0001>

<bundles_post_ra>
// kernel: tpu_custom_call.1
= control target key start
LH: loop header
LB: loop body
LE: loop exit
PB: predicated region body
PF: predicated region fallthrough
CT: control target
= control target key end

     0   :  { %18 = vsyncpa [#allocation9], 0  ;;  %s6389_s0 = inlined_call_operand.vmem [shape: f32[1,144,18], index: 0, kind: input, shape index: {}]   ;;  %s6390_s1 = inlined_call_operand.hbm [shape: f32[3,18,256], index: 1, kind: input, shape index: {}]   ;;  %s6391_s2 = inlined_call_operand.vmem [shape: f32[1,256], index: 2, kind: input, shape index: {}]   ;;  %s6392_s3 = inlined_call_operand.vmem [shape: f32[3,128,192], index: 3, kind: input, shape index: {}]   ;;  %s6393_s4 = inlined_call_operand.vmem [shape: f32[1,192], index: 4, kind: input, shape index: {}]   ;;  %s6394_s5 = inlined_call_operand.vmem [shape: f32[256,128], index: 5, kind: input, shape index: {}]   ;;  %s6395_s6 = inlined_call_operand.vmem [shape: f32[256,128], index: 6, kind: input, shape index: {}]   ;;  %s6396_s7 = inlined_call_operand.vmem [shape: f32[192,96], index: 7, kind: input, shape index: {}]   ;;  %s6397_s8 = inlined_call_operand.hbm [shape: f32[192,96], index: 8, kind: input, shape index: {}]   ;;  %s6398_s9 = inlined_call_operand.vmem [shape: f32[3,96,640], index: 9, kind: input, shape index: {}]   ;;  %s6399_s10 = inlined_call_operand.vmem [shape: f32[1,640], index: 10, kind: input, shape index: {}]   ;;  %s6400_s11 = inlined_call_operand.vmem [shape: f32[640,16], index: 11, kind: input, shape index: {}]   ;;  %s6401_s12 = inlined_call_operand.vmem [shape: f32[1,16], index: 12, kind: input, shape index: {}]   ;;  %s6402_s13 = inlined_call_operand.hbm [shape: f32[8,16], index: 13, kind: output, shape index: {}]  }
   0x1   :  { %19 = vsyncpa [#allocation12], 0 }
   0x2   :  { %20 = vsyncpa [#allocation10], 0  ;;  %s4211_s25 = smov [#allocation8]  }
   0x3   :  { %s28_s26 = sshll.u32 %s4211_s25, 4  ;;  %s29_s26 = int_to_ptr.vmem [resolvable:$true] %s28_s26 }
   0x4   :  { %s4153_s27 = scalar_lea.vmem %s29_s26, 2304  ;;  %p4158_p1 = scmp.lt.s32.totalorder %s29_s26, %s29_s26 }
   0x5   :  { %p4154_p0 = scmp.ne.s32.totalorder %s29_s26, %s4153_s27  ;;  %p4159_p2 = scmp.lt.s32.totalorder %s4153_s27, %s4153_s27 }
   0x7   :  { %p4160_p3 = por %p4159_p2, %p4158_p1 }
   0x9   :  { %p4161_p4 = pnand %p4160_p3, %p4154_p0 }
   0xb   :  { %4164 = shalt.err (!%p4161_p4)
}
   0xc   :  { %s4212_s28 = smov 256   ;;  %s4213_s29 = smov 16  }
   0xd   :  { %34 = dma.hbm_to_vmem [thread:$0]  %s6390_s1, 2304, %s29_s26, [#allocation9], %s4212_s28, %s4212_s28, %s4213_s29  }
   0xe   :  { %s4214_s15 = smov [#allocation11]  }
   0xf   :  { %s52_s16 = sshll.u32 %s4214_s15, 4  ;;  %s53_s16 = int_to_ptr.vmem [resolvable:$true] %s52_s16 }
  0x10   :  { %s4173_s17 = scalar_lea.vmem %s53_s16, 3072  ;;  %p4178_p6 = scmp.lt.s32.totalorder %s53_s16, %s53_s16 }
  0x11   :  { %p4174_p5 = scmp.ne.s32.totalorder %s53_s16, %s4173_s17  ;;  %p4179_p7 = scmp.lt.s32.totalorder %s4173_s17, %s4173_s17 }
  0x13   :  { %p4180_p8 = por %p4179_p7, %p4178_p6 }
  0x15   :  { %p4181_p9 = pnand %p4180_p8, %p4174_p5 }
  0x17   :  { %4184 = shalt.err (!%p4181_p9)
}
  0x18   :  { %s4215_s18 = smov 128   ;;  %s4216_s19 = smov 8  }
  0x19   :  { %58 = dma.hbm_to_vmem [thread:$0]  %s6397_s8, 3072, %s53_s16, [#allocation12], %s4215_s18, %s4215_s18, %s4216_s19  }
  0x1a   :  { %4205 = dma.done.wait [#allocation9], 2304  }
  0x1b   :  { %4206 = vsyncadd [#allocation9], 4294964992 }
  0x1c   :  { %4207 = dma.done.wait [#allocation12], 3072  }
  0x1d   :  { %4208 = vsyncadd [#allocation12], 4294964224  ;;  %v6403_v0 = vmov 0.0   ;;  %vm144_vm0 = vcmask 1041408   ;;  %v94_v1 = vld [vmem:[#allocation8 + $0x28] sm:$0x3] }
  0x1e   :  { %215 = vmatprep.mubr.f32.mxu0 %v6403_v0  ;;  %535 = vmatprep.mubr.f32.mxu1 %v6403_v0  ;;  %v93_v2 = vld [vmem:[#allocation8 + $0x20] sm:$0x3]  ;;  %v92_v3 = vld [vmem:[#allocation8 + $0x18] sm:$0xff]  ;;  %v91_v4 = vld [vmem:[#allocation8 + $0x10] sm:$0xff]  ;;  %vm95_vm1 = vcmask 146432   ;;  %vm1662_vm2 = vcmask 523264  }
  0x1f   :  { %3522 = vmatprep.subr.msk.mxu0 %vm144_vm0, %v94_v1  ;;  %v90_v5 = vld [vmem:[#allocation8 + $0x8] sm:$0xff]  ;;  %v398_v6 = vld [vmem:[#allocation8 + $0x58] sm:$0x3]  ;;  %v397_v7 = vld [vmem:[#allocation8 + $0x50] sm:$0x3]  ;;  %vm4218_vm3 = vmmov 0  }
  0x20   :  { %3523 = vmatpush1.msk.msra.mxu0 %vm144_vm0, %v93_v2  ;;  %v89_v8 = vld [vmem:[#allocation8] sm:$0xff]  ;;  %4130 = vmatprep.subr.msk.mxu1 %vm144_vm0, %v398_v6  ;;  %v396_v9 = vld [vmem:[#allocation8 + $0x48] sm:$0xff]  ;;  %v73_v10 = vld [vmem:[%s6389_s0] sm:$0xff]  ;;  %vm2336_vm4 = vcmask 785408   ;;  %vm3504_vm5 = vcmask 130048  }
  0x21   :  { %179 = vmatprep.subr.mxu0 %v92_v3  ;;  %4133 = vmatpush1.msk.msra.mxu1 %vm144_vm0, %v397_v7  ;;  %v395_v11 = vld [vmem:[#allocation8 + $0x40] sm:$0xff]  ;;  %v394_v12 = vld [vmem:[#allocation8 + $0x38] sm:$0xff]  ;;  %v393_v13 = vld [vmem:[#allocation8 + $0x30] sm:$0xff] }
  0x22   :  { %180 = vmatpush1.msra.mxu0 %v91_v4  ;;  %4131 = vmatprep.subr.mxu1 %v396_v9  ;;  %v4312_v14 = vld [vmem:[%s6389_s0 + $0x8] sm:$0xff]  ;;  %v4317_v15 = vld [vmem:[%s6389_s0 + $0x20] sm:$0xff]  ;;  %v4327_v16 = vld [vmem:[%s6389_s0 + $0x10] sm:$0xff] }
  0x23   :  { %181 = vmatprep.subr.mxu0 %v90_v5  ;;  %4134 = vmatpush1.msra.mxu1 %v395_v11  ;;  %v4333_v17 = vld [vmem:[%s6389_s0 + $0x28] sm:$0xff]  ;;  %v732_v18 = vld [vmem:[#allocation8 + $0x88] sm:$0x3]  ;;  %v4343_v19 = vld [vmem:[%s6389_s0 + $0x18] sm:$0xff] }
  0x24   :  { %182 = vmatpush1.msra.mxu0 %v89_v8  ;;  %4132 = vmatprep.subr.mxu1 %v394_v12  ;;  %v4349_v20 = vld [vmem:[%s6389_s0 + $0x30] sm:$0xff]  ;;  %v4361_v21 = vld [vmem:[%s6389_s0 + $0x38] sm:$0xff]  ;;  %v4372_v22 = vld [vmem:[%s6389_s0 + $0x40] sm:$0xff] }
  0x25   :  { %3524 = vmatmul.mubr.msk.f32.vlgmr.msra.gmra.mxu0 %vm95_vm1, %v73_v10  ;;  %3540 = vmatprep.subr.msk.mxu0 %vm144_vm0, %v398_v6  ;;  %v4383_v23 = vld [vmem:[%s6389_s0 + $0x48] sm:$0xff]  ;;  %v4394_v24 = vld [vmem:[%s6389_s0 + $0x50] sm:$0xff]  ;;  %v4405_v25 = vld [vmem:[%s6389_s0 + $0x58] sm:$0xff] }
  0x26   :  { %3541 = vmatpush1.msk.msra.mxu0 %vm144_vm0, %v397_v7  ;;  %221 = vmatprep.mubr.f32.mxu0 %v6403_v0  ;;  %v4416_v26 = vld [vmem:[%s6389_s0 + $0x60] sm:$0xff]  ;;  %v388_v27 = vld [vmem:[%s6389_s0 + $0x68] sm:$0xff]  ;;  %v389_v28 = vld [vmem:[%s6389_s0 + $0x70] sm:$0xff] }
  0x27   :  { %481 = vmatprep.subr.mxu0 %v396_v9  ;;  %4135 = vmatpush1.msra.mxu1 %v393_v13  ;;  %v4443_v29 = vld [vmem:[%s6389_s0 + $0x78] sm:$0xff]  ;;  %v4454_v30 = vld [vmem:[%s6389_s0 + $0x80] sm:$0xff]  ;;  %v731_v31 = vld [vmem:[#allocation8 + $0x80] sm:$0x3] }
  0x28   :  { %482 = vmatpush1.msra.mxu0 %v395_v11  ;;  %3545 = vmatmul.mubr.msk.f32.vlgmr.msra.gmra.mxu1 %vm95_vm1, %v4317_v15  ;;  %v730_v32 = vld [vmem:[#allocation8 + $0x78] sm:$0xff]  ;;  %v729_v33 = vld [vmem:[#allocation8 + $0x70] sm:$0xff]  ;;  %v728_v34 = vld [vmem:[#allocation8 + $0x68] sm:$0xff] }
  0x29   :  { %3525 = vmatmul.mubr.msk.f32.gmra.mxu0 %vm95_vm1, %v4312_v14  ;;  %541 = vmatprep.mubr.f32.mxu1 %v6403_v0  ;;  %v727_v35 = vld [vmem:[#allocation8 + $0x60] sm:$0xff]  ;;  %v1263_v36 = vld [vmem:[%s6394_s5 + $0xf8] sm:$0xff]  ;;  %v1262_v38 = vld [vmem:[%s6394_s5 + $0xf0] sm:$0xff] }
  0x2a   :  { %227 = vmatprep.mubr.f32.mxu0 %v6403_v0  ;;  %483 = vmatprep.subr.mxu0 %v394_v12  ;;  %v1247_v37 = vld [vmem:[%s6394_s5 + $0x78] sm:$0xff]  ;;  %v1246_v39 = vld [vmem:[%s6394_s5 + $0x70] sm:$0xff]  ;;  %v1261_v40 = vld [vmem:[%s6394_s5 + $0xe8] sm:$0xff] }
  0x2b   :  { %484 = vmatpush1.msra.mxu0 %v393_v13  ;;  %3776 = vmatprep.subr.mxu1 %v1263_v36  ;;  %v1245_v41 = vld [vmem:[%s6394_s5 + $0x68] sm:$0xff]  ;;  %v1260_v42 = vld [vmem:[%s6394_s5 + $0xe0] sm:$0xff]  ;;  %v1259_v44 = vld [vmem:[%s6394_s5 + $0xd8] sm:$0xff] }
  0x2c   :  { %3546 = vmatmul.mubr.msk.f32.gmra.mxu1 %vm95_vm1, %v4333_v17  ;;  %3558 = vmatprep.subr.msk.mxu0 %vm144_vm0, %v732_v18  ;;  %v1244_v43 = vld [vmem:[%s6394_s5 + $0x60] sm:$0xff]  ;;  %v1243_v45 = vld [vmem:[%s6394_s5 + $0x58] sm:$0xff]  ;;  %v725_v46 = vld [vmem:[%s6389_s0 + $0x88] sm:$0xff] }
  0x2d   :  { %3526 = vmatmul.mubr.msk.f32.gmra.mxu0 %vm95_vm1, %v4327_v16  ;;  %547 = vmatprep.mubr.f32.mxu1 %v6403_v0  ;;  %v1258_v47 = vld [vmem:[%s6394_s5 + $0xd0] sm:$0xff]  ;;  %v1257_v49 = vld [vmem:[%s6394_s5 + $0xc8] sm:$0xff]  ;;  %v1256_v51 = vld [vmem:[%s6394_s5 + $0xc0] sm:$0xff] }
  0x2e   :  { %233 = vmatprep.mubr.f32.mxu0 %v6403_v0  ;;  %3777 = vmatpush3.msra.mxu1 %v1247_v37  ;;  %v1242_v48 = vld [vmem:[%s6394_s5 + $0x50] sm:$0xff]  ;;  %v1241_v50 = vld [vmem:[%s6394_s5 + $0x48] sm:$0xff]  ;;  %v1240_v52 = vld [vmem:[%s6394_s5 + $0x40] sm:$0xff] }
  0x2f   :  { %3778 = vmatprep.subr.mxu1 %v1262_v38  ;;  %v1255_v53 = vld [vmem:[%s6394_s5 + $0xb8] sm:$0xff]  ;;  %v1254_v55 = vld [vmem:[%s6394_s5 + $0xb0] sm:$0xff]  ;;  %v1253_v57 = vld [vmem:[%s6394_s5 + $0xa8] sm:$0xff] }
  0x30   :  { %3547 = vmatmul.mubr.msk.f32.gmra.mxu1 %vm95_vm1, %v4349_v20  ;;  %v1239_v54 = vld [vmem:[%s6394_s5 + $0x38] sm:$0xff]  ;;  %v1238_v56 = vld [vmem:[%s6394_s5 + $0x30] sm:$0xff]  ;;  %v1237_v58 = vld [vmem:[%s6394_s5 + $0x28] sm:$0xff] }
  0x31   :  { %3527 = vmatmul.mubr.msk.f32.gmra.mxu0 %vm95_vm1, %v4343_v19  ;;  %553 = vmatprep.mubr.f32.mxu1 %v6403_v0  ;;  %v1252_v59 = vld [vmem:[%s6394_s5 + $0xa0] sm:$0xff]  ;;  %v1251_v61 = vld [vmem:[%s6394_s5 + $0x98] sm:$0xff]  ;;  %v1250_v63 = vld [vmem:[%s6394_s5 + $0x90] sm:$0xff] }
  0x32   :  { %239 = vmatprep.mubr.f32.mxu0 %v6403_v0  ;;  %3779 = vmatpush3.msra.mxu1 %v1246_v39  ;;  %v1236_v60 = vld [vmem:[%s6394_s5 + $0x20] sm:$0xff]  ;;  %v1235_v62 = vld [vmem:[%s6394_s5 + $0x18] sm:$0xff]  ;;  %v1234_v1 = vld [vmem:[%s6394_s5 + $0x10] sm:$0xff] }
  0x33   :  { %3780 = vmatprep.subr.mxu1 %v1261_v40  ;;  %v1249_v2 = vld [vmem:[%s6394_s5 + $0x88] sm:$0xff]  ;;  %v1248_v4 = vld [vmem:[%s6394_s5 + $0x80] sm:$0xff]  ;;  %v1400_v6 = vld [vmem:[%s6395_s6 + $0xf8] sm:$0xff] }
  0x34   :  { %3548 = vmatmul.mubr.msk.f32.gmra.mxu1 %vm95_vm1, %v4361_v21  ;;  %v1233_v3 = vld [vmem:[%s6394_s5 + $0x8] sm:$0xff]  ;;  %v1232_v5 = vld [vmem:[%s6394_s5] sm:$0xff] }
  0x35   :  { %3528 = vmatmul.mubr.msk.f32.gmra.mxu0 %vm95_vm1, %v4317_v15  ;;  %559 = vmatprep.mubr.f32.mxu1 %v6403_v0 }
  0x36   :  { %245 = vmatprep.mubr.f32.mxu0 %v6403_v0  ;;  %3781 = vmatpush3.msra.mxu1 %v1245_v41 }
  0x37   :  { %3782 = vmatprep.subr.mxu1 %v1260_v42 }
  0x38   :  { %3549 = vmatmul.mubr.msk.f32.gmra.mxu1 %vm95_vm1, %v4372_v22 }
  0x39   :  { %3529 = vmatmul.mubr.msk.f32.gmra.mxu0 %vm95_vm1, %v4333_v17  ;;  %565 = vmatprep.mubr.f32.mxu1 %v6403_v0 }
  0x3a   :  { %251 = vmatprep.mubr.f32.mxu0 %v6403_v0  ;;  %3783 = vmatpush3.msra.mxu1 %v1244_v43 }
  0x3b   :  { %3784 = vmatprep.subr.mxu1 %v1259_v44 }
  0x3c   :  { %3550 = vmatmul.mubr.msk.f32.gmra.mxu1 %vm95_vm1, %v4383_v23 }
  0x3d   :  { %3530 = vmatmul.mubr.msk.f32.gmra.mxu0 %vm95_vm1, %v4349_v20  ;;  %571 = vmatprep.mubr.f32.mxu1 %v6403_v0 }
  0x3e   :  { %257 = vmatprep.mubr.f32.mxu0 %v6403_v0  ;;  %3785 = vmatpush3.msra.mxu1 %v1243_v45 }
  0x3f   :  { %3786 = vmatprep.subr.mxu1 %v1258_v47 }
  0x40   :  { %3551 = vmatmul.mubr.msk.f32.gmra.mxu1 %vm95_vm1, %v4394_v24 }
  0x41   :  { %3531 = vmatmul.mubr.msk.f32.gmra.mxu0 %vm95_vm1, %v4361_v21  ;;  %577 = vmatprep.mubr.f32.mxu1 %v6403_v0 }
  0x42   :  { %263 = vmatprep.mubr.f32.mxu0 %v6403_v0  ;;  %3787 = vmatpush3.msra.mxu1 %v1242_v48  ;;  %v1046_v48 = vlaneseq }
  0x43   :  { %3788 = vmatprep.subr.mxu1 %v1257_v49 }
  0x44   :  { %3552 = vmatmul.mubr.msk.f32.gmra.mxu1 %vm95_vm1, %v4405_v25 }
  0x45   :  { %3532 = vmatmul.mubr.msk.f32.gmra.mxu0 %vm95_vm1, %v4372_v22  ;;  %583 = vmatprep.mubr.f32.mxu1 %v6403_v0 }
  0x46   :  { %269 = vmatprep.mubr.f32.mxu0 %v6403_v0  ;;  %3789 = vmatpush3.msra.mxu1 %v1241_v50 }
  0x47   :  { %3790 = vmatprep.subr.mxu1 %v1256_v51 }
  0x48   :  { %3553 = vmatmul.mubr.msk.f32.gmra.mxu1 %vm95_vm1, %v4416_v26 }
  0x49   :  { %3533 = vmatmul.mubr.msk.f32.gmra.mxu0 %vm95_vm1, %v4383_v23  ;;  %589 = vmatprep.mubr.f32.mxu1 %v6403_v0 }
  0x4a   :  { %275 = vmatprep.mubr.f32.mxu0 %v6403_v0  ;;  %3791 = vmatpush3.msra.mxu1 %v1240_v52  ;;  %v4696_v52 = vshrl.u32 %v1046_v48, 7 }
  0x4b   :  { %3792 = vmatprep.subr.mxu1 %v1255_v53 }
  0x4c   :  { %3554 = vmatmul.mubr.msk.f32.gmra.mxu1 %vm95_vm1, %v388_v27  ;;  %6410 = vst [vmem:[#allocation18_spill] sm:$0xff] %v4696_v52 }
  0x4d   :  { %3534 = vmatmul.mubr.msk.f32.gmra.mxu0 %vm95_vm1, %v4394_v24  ;;  %595 = vmatprep.mubr.f32.mxu1 %v6403_v0 }
  0x4e   :  { %281 = vmatprep.mubr.f32.mxu0 %v6403_v0  ;;  %3793 = vmatpush3.msra.mxu1 %v1239_v54 }
  0x4f   :  { %3794 = vmatprep.subr.mxu1 %v1254_v55 }
  0x50   :  { %3555 = vmatmul.mubr.msk.f32.gmra.mxu1 %vm95_vm1, %v389_v28 }
  0x51   :  { %3535 = vmatmul.mubr.msk.f32.gmra.mxu0 %vm95_vm1, %v4405_v25  ;;  %601 = vmatprep.mubr.f32.mxu1 %v6403_v0 }
  0x52   :  { %287 = vmatprep.mubr.f32.mxu0 %v6403_v0  ;;  %3795 = vmatpush3.msra.mxu1 %v1238_v56  ;;  %v4701_v56 = vsub.s32 0, %v4696_v52 }
  0x53   :  { %3796 = vmatprep.subr.mxu1 %v1253_v57 }
  0x54   :  { %3556 = vmatmul.mubr.msk.f32.gmra.mxu1 %vm95_vm1, %v4443_v29  ;;  %6411 = vst [vmem:[#allocation19_spill] sm:$0xff] %v4701_v56 }
  0x55   :  { %3536 = vmatmul.mubr.msk.f32.gmra.mxu0 %vm95_vm1, %v4416_v26  ;;  %607 = vmatprep.mubr.f32.mxu1 %v6403_v0 }
  0x56   :  { %293 = vmatprep.mubr.f32.mxu0 %v6403_v0  ;;  %3797 = vmatpush3.msra.mxu1 %v1237_v58 }
  0x57   :  { %3798 = vmatprep.subr.mxu1 %v1252_v59  ;;  %v1044_v59 = vld [vmem:[%s6391_s2] sm:$0x3]  ;;  %s4219_s2 = smov [#allocation13]  }
  0x58   :  { %3557 = vmatmul.mubr.msk.f32.gmra.mxu1 %vm95_vm1, %v4454_v30  ;;  %s3512_s0 = sshll.u32 %s4219_s2, 4  ;;  %s3513_s0 = int_to_ptr.vmem [resolvable:$true] %s3512_s0 }
  0x59   :  { %3537 = vmatmul.mubr.msk.f32.gmra.mxu0 %vm95_vm1, %v388_v27  ;;  %3799 = vmatpush3.msra.mxu1 %v1236_v60  ;;  %s4185_s26 = scalar_lea.vmem %s3513_s0, 128  ;;  %p4190_p11 = scmp.lt.s32.totalorder %s3513_s0, %s3513_s0 }
  0x5a   :  { %299 = vmatprep.mubr.f32.mxu0 %v6403_v0  ;;  %3800 = vmatprep.subr.mxu1 %v1251_v61  ;;  %v4709_v61 = vsub.s32 1, %v4696_v52  ;;  %p4186_p10 = scmp.ne.s32.totalorder %s3513_s0, %s4185_s26  ;;  %p4191_p12 = scmp.lt.s32.totalorder %s4185_s26, %s4185_s26 }
  0x5b   :  { %3801 = vmatpush3.msra.mxu1 %v1235_v62 }
  0x5c   :  { %3802 = vmatprep.subr.mxu1 %v1250_v63  ;;  %v4717_v48 = vrot.slane %v1044_v59, %v4709_v61  ;;  %p4192_p13 = por %p4191_p12, %p4190_p11 }
  0x5d   :  { %3538 = vmatmul.mubr.msk.f32.gmra.mxu0 %vm95_vm1, %v389_v28  ;;  %3803 = vmatpush3.msra.mxu1 %v1234_v1 }
  0x5e   :  { %305 = vmatprep.mubr.f32.mxu0 %v6403_v0  ;;  %3804 = vmatprep.subr.mxu1 %v1249_v2  ;;  %v4712_v2 = vrot.slane %v1044_v59, %v4701_v56  ;;  %p4193_p0 = pnand %p4192_p13, %p4186_p10 }
  0x5f   :  { %3805 = vmatpush3.msra.mxu1 %v1233_v3 }
  0x60   :  { %3806 = vmatprep.subr.mxu1 %v1248_v4 }
  0x61   :  { %3539 = vmatmul.mubr.msk.f32.gmra.mxu0 %vm95_vm1, %v4443_v29  ;;  %3807 = vmatpush3.msra.mxu1 %v1232_v5 }
  0x62   :  { %517 = vmatprep.mubr.f32.mxu0 %v6403_v0  ;;  %3832 = vmatprep.subr.mxu1 %v1400_v6 }
  0x65   :  { %3542 = vmatmul.mubr.msk.f32.vlgmr.msra.gmra.mxu0 %vm95_vm1, %v4312_v14 }
  0x66   :  { %3559 = vmatpush1.msk.msra.mxu0 %vm144_vm0, %v731_v31  ;;  %523 = vmatprep.mubr.f32.mxu0 %v6403_v0 }
  0x67   :  { %815 = vmatprep.subr.mxu0 %v730_v32 }
  0x68   :  { %816 = vmatpush1.msra.mxu0 %v729_v33 }
  0x69   :  { %3543 = vmatmul.mubr.msk.f32.gmra.mxu0 %vm95_vm1, %v4327_v16  ;;  %817 = vmatprep.subr.mxu0 %v728_v34 }
  0x6a   :  { %529 = vmatprep.mubr.f32.mxu0 %v6403_v0  ;;  %818 = vmatpush1.msra.mxu0 %v727_v35 }
  0x6d   :  { %3544 = vmatmul.mubr.msk.f32.gmra.mxu0 %vm95_vm1, %v4343_v19 }
  0x6e   :  { %851 = vmatprep.mubr.f32.mxu0 %v6403_v0 }
  0x71   :  { %3560 = vmatmul.mubr.msk.f32.vlgmr.msra.gmra.mxu0 %vm95_vm1, %v4327_v16 }
  0x72   :  { %857 = vmatprep.mubr.f32.mxu0 %v6403_v0 }
  0x75   :  { %3561 = vmatmul.mubr.msk.f32.gmra.mxu0 %vm95_vm1, %v4343_v19 }
  0x76   :  { %863 = vmatprep.mubr.f32.mxu0 %v6403_v0 }
  0x79   :  { %3562 = vmatmul.mubr.msk.f32.gmra.mxu0 %vm95_vm1, %v4317_v15 }
  0x7a   :  { %869 = vmatprep.mubr.f32.mxu0 %v6403_v0 }
  0x7d   :  { %3563 = vmatmul.mubr.msk.f32.gmra.mxu0 %vm95_vm1, %v4333_v17 }
  0x7e   :  { %875 = vmatprep.mubr.f32.mxu0 %v6403_v0 }
  0x81   :  { %3564 = vmatmul.mubr.msk.f32.gmra.mxu0 %vm95_vm1, %v4349_v20 }
  0x82   :  { %881 = vmatprep.mubr.f32.mxu0 %v6403_v0 }
  0x85   :  { %3565 = vmatmul.mubr.msk.f32.gmra.mxu0 %vm95_vm1, %v4361_v21 }
  0x86   :  { %887 = vmatprep.mubr.f32.mxu0 %v6403_v0 }
  0x89   :  { %3566 = vmatmul.mubr.msk.f32.gmra.mxu0 %vm95_vm1, %v4372_v22 }
  0x8a   :  { %893 = vmatprep.mubr.f32.mxu0 %v6403_v0 }
  0x8d   :  { %3567 = vmatmul.mubr.msk.f32.gmra.mxu0 %vm95_vm1, %v4383_v23 }
  0x8e   :  { %899 = vmatprep.mubr.f32.mxu0 %v6403_v0 }
  0x91   :  { %3568 = vmatmul.mubr.msk.f32.gmra.mxu0 %vm95_vm1, %v4394_v24 }
  0x92   :  { %905 = vmatprep.mubr.f32.mxu0 %v6403_v0 }
  0x95   :  { %3569 = vmatmul.mubr.msk.f32.gmra.mxu0 %vm95_vm1, %v4405_v25 }
  0x96   :  { %911 = vmatprep.mubr.f32.mxu0 %v6403_v0 }
  0x99   :  { %3570 = vmatmul.mubr.msk.f32.gmra.mxu0 %vm95_vm1, %v4416_v26 }
  0x9a   :  { %917 = vmatprep.mubr.f32.mxu0 %v6403_v0 }
  0x9d   :  { %3571 = vmatmul.mubr.msk.f32.gmra.mxu0 %vm95_vm1, %v388_v27 }
  0x9e   :  { %923 = vmatprep.mubr.f32.mxu0 %v6403_v0 }
  0xa1   :  { %3572 = vmatmul.mubr.msk.f32.gmra.mxu0 %vm95_vm1, %v389_v28 }
  0xa2   :  { %929 = vmatprep.mubr.f32.mxu0 %v6403_v0 }
  0xa5   :  { %3573 = vmatmul.mubr.msk.f32.gmra.mxu0 %vm95_vm1, %v4443_v29 }
  0xa6   :  { %935 = vmatprep.mubr.f32.mxu0 %v6403_v0 }
  0xa9   :  { %3574 = vmatmul.mubr.msk.f32.gmra.mxu0 %vm95_vm1, %v4454_v30 }
  0xaa   :  { %941 = vmatprep.mubr.f32.mxu0 %v6403_v0 }
  0xad   :  { %3575 = vmatmul.mubr.msk.f32.gmra.mxu0 %vm95_vm1, %v725_v46 }
  0xae   :  { %1624 = vmatprep.mubr.f32.mxu0 %v6403_v0 }
  0xe5   :  { %v217_v7 = vpop.f32.mrf.mxu0 }
  0xe7   :  { %v219_v8 = vpop.f32.mrf.mxu0 }
  0xe8   :  { %v4648_v24 = vpop.f32.mrf.mxu1 }
  0xe9   :  { %v223_v9 = vpop.f32.mrf.mxu0 }
  0xea   :  { %v4654_v27 = vpop.f32.mrf.mxu1 }
  0xeb   :  { %v225_v10 = vpop.f32.mrf.mxu0 }
  0xec   :  { %v4660_v30 = vpop.f32.mrf.mxu1 }
  0xed   :  { %v4622_v11 = vpop.f32.mrf.mxu0 }
  0xee   :  { %v4666_v33 = vpop.f32.mrf.mxu1 }
  0xef   :  { %v4624_v12 = vpop.f32.mrf.mxu0 }
  0xf0   :  { %v4672_v36 = vpop.f32.mrf.mxu1 }
  0xf1   :  { %v4626_v13 = vpop.f32.mrf.mxu0 }
  0xf2   :  { %v4678_v39 = vpop.f32.mrf.mxu1 }
  0xf3   :  { %v4628_v14 = vpop.f32.mrf.mxu0 }
  0xf4   :  { %v4684_v42 = vpop.f32.mrf.mxu1 }
  0xf5   :  { %v4630_v15 = vpop.f32.mrf.mxu0 }
  0xf6   :  { %v4690_v45 = vpop.f32.mrf.mxu1 }
  0xf7   :  { %v4632_v16 = vpop.f32.mrf.mxu0 }
  0xf8   :  { %v4694_v49 = vpop.f32.mrf.mxu1 }
  0xf9   :  { %v4634_v17 = vpop.f32.mrf.mxu0 }
  0xfa   :  { %v4698_v53 = vpop.f32.mrf.mxu1 }
  0xfb   :  { %v4636_v18 = vpop.f32.mrf.mxu0 }
  0xfc   :  { %v4703_v57 = vpop.f32.mrf.mxu1 }
  0xfd   :  { %v4638_v19 = vpop.f32.mrf.mxu0 }
  0xfe   :  { %v4714_v3 = vpop.f32.mrf.mxu1 }
  0xff   :  { %v4640_v20 = vpop.f32.mrf.mxu0 }
 0x100   :  { %v4720_v52 = vpop.f32.mrf.mxu1 }
 0x101   :  { %v4642_v21 = vpop.f32.mrf.mxu0 }
 0x103   :  { %v4644_v22 = vpop.f32.mrf.mxu0 }
 0x105   :  { %v4646_v23 = vpop.f32.mrf.mxu0 }
 0x107   :  { %v4650_v25 = vpop.f32.mrf.mxu0 }
 0x109   :  { %v4652_v26 = vpop.f32.mrf.mxu0 }
 0x10b   :  { %v4656_v28 = vpop.f32.mrf.mxu0 }
 0x10d   :  { %v4658_v29 = vpop.f32.mrf.mxu0 }
 0x10f   :  { %v4662_v31 = vpop.f32.mrf.mxu0 }
 0x111   :  { %v4664_v32 = vpop.f32.mrf.mxu0 }
 0x113   :  { %v4668_v34 = vpop.f32.mrf.mxu0 }
 0x115   :  { %v4670_v35 = vpop.f32.mrf.mxu0 }
 0x117   :  { %v4674_v37 = vpop.f32.mrf.mxu0 }
 0x119   :  { %v4676_v38 = vpop.f32.mrf.mxu0 }
 0x11b   :  { %v4680_v40 = vpop.f32.mrf.mxu0 }
 0x11d   :  { %v4682_v41 = vpop.f32.mrf.mxu0 }
 0x11f   :  { %v4686_v43 = vpop.f32.mrf.mxu0 }
 0x121   :  { %v4688_v44 = vpop.f32.mrf.mxu0 }
 0x123   :  { %v4692_v46 = vpop.f32.mrf.mxu0 }
 0x124   :  { %6409 = vst [vmem:[#allocation17_spill] sm:$0xff] %v4692_v46 }
 0x125   :  { %v519_v47 = vpop.f32.mrf.mxu0 }
 0x126   :  { %v614_v60 = vadd.f32 %v519_v47, %v217_v7 }
 0x127   :  { %v521_v50 = vpop.f32.mrf.mxu0 }
 0x128   :  { %v615_v63 = vadd.f32 %v521_v50, %v219_v8 }
 0x129   :  { %v525_v51 = vpop.f32.mrf.mxu0 }
 0x12a   :  { %v616_v5 = vadd.f32 %v525_v51, %v223_v9 }
 0x12b   :  { %v527_v54 = vpop.f32.mrf.mxu0 }
 0x12c   :  { %v617_v46 = vadd.f32 %v527_v54, %v225_v10 }
 0x12d   :  { %v531_v55 = vpop.f32.mrf.mxu0 }
 0x12e   :  { %v618_v50 = vadd.f32 %v531_v55, %v4622_v11 }
 0x12f   :  { %v533_v58 = vpop.f32.mrf.mxu0 }
 0x130   :  { %v619_v9 = vadd.f32 %v533_v58, %v4624_v12  ;;  %v621_v12 = vadd.f32 %v4654_v27, %v4628_v14  ;;  %v1399_v27 = vld [vmem:[%s6395_s6 + $0xf0] sm:$0xff] }
 0x131   :  { %v853_v62 = vpop.f32.mrf.mxu0 }
 0x132   :  { %v948_v1 = vadd.f32 %v853_v62, %v614_v60 }
 0x133   :  { %v855_v4 = vpop.f32.mrf.mxu0 }
 0x134   :  { %v949_v6 = vadd.f32 %v855_v4, %v615_v63  ;;  %v1056_v7 = vadd.f32 %v4712_v2, %v948_v1  ;;  %v4729_v1 = vpop.f32.mrf.mxu1 }
 0x135   :  { %v859_v0 = vpop.f32.mrf.mxu0 }
 0x136   :  { %v950_v47 = vadd.f32 %v859_v0, %v616_v5  ;;  %v1057_v60 = vadd.f32 %v4717_v48, %v949_v6  ;;  %v1088_v59 = vmax.f32 %v1056_v7, 0.0  ;;  %v620_v0 = vadd.f32 %v4648_v24, %v4626_v13  ;;  %v1384_v24 = vld [vmem:[%s6395_s6 + $0x78] sm:$0xff] }
 0x137   :  { %v861_v8 = vpop.f32.mrf.mxu0 }
 0x138   :  { %v1058_v62 = vadd.f32 %v4712_v2, %v950_v47  ;;  %v951_v56 = vadd.f32 %v861_v8, %v617_v46  ;;  %v1089_v11 = vmax.f32 %v1057_v60, 0.0  ;;  %v4738_v47 = vpop.f32.mrf.mxu1  ;;  %v622_v8 = vadd.f32 %v4660_v30, %v4630_v15  ;;  %v1383_v15 = vld [vmem:[%s6395_s6 + $0x70] sm:$0xff] }
 0x139   :  { %v865_v51 = vpop.f32.mrf.mxu0 }
 0x13a   :  { %v1090_v63 = vmax.f32 %v1058_v62, 0.0  ;;  %v1059_v10 = vadd.f32 %v4717_v48, %v951_v56  ;;  %v952_v54 = vadd.f32 %v865_v51, %v618_v50  ;;  %v623_v62 = vadd.f32 %v4666_v33, %v4632_v16  ;;  %v4763_v33 = vpop.f32.mrf.mxu1 }
 0x13b   :  { %v867_v4 = vpop.f32.mrf.mxu0  ;;  %v624_v16 = vadd.f32 %v4672_v36, %v4634_v17  ;;  %v1381_v17 = vld [vmem:[%s6395_s6 + $0x60] sm:$0xff]  ;;  %v625_v36 = vadd.f32 %v4678_v39, %v4636_v18  ;;  %v1380_v18 = vld [vmem:[%s6395_s6 + $0x58] sm:$0xff] }
 0x13c   :  { %v4731_v55 = vmax.f32 %v1088_v59, %v1090_v63  ;;  %v1091_v5 = vmax.f32 %v1059_v10, 0.0  ;;  %v953_v6 = vadd.f32 %v867_v4, %v619_v9  ;;  %v1060_v58 = vadd.f32 %v4712_v2, %v952_v54  ;;  %v1398_v10 = vld [vmem:[%s6395_s6 + $0xe8] sm:$0xff] }
 0x13d   :  { %v871_v46 = vpop.f32.mrf.mxu0 }
 0x13e   :  { %v954_v7 = vadd.f32 %v871_v46, %v620_v0  ;;  %v4736_v56 = vmax.f32 %v1089_v11, %v1091_v5  ;;  %v1061_v50 = vadd.f32 %v4717_v48, %v953_v6  ;;  %v1092_v30 = vmax.f32 %v1060_v58, 0.0  ;;  %v1382_v0 = vld [vmem:[%s6395_s6 + $0x68] sm:$0xff]  ;;  %v1397_v46 = vld [vmem:[%s6395_s6 + $0xe0] sm:$0xff] }
 0x13f   :  { %v873_v13 = vpop.f32.mrf.mxu0 }
 0x140   :  { %v1062_v60 = vadd.f32 %v4712_v2, %v954_v7  ;;  %v955_v14 = vadd.f32 %v873_v13, %v621_v12  ;;  %1328 = vmatprep.mubr.f32.mxu1 %v4736_v56  ;;  %v1093_v4 = vmax.f32 %v1061_v50, 0.0  ;;  %v4786_v50 = vpop.f32.mrf.mxu1 }
 0x141   :  { %v877_v9 = vpop.f32.mrf.mxu0  ;;  %1329 = vmatmul.mubr.f32.vlgmr.msra.gmra.mxu1 %v4731_v55 }
 0x142   :  { %v1094_v51 = vmax.f32 %v1062_v60, 0.0  ;;  %v1063_v59 = vadd.f32 %v4717_v48, %v955_v14  ;;  %v956_v63 = vadd.f32 %v877_v9, %v622_v8  ;;  %3833 = vmatpush3.msra.mxu1 %v1384_v24  ;;  %v1396_v24 = vld [vmem:[%s6395_s6 + $0xd8] sm:$0xff]  ;;  %v626_v8 = vadd.f32 %v4684_v42, %v4638_v19  ;;  %v1395_v19 = vld [vmem:[%s6395_s6 + $0xd0] sm:$0xff] }
 0x143   :  { %v879_v54 = vpop.f32.mrf.mxu0  ;;  %3834 = vmatprep.subr.mxu1 %v1399_v27  ;;  %v627_v42 = vadd.f32 %v4690_v45, %v4640_v20  ;;  %v1379_v9 = vld [vmem:[%s6395_s6 + $0x50] sm:$0xff]  ;;  %v628_v20 = vadd.f32 %v4694_v49, %v4642_v21  ;;  %v4809_v45 = vpop.f32.mrf.mxu1  ;;  %v1377_v21 = vld [vmem:[%s6395_s6 + $0x40] sm:$0xff]  ;;  %v629_v49 = vadd.f32 %v4698_v53, %v4644_v22  ;;  %v1376_v22 = vld [vmem:[%s6395_s6 + $0x38] sm:$0xff] }
 0x144   :  { %v1095_v11 = vmax.f32 %v1063_v59, 0.0  ;;  %v957_v5 = vadd.f32 %v879_v54, %v623_v62  ;;  %v4768_v6 = vmax.f32 %v1092_v30, %v1094_v51  ;;  %3835 = vmatpush3.msra.mxu1 %v1383_v15  ;;  %v1064_v58 = vadd.f32 %v4712_v2, %v956_v63  ;;  %v1394_v63 = vld [vmem:[%s6395_s6 + $0xc8] sm:$0xff] }
 0x145   :  { %v883_v12 = vpop.f32.mrf.mxu0  ;;  %3836 = vmatprep.subr.mxu1 %v1398_v10 }
 0x146   :  { %v958_v7 = vadd.f32 %v883_v12, %v624_v16  ;;  %v4779_v13 = vmax.f32 %v1093_v4, %v1095_v11  ;;  %3837 = vmatpush3.msra.mxu1 %v1382_v0  ;;  %v1065_v39 = vadd.f32 %v4717_v48, %v957_v5  ;;  %v1096_v15 = vmax.f32 %v1064_v58, 0.0  ;;  %v1378_v16 = vld [vmem:[%s6395_s6 + $0x48] sm:$0xff]  ;;  %v1393_v5 = vld [vmem:[%s6395_s6 + $0xc0] sm:$0xff]  ;;  %v1392_v58 = vld [vmem:[%s6395_s6 + $0xb8] sm:$0xff] }
 0x147   :  { %v885_v60 = vpop.f32.mrf.mxu0  ;;  %3838 = vmatprep.subr.mxu1 %v1397_v46 }
 0x148   :  { %v1066_v14 = vadd.f32 %v4712_v2, %v958_v7  ;;  %v959_v27 = vadd.f32 %v885_v60, %v625_v36  ;;  %1333 = vmatprep.mubr.f32.mxu1 %v4779_v13  ;;  %3839 = vmatpush3.msra.mxu1 %v1381_v17  ;;  %v1097_v54 = vmax.f32 %v1065_v39, 0.0  ;;  %v630_v7 = vadd.f32 %v4703_v57, %v4646_v23  ;;  %v1391_v23 = vld [vmem:[%s6395_s6 + $0xb0] sm:$0xff] }
 0x149   :  { %v889_v62 = vpop.f32.mrf.mxu0  ;;  %1334 = vmatmul.mubr.f32.gmra.mxu1 %v4768_v6  ;;  %3840 = vmatprep.subr.mxu1 %v1396_v24  ;;  %v4832_v24 = vpop.f32.mrf.mxu1  ;;  %v631_v57 = vadd.f32 %v4714_v3, %v4650_v25  ;;  %v632_v25 = vadd.f32 %v4720_v52, %v4652_v26  ;;  %v1373_v26 = vld [vmem:[%s6395_s6 + $0x20] sm:$0xff]  ;;  %v633_v52 = vadd.f32 %v4729_v1, %v4656_v28  ;;  %v1372_v28 = vld [vmem:[%s6395_s6 + $0x18] sm:$0xff] }
 0x14a   :  { %v1098_v30 = vmax.f32 %v1066_v14, 0.0  ;;  %v1067_v51 = vadd.f32 %v4717_v48, %v959_v27  ;;  %v960_v59 = vadd.f32 %v889_v62, %v626_v8  ;;  %3841 = vmatpush3.msra.mxu1 %v1380_v18  ;;  %v1375_v14 = vld [vmem:[%s6395_s6 + $0x30] sm:$0xff] }
 0x14b   :  { %v891_v10 = vpop.f32.mrf.mxu0  ;;  %3842 = vmatprep.subr.mxu1 %v1395_v19  ;;  %v4855_v3 = vpop.f32.mrf.mxu1 }
 0x14c   :  { %v1099_v0 = vmax.f32 %v1067_v51, 0.0  ;;  %v961_v4 = vadd.f32 %v891_v10, %v627_v42  ;;  %v4814_v11 = vmax.f32 %v1096_v15, %v1098_v30  ;;  %3843 = vmatpush3.msra.mxu1 %v1379_v9  ;;  %v1068_v12 = vadd.f32 %v4712_v2, %v960_v59  ;;  %v1390_v9 = vld [vmem:[%s6395_s6 + $0xa8] sm:$0xff]  ;;  %v1389_v10 = vld [vmem:[%s6395_s6 + $0xa0] sm:$0xff] }
 0x14d   :  { %v895_v46 = vpop.f32.mrf.mxu0  ;;  %3844 = vmatprep.subr.mxu1 %v1394_v63  ;;  %v1374_v30 = vld [vmem:[%s6395_s6 + $0x28] sm:$0xff] }
 0x14e   :  { %v962_v17 = vadd.f32 %v895_v46, %v628_v20  ;;  %v4825_v36 = vmax.f32 %v1097_v54, %v1099_v0  ;;  %3845 = vmatpush3.msra.mxu1 %v1378_v16  ;;  %v1069_v53 = vadd.f32 %v4717_v48, %v961_v4  ;;  %v1100_v27 = vmax.f32 %v1068_v12, 0.0 }
 0x14f   :  { %v897_v8 = vpop.f32.mrf.mxu0  ;;  %3846 = vmatprep.subr.mxu1 %v1393_v5  ;;  %v1388_v5 = vld [vmem:[%s6395_s6 + $0x98] sm:$0xff]  ;;  %v634_v46 = vadd.f32 %v4738_v47, %v4658_v29  ;;  %v635_v29 = vadd.f32 %v4763_v33, %v4662_v31  ;;  %v636_v31 = vadd.f32 %v4786_v50, %v4664_v32  ;;  %v1369_v32 = vld [vmem:[%s6395_s6] sm:$0xff]  ;;  %v637_v50 = vadd.f32 %v4809_v45, %v4668_v34 }
 0x150   :  { %v1070_v60 = vadd.f32 %v4712_v2, %v962_v17  ;;  %v963_v18 = vadd.f32 %v897_v8, %v629_v49  ;;  %1338 = vmatprep.mubr.f32.mxu1 %v4825_v36  ;;  %3847 = vmatpush3.msra.mxu1 %v1377_v21  ;;  %v1101_v51 = vmax.f32 %v1069_v53, 0.0  ;;  %v597_v21 = vpop.f32.mrf.mxu1  ;;  %v639_v34 = vadd.f32 %v4855_v3, %v4674_v37 }
 0x151   :  { %v901_v39 = vpop.f32.mrf.mxu0  ;;  %1339 = vmatmul.mubr.f32.gmra.mxu1 %v4814_v11  ;;  %3848 = vmatprep.subr.mxu1 %v1392_v58  ;;  %v1387_v58 = vld [vmem:[%s6395_s6 + $0x90] sm:$0xff] }
 0x152   :  { %v1102_v19 = vmax.f32 %v1070_v60, 0.0  ;;  %v1071_v42 = vadd.f32 %v4717_v48, %v963_v18  ;;  %v964_v62 = vadd.f32 %v901_v39, %v630_v7  ;;  %3849 = vmatpush3.msra.mxu1 %v1376_v22  ;;  %v1371_v7 = vld [vmem:[%s6395_s6 + $0x10] sm:$0xff]  ;;  %v1386_v18 = vld [vmem:[%s6395_s6 + $0x88] sm:$0xff]  ;;  %v599_v33 = vpop.f32.mrf.mxu1 }
 0x153   :  { %v903_v15 = vpop.f32.mrf.mxu0  ;;  %3850 = vmatprep.subr.mxu1 %v1391_v23  ;;  %v641_v37 = vadd.f32 %v599_v33, %v4680_v40 }
 0x154   :  { %v1103_v59 = vmax.f32 %v1071_v42, 0.0  ;;  %v965_v63 = vadd.f32 %v903_v15, %v631_v57  ;;  %v4860_v20 = vmax.f32 %v1100_v27, %v1102_v19  ;;  %3851 = vmatpush3.msra.mxu1 %v1375_v14  ;;  %v1072_v54 = vadd.f32 %v4712_v2, %v964_v62  ;;  %v1370_v57 = vld [vmem:[%s6395_s6 + $0x8] sm:$0xff]  ;;  %v1385_v42 = vld [vmem:[%s6395_s6 + $0x80] sm:$0xff] }
 0x155   :  { %v907_v16 = vpop.f32.mrf.mxu0  ;;  %3852 = vmatprep.subr.mxu1 %v1390_v9 }
 0x156   :  { %v966_v0 = vadd.f32 %v907_v16, %v632_v25  ;;  %v4871_v4 = vmax.f32 %v1101_v51, %v1103_v59  ;;  %3853 = vmatpush3.msra.mxu1 %v1374_v30  ;;  %v1073_v1 = vadd.f32 %v4717_v48, %v965_v63  ;;  %v1104_v8 = vmax.f32 %v1072_v54, 0.0  ;;  %v603_v51 = vpop.f32.mrf.mxu1 }
 0x157   :  { %v909_v49 = vpop.f32.mrf.mxu0  ;;  %3854 = vmatprep.subr.mxu1 %v1389_v10  ;;  %v638_v30 = vadd.f32 %v4832_v24, %v4670_v35  ;;  %v640_v54 = vadd.f32 %v597_v21, %v4676_v38 }
 0x158   :  { %v1074_v12 = vadd.f32 %v4712_v2, %v966_v0  ;;  %v967_v17 = vadd.f32 %v909_v49, %v633_v52  ;;  %1343 = vmatprep.mubr.f32.mxu1 %v4871_v4  ;;  %3855 = vmatpush3.msra.mxu1 %v1373_v26  ;;  %v1105_v39 = vmax.f32 %v1073_v1, 0.0  ;;  %v605_v0 = vpop.f32.mrf.mxu1 }
 0x159   :  { %v913_v47 = vpop.f32.mrf.mxu0  ;;  %1344 = vmatmul.mubr.f32.gmra.mxu1 %v4860_v20  ;;  %3856 = vmatprep.subr.mxu1 %v1388_v5 }
 0x15a   :  { %v1106_v22 = vmax.f32 %v1074_v12, 0.0  ;;  %v1075_v53 = vadd.f32 %v4717_v48, %v967_v17  ;;  %v968_v60 = vadd.f32 %v913_v47, %v634_v46  ;;  %3857 = vmatpush3.msra.mxu1 %v1372_v28 }
 0x15b   :  { %v915_v23 = vpop.f32.mrf.mxu0  ;;  %3858 = vmatprep.subr.mxu1 %v1387_v58 }
 0x15c   :  { %v1107_v14 = vmax.f32 %v1075_v53, 0.0  ;;  %v969_v27 = vadd.f32 %v915_v23, %v635_v29  ;;  %v4902_v19 = vmax.f32 %v1104_v8, %v1106_v22  ;;  %3859 = vmatpush3.msra.mxu1 %v1371_v7  ;;  %v1076_v9 = vadd.f32 %v4712_v2, %v968_v60  ;;  %v609_v29 = vpop.f32.mrf.mxu1 }
 0x15d   :  { %v919_v62 = vpop.f32.mrf.mxu0  ;;  %3860 = vmatprep.subr.mxu1 %v1386_v18  ;;  %v642_v7 = vadd.f32 %v603_v51, %v4682_v41  ;;  %v643_v22 = vadd.f32 %v605_v0, %v4686_v43  ;;  %v644_v33 = vadd.f32 %v609_v29, %v4688_v44  ;;  %v1544_v0 = vld [vmem:[%s6392_s3 + $0x80] sm:$0xff]  ;;  %v1538_v29 = vld [vmem:[%s6392_s3 + $0x50] sm:$0xff] }
 0x15e   :  { %v970_v25 = vadd.f32 %v919_v62, %v636_v31  ;;  %v4913_v15 = vmax.f32 %v1105_v39, %v1107_v14  ;;  %3861 = vmatpush3.msra.mxu1 %v1370_v57  ;;  %v1077_v63 = vadd.f32 %v4717_v48, %v969_v27  ;;  %v1108_v26 = vmax.f32 %v1076_v9, 0.0  ;;  %v611_v41 = vpop.f32.mrf.mxu1  ;;  %v6412_v62 = vld [vmem:[#allocation17_spill] sm:$0xff] }
 0x15f   :  { %v921_v59 = vpop.f32.mrf.mxu0  ;;  %3862 = vmatprep.subr.mxu1 %v1385_v42 }
 0x160   :  { %v1078_v10 = vadd.f32 %v4712_v2, %v970_v25  ;;  %v971_v16 = vadd.f32 %v921_v59, %v637_v50  ;;  %1348 = vmatprep.mubr.f32.mxu1 %v4913_v15  ;;  %3863 = vmatpush3.msra.mxu1 %v1369_v32  ;;  %v1109_v46 = vmax.f32 %v1077_v63, 0.0  ;;  %v645_v32 = vadd.f32 %v611_v41, %v6412_v62  ;;  %v3594_v41 = vld [vmem:[%s6392_s3 + $0x190] sm:$0xff]  ;;  %v3589_v62 = vld [vmem:[%s6392_s3 + $0x168] sm:$0xff] }
 0x161   :  { %v925_v45 = vpop.f32.mrf.mxu0  ;;  %1349 = vmatmul.mubr.f32.gmra.mxu1 %v4902_v19 }
 0x162   :  { %v1110_v52 = vmax.f32 %v1078_v10, 0.0  ;;  %v1079_v35 = vadd.f32 %v4717_v48, %v971_v16  ;;  %v972_v24 = vadd.f32 %v925_v45, %v638_v30 }
 0x163   :  { %v927_v5 = vpop.f32.mrf.mxu0 }
 0x164   :  { %v1111_v49 = vmax.f32 %v1079_v35, 0.0  ;;  %v973_v28 = vadd.f32 %v927_v5, %v639_v34  ;;  %v4925_v1 = vmax.f32 %v1108_v26, %v1110_v52  ;;  %v1080_v3 = vadd.f32 %v4712_v2, %v972_v24  ;;  %v1547_v35 = vld [vmem:[%s6392_s3 + $0x98] sm:$0xff]  ;;  %v1546_v24 = vld [vmem:[%s6392_s3 + $0x90] sm:$0xff] }
 0x165   :  { %v931_v12 = vpop.f32.mrf.mxu0  ;;  %v6413_v52 = vmov 0.0   ;;  %v1543_v5 = vld [vmem:[%s6392_s3 + $0x78] sm:$0xff] }
 0x166   :  { %v974_v17 = vadd.f32 %v931_v12, %v640_v54  ;;  %v4929_v58 = vmax.f32 %v1109_v46, %v1111_v49  ;;  %v1081_v38 = vadd.f32 %v4717_v48, %v973_v28  ;;  %v1112_v40 = vmax.f32 %v1080_v3, 0.0  ;;  %v1545_v54 = vld [vmem:[%s6392_s3 + $0x88] sm:$0xff]  ;;  %v1542_v46 = vld [vmem:[%s6392_s3 + $0x70] sm:$0xff]  ;;  %v3607_v28 = vld [vmem:[%s6392_s3 + $0x1f8] sm:$0xff] }
 0x167   :  { %v933_v47 = vpop.f32.mrf.mxu0  ;;  %v1541_v49 = vld [vmem:[%s6392_s3 + $0x68] sm:$0xff]  ;;  %1725 = vmatprep.subr.mxu1 %v3607_v28  ;;  %v1540_v12 = vld [vmem:[%s6392_s3 + $0x60] sm:$0xff] }
 0x168   :  { %v1082_v21 = vadd.f32 %v4712_v2, %v974_v17  ;;  %v975_v8 = vadd.f32 %v933_v47, %v641_v37  ;;  %1353 = vmatprep.mubr.f32.mxu1 %v4929_v58  ;;  %v1113_v57 = vmax.f32 %v1081_v38, 0.0  ;;  %v3605_v37 = vld [vmem:[%s6392_s3 + $0x1e8] sm:$0xff]  ;;  %v3604_v3 = vld [vmem:[%s6392_s3 + $0x1e0] sm:$0xff]  ;;  %v3603_v17 = vld [vmem:[%s6392_s3 + $0x1d8] sm:$0xff] }
 0x169   :  { %v937_v53 = vpop.f32.mrf.mxu0  ;;  %1354 = vmatmul.mubr.f32.gmra.mxu1 %v4925_v1  ;;  %v3602_v47 = vld [vmem:[%s6392_s3 + $0x1d0] sm:$0xff]  ;;  %v3600_v38 = vld [vmem:[%s6392_s3 + $0x1c0] sm:$0xff] }
 0x16a   :  { %v1114_v60 = vmax.f32 %v1082_v21, 0.0  ;;  %v1083_v18 = vadd.f32 %v4717_v48, %v975_v8  ;;  %v976_v31 = vadd.f32 %v937_v53, %v642_v7  ;;  %v3601_v7 = vld [vmem:[%s6392_s3 + $0x1c8] sm:$0xff]  ;;  %v3599_v8 = vld [vmem:[%s6392_s3 + $0x1b8] sm:$0xff]  ;;  %v1536_v53 = vld [vmem:[%s6392_s3 + $0x40] sm:$0xff] }
 0x16b   :  { %v939_v23 = vpop.f32.mrf.mxu0  ;;  %v1537_v21 = vld [vmem:[%s6392_s3 + $0x48] sm:$0xff] }
 0x16c   :  { %v1115_v39 = vmax.f32 %v1083_v18, 0.0  ;;  %v977_v14 = vadd.f32 %v939_v23, %v643_v22  ;;  %v1204_v27 = vmax.f32 %v1112_v40, %v1114_v60  ;;  %v1084_v43 = vadd.f32 %v4712_v2, %v976_v31  ;;  %v3598_v22 = vld [vmem:[%s6392_s3 + $0x1b0] sm:$0xff]  ;;  %v3597_v40 = vld [vmem:[%s6392_s3 + $0x1a8] sm:$0xff]  ;;  %v3596_v60 = vld [vmem:[%s6392_s3 + $0x1a0] sm:$0xff] }
 0x16d   :  { %v943_v42 = vpop.f32.mrf.mxu0  ;;  %v3595_v18 = vld [vmem:[%s6392_s3 + $0x198] sm:$0xff]  ;;  %v3593_v23 = vld [vmem:[%s6392_s3 + $0x188] sm:$0xff] }
 0x16e   :  { %v978_v50 = vadd.f32 %v943_v42, %v644_v33  ;;  %v1205_v9 = vmax.f32 %v1113_v57, %v1115_v39  ;;  %v1085_v30 = vadd.f32 %v4717_v48, %v977_v14  ;;  %v1116_v44 = vmax.f32 %v1084_v43, 0.0  ;;  %v1535_v31 = vld [vmem:[%s6392_s3 + $0x38] sm:$0xff]  ;;  %v1534_v33 = vld [vmem:[%s6392_s3 + $0x30] sm:$0xff]  ;;  %v3592_v57 = vld [vmem:[%s6392_s3 + $0x180] sm:$0xff] }
 0x16f   :  { %v945_v25 = vpop.f32.mrf.mxu0  ;;  %v1533_v39 = vld [vmem:[%s6392_s3 + $0x28] sm:$0xff]  ;;  %v3591_v14 = vld [vmem:[%s6392_s3 + $0x178] sm:$0xff]  ;;  %v1532_v42 = vld [vmem:[%s6392_s3 + $0x20] sm:$0xff] }
 0x170   :  { %v1086_v51 = vadd.f32 %v4712_v2, %v978_v50  ;;  %v979_v59 = vadd.f32 %v945_v25, %v645_v32  ;;  %1358 = vmatprep.mubr.f32.mxu1 %v1205_v9  ;;  %v1117_v16 = vmax.f32 %v1085_v30, 0.0  ;;  %v1559_v2 = vld [vmem:[%s6392_s3 + $0xf8] sm:$0xff]  ;;  %v3588_v32 = vld [vmem:[%s6392_s3 + $0x160] sm:$0xff]  ;;  %v1530_v25 = vld [vmem:[%s6392_s3 + $0x10] sm:$0xff] }
 0x171   :  { %1359 = vmatmul.mubr.f32.gmra.mxu1 %v1204_v27  ;;  %1560 = vmatprep.subr.mxu0 %v1559_v2  ;;  %v3587_v43 = vld [vmem:[%s6392_s3 + $0x158] sm:$0xff]  ;;  %v3585_v30 = vld [vmem:[%s6392_s3 + $0x148] sm:$0xff]  ;;  %v3578_v2 = vld [vmem:[%s6392_s3 + $0x110] sm:$0xff] }
 0x172   :  { %v1118_v63 = vmax.f32 %v1086_v51, 0.0  ;;  %v1087_v10 = vadd.f32 %v4717_v48, %v979_v59  ;;  %v1558_v48 = vld [vmem:[%s6392_s3 + $0xf0] sm:$0xff]  ;;  %v1531_v50 = vld [vmem:[%s6392_s3 + $0x18] sm:$0xff]  ;;  %v3584_v51 = vld [vmem:[%s6392_s3 + $0x140] sm:$0xff] }
 0x173   :  { %1561 = vmatpush1.msra.mxu0 %v1558_v48  ;;  %v3583_v59 = vld [vmem:[%s6392_s3 + $0x138] sm:$0xff]  ;;  %v3577_v48 = vld [vmem:[%s6392_s3 + $0x108] sm:$0xff] }
 0x174   :  { %v1119_v34 = vmax.f32 %v1087_v10, 0.0  ;;  %v1212_v45 = vmax.f32 %v1116_v44, %v1118_v63  ;;  %v1529_v44 = vld [vmem:[%s6392_s3 + $0x8] sm:$0xff]  ;;  %v3582_v63 = vld [vmem:[%s6392_s3 + $0x130] sm:$0xff]  ;;  %v1528_v10 = vld [vmem:[%s6392_s3] sm:$0xff] }
 0x176   :  { %v1213_v26 = vmax.f32 %v1117_v16, %v1119_v34  ;;  %v3581_v16 = vld [vmem:[%s6392_s3 + $0x128] sm:$0xff]  ;;  %v3580_v34 = vld [vmem:[%s6392_s3 + $0x120] sm:$0xff] }
 0x178   :  { %1363 = vmatprep.mubr.f32.mxu1 %v1213_v26 }
 0x179   :  { %1364 = vmatmul.mubr.f32.gmra.mxu1 %v1212_v45 }
 0x17a   :  { %1465 = vmatprep.mubr.f32.mxu1 %v4736_v56  ;;  %v1557_v56 = vld [vmem:[%s6392_s3 + $0xe8] sm:$0xff] }
 0x17b   :  { %1562 = vmatprep.subr.mxu0 %v1557_v56  ;;  %v3576_v56 = vld [vmem:[%s6392_s3 + $0x100] sm:$0xff] }
 0x17d   :  { %1466 = vmatmul.mubr.f32.vlgmr.msra.gmra.mxu1 %v4731_v55  ;;  %v1556_v55 = vld [vmem:[%s6392_s3 + $0xe0] sm:$0xff] }
 0x17e   :  { %1470 = vmatprep.mubr.f32.mxu1 %v4779_v13  ;;  %1563 = vmatpush1.msra.mxu0 %v1556_v55  ;;  %v1554_v13 = vld [vmem:[%s6392_s3 + $0xd0] sm:$0xff] }
 0x181   :  { %1471 = vmatmul.mubr.f32.gmra.mxu1 %v4768_v6  ;;  %v1555_v6 = vld [vmem:[%s6392_s3 + $0xd8] sm:$0xff] }
 0x182   :  { %1475 = vmatprep.mubr.f32.mxu1 %v4825_v36  ;;  %1564 = vmatprep.subr.mxu0 %v1555_v6  ;;  %v1552_v36 = vld [vmem:[%s6392_s3 + $0xc0] sm:$0xff] }
 0x183   :  { %1565 = vmatpush1.msra.mxu0 %v1554_v13 }
 0x185   :  { %1476 = vmatmul.mubr.f32.gmra.mxu1 %v4814_v11  ;;  %v1553_v11 = vld [vmem:[%s6392_s3 + $0xc8] sm:$0xff] }
 0x186   :  { %1480 = vmatprep.mubr.f32.mxu1 %v4871_v4  ;;  %1566 = vmatprep.subr.mxu0 %v1553_v11  ;;  %v1550_v4 = vld [vmem:[%s6392_s3 + $0xb0] sm:$0xff] }
 0x187   :  { %1567 = vmatpush1.msra.mxu0 %v1552_v36 }
 0x189   :  { %1481 = vmatmul.mubr.f32.gmra.mxu1 %v4860_v20  ;;  %v1551_v20 = vld [vmem:[%s6392_s3 + $0xb8] sm:$0xff] }
 0x18a   :  { %1485 = vmatprep.mubr.f32.mxu1 %v4913_v15  ;;  %1568 = vmatprep.subr.mxu0 %v1551_v20  ;;  %v1548_v15 = vld [vmem:[%s6392_s3 + $0xa0] sm:$0xff] }
 0x18b   :  { %1569 = vmatpush1.msra.mxu0 %v1550_v4 }
 0x18d   :  { %1486 = vmatmul.mubr.f32.gmra.mxu1 %v4902_v19  ;;  %v1549_v19 = vld [vmem:[%s6392_s3 + $0xa8] sm:$0xff] }
 0x18e   :  { %1490 = vmatprep.mubr.f32.mxu1 %v4929_v58  ;;  %1570 = vmatprep.subr.mxu0 %v1549_v19  ;;  %v1539_v58 = vld [vmem:[%s6392_s3 + $0x58] sm:$0xff] }
 0x18f   :  { %1571 = vmatpush1.msra.mxu0 %v1548_v15 }
 0x190   :  { %1572 = vmatprep.subr.mxu0 %v1547_v35 }
 0x191   :  { %1491 = vmatmul.mubr.f32.gmra.mxu1 %v4925_v1  ;;  %1573 = vmatpush1.msra.mxu0 %v1546_v24  ;;  %v3606_v1 = vld [vmem:[%s6392_s3 + $0x1f0] sm:$0xff] }
 0x192   :  { %1495 = vmatprep.mubr.f32.mxu1 %v1205_v9  ;;  %1574 = vmatprep.subr.mxu0 %v1545_v54  ;;  %v3586_v9 = vld [vmem:[%s6392_s3 + $0x150] sm:$0xff] }
 0x193   :  { %1575 = vmatpush1.msra.mxu0 %v1544_v0  ;;  %1726 = vmatpush1.msra.mxu1 %v3606_v1 }
 0x194   :  { %1576 = vmatprep.subr.mxu0 %v1543_v5  ;;  %1727 = vmatprep.subr.mxu1 %v3605_v37 }
 0x195   :  { %1496 = vmatmul.mubr.f32.gmra.mxu1 %v1204_v27  ;;  %1577 = vmatpush1.msra.mxu0 %v1542_v46  ;;  %v3590_v27 = vld [vmem:[%s6392_s3 + $0x170] sm:$0xff] }
 0x196   :  { %1500 = vmatprep.mubr.f32.mxu1 %v1213_v26  ;;  %1578 = vmatprep.subr.mxu0 %v1541_v49  ;;  %v3579_v26 = vld [vmem:[%s6392_s3 + $0x118] sm:$0xff] }
 0x197   :  { %1579 = vmatpush1.msra.mxu0 %v1540_v12  ;;  %1728 = vmatpush1.msra.mxu1 %v3604_v3 }
 0x198   :  { %1729 = vmatprep.subr.mxu1 %v3603_v17  ;;  %1580 = vmatprep.subr.mxu0 %v1539_v58  ;;  %v3638_v58 = vld [vmem:[%s6392_s3 + $0x2f0] sm:$0xff] }
 0x199   :  { %1501 = vmatmul.mubr.f32.gmra.mxu1 %v1212_v45  ;;  %1581 = vmatpush1.msra.mxu0 %v1538_v29  ;;  %v3639_v45 = vld [vmem:[%s6392_s3 + $0x2f8] sm:$0xff] }
 0x19a   :  { %1789 = vmatprep.mubr.f32.mxu1 %v6413_v52  ;;  %1730 = vmatpush1.msra.mxu1 %v3602_v47  ;;  %v3637_v47 = vld [vmem:[%s6392_s3 + $0x2e8] sm:$0xff] }
 0x19b   :  { %1731 = vmatprep.subr.mxu1 %v3601_v7  ;;  %1582 = vmatprep.subr.mxu0 %v1537_v21  ;;  %v3636_v21 = vld [vmem:[%s6392_s3 + $0x2e0] sm:$0xff] }
 0x19c   :  { %1732 = vmatpush1.msra.mxu1 %v3600_v38  ;;  %1583 = vmatpush1.msra.mxu0 %v1536_v53 }
 0x19d   :  { %1733 = vmatprep.subr.mxu1 %v3599_v8  ;;  %1584 = vmatprep.subr.mxu0 %v1535_v31 }
 0x19e   :  { %1734 = vmatpush1.msra.mxu1 %v3598_v22  ;;  %1585 = vmatpush1.msra.mxu0 %v1534_v33  ;;  %v3635_v22 = vld [vmem:[%s6392_s3 + $0x2d8] sm:$0xff] }
 0x19f   :  { %1735 = vmatprep.subr.mxu1 %v3597_v40  ;;  %1586 = vmatprep.subr.mxu0 %v1533_v39  ;;  %v3634_v40 = vld [vmem:[%s6392_s3 + $0x2d0] sm:$0xff] }
 0x1a0   :  { %1736 = vmatpush1.msra.mxu1 %v3596_v60  ;;  %1587 = vmatpush1.msra.mxu0 %v1532_v42  ;;  %v3629_v42 = vld [vmem:[%s6392_s3 + $0x2a8] sm:$0xff] }
 0x1a1   :  { %1737 = vmatprep.subr.mxu1 %v3595_v18  ;;  %1588 = vmatprep.subr.mxu0 %v1531_v50  ;;  %v3633_v18 = vld [vmem:[%s6392_s3 + $0x2c8] sm:$0xff] }
 0x1a2   :  { %1738 = vmatpush1.msra.mxu1 %v3594_v41  ;;  %1589 = vmatpush1.msra.mxu0 %v1530_v25  ;;  %v3632_v41 = vld [vmem:[%s6392_s3 + $0x2c0] sm:$0xff] }
 0x1a3   :  { %1739 = vmatprep.subr.mxu1 %v3593_v23  ;;  %1590 = vmatprep.subr.mxu0 %v1529_v44 }
 0x1a4   :  { %1740 = vmatpush1.msra.mxu1 %v3592_v57  ;;  %1591 = vmatpush1.msra.mxu0 %v1528_v10  ;;  %v3631_v57 = vld [vmem:[%s6392_s3 + $0x2b8] sm:$0xff]  ;;  %v3624_v10 = vld [vmem:[%s6392_s3 + $0x280] sm:$0xff] }
 0x1a5   :  { %1741 = vmatprep.subr.mxu1 %v3591_v14  ;;  %1901 = vmatprep.subr.mxu0 %v3639_v45  ;;  %v3630_v14 = vld [vmem:[%s6392_s3 + $0x2b0] sm:$0xff] }
 0x1a6   :  { %1742 = vmatpush1.msra.mxu1 %v3590_v27 }
 0x1a7   :  { %1743 = vmatprep.subr.mxu1 %v3589_v62 }
 0x1a8   :  { %1744 = vmatpush1.msra.mxu1 %v3588_v32 }
 0x1a9   :  { %1745 = vmatprep.subr.mxu1 %v3587_v43  ;;  %v3628_v43 = vld [vmem:[%s6392_s3 + $0x2a0] sm:$0xff] }
 0x1aa   :  { %1746 = vmatpush1.msra.mxu1 %v3586_v9  ;;  %v3627_v9 = vld [vmem:[%s6392_s3 + $0x298] sm:$0xff] }
 0x1ab   :  { %1747 = vmatprep.subr.mxu1 %v3585_v30  ;;  %v3626_v30 = vld [vmem:[%s6392_s3 + $0x290] sm:$0xff] }
 0x1ac   :  { %1748 = vmatpush1.msra.mxu1 %v3584_v51 }
 0x1ad   :  { %1749 = vmatprep.subr.mxu1 %v3583_v59  ;;  %v3625_v59 = vld [vmem:[%s6392_s3 + $0x288] sm:$0xff] }
 0x1ae   :  { %1750 = vmatpush1.msra.mxu1 %v3582_v63 }
 0x1af   :  { %1751 = vmatprep.subr.mxu1 %v3581_v16 }
 0x1b0   :  { %1752 = vmatpush1.msra.mxu1 %v3580_v34  ;;  %v3623_v34 = vld [vmem:[%s6392_s3 + $0x278] sm:$0xff] }
 0x1b1   :  { %1753 = vmatprep.subr.mxu1 %v3579_v26  ;;  %v3622_v26 = vld [vmem:[%s6392_s3 + $0x270] sm:$0xff] }
 0x1b2   :  { %1754 = vmatpush1.msra.mxu1 %v3578_v2 }
 0x1b3   :  { %1755 = vmatprep.subr.mxu1 %v3577_v48  ;;  %v3621_v48 = vld [vmem:[%s6392_s3 + $0x268] sm:$0xff] }
 0x1b4   :  { %1756 = vmatpush1.msra.mxu1 %v3576_v56 }
 0x1b5   :  { %2149 = vmatprep.subr.mxu1 %v6413_v52 }
 0x201   :  { %v3808_v55 = vpop.f32.mrf.mxu1 }
 0x203   :  { %v3809_v6 = vpop.f32.mrf.mxu1 }
 0x204   :  { %v3810_v12 = vadd.f32 %v3809_v6, %v3808_v55  ;;  %v3620_v6 = vld [vmem:[%s6392_s3 + $0x260] sm:$0xff] }
 0x209   :  { %v3811_v13 = vpop.f32.mrf.mxu1 }
 0x20b   :  { %v3812_v11 = vpop.f32.mrf.mxu1 }
 0x20c   :  { %v3813_v7 = vadd.f32 %v3812_v11, %v3811_v13  ;;  %v3619_v11 = vld [vmem:[%s6392_s3 + $0x258] sm:$0xff] }
 0x211   :  { %v3814_v36 = vpop.f32.mrf.mxu1 }
 0x213   :  { %v3815_v20 = vpop.f32.mrf.mxu1 }
 0x214   :  { %v3816_v31 = vadd.f32 %v3815_v20, %v3814_v36  ;;  %v3618_v20 = vld [vmem:[%s6392_s3 + $0x250] sm:$0xff] }
 0x219   :  { %v3817_v4 = vpop.f32.mrf.mxu1 }
 0x21b   :  { %v3818_v19 = vpop.f32.mrf.mxu1 }
 0x21c   :  { %v3819_v62 = vadd.f32 %v3818_v19, %v3817_v4  ;;  %v3617_v19 = vld [vmem:[%s6392_s3 + $0x248] sm:$0xff] }
 0x221   :  { %v5153_v15 = vpop.f32.mrf.mxu1 }
 0x223   :  { %v5155_v35 = vpop.f32.mrf.mxu1 }
 0x224   :  { %v3822_v44 = vadd.f32 %v5155_v35, %v5153_v15 }
 0x229   :  { %v5157_v24 = vpop.f32.mrf.mxu1 }
 0x22b   :  { %v5159_v54 = vpop.f32.mrf.mxu1 }
 0x22c   :  { %v3825_v56 = vadd.f32 %v5159_v54, %v5157_v24  ;;  %v3616_v24 = vld [vmem:[%s6392_s3 + $0x240] sm:$0xff]  ;;  %v3615_v54 = vld [vmem:[%s6392_s3 + $0x238] sm:$0xff] }
 0x231   :  { %v5161_v0 = vpop.f32.mrf.mxu1 }
 0x233   :  { %v5163_v5 = vpop.f32.mrf.mxu1 }
 0x234   :  { %v3828_v15 = vadd.f32 %v5163_v5, %v5161_v0  ;;  %v3614_v0 = vld [vmem:[%s6392_s3 + $0x230] sm:$0xff]  ;;  %v3613_v5 = vld [vmem:[%s6392_s3 + $0x228] sm:$0xff] }
 0x239   :  { %v5165_v46 = vpop.f32.mrf.mxu1 }
 0x23b   :  { %v5167_v49 = vpop.f32.mrf.mxu1 }
 0x23d   :  { %v3864_v28 = vpop.f32.mrf.mxu1 }
 0x23f   :  { %v3865_v1 = vpop.f32.mrf.mxu1 }
 0x240   :  { %v3866_v37 = vadd.f32 %v3865_v1, %v3864_v28  ;;  %v3612_v1 = vld [vmem:[%s6392_s3 + $0x220] sm:$0xff] }
 0x241   :  { %v3867_v3 = vpop.f32.mrf.mxu1 }
 0x242   :  { %v1506_v17 = vmax.f32 %v3810_v12, %v3866_v37  ;;  %v3611_v12 = vld [vmem:[%s6392_s3 + $0x218] sm:$0xff]  ;;  %v3610_v37 = vld [vmem:[%s6392_s3 + $0x210] sm:$0xff] }
 0x243   :  { %v3868_v29 = vpop.f32.mrf.mxu1 }
 0x244   :  { %v3869_v38 = vadd.f32 %v3868_v29, %v3867_v3  ;;  %1625 = vmatmul.mubr.f32.vlgmr.msra.gmra.mxu0 %v1506_v17  ;;  %v3609_v3 = vld [vmem:[%s6392_s3 + $0x208] sm:$0xff]  ;;  %v3608_v17 = vld [vmem:[%s6392_s3 + $0x200] sm:$0xff] }
 0x245   :  { %1902 = vmatpush1.msra.mxu0 %v3638_v58  ;;  %v3870_v8 = vpop.f32.mrf.mxu1  ;;  %1630 = vmatprep.mubr.f32.mxu0 %v6413_v52 }
 0x246   :  { %v1507_v53 = vmax.f32 %v3813_v7, %v3869_v38  ;;  %1903 = vmatprep.subr.mxu0 %v3637_v47  ;;  %v3831_v7 = vadd.f32 %v5167_v49, %v5165_v46  ;;  %v2130_v46 = vld [vmem:[%s6396_s7 + $0x70] sm:$0xff]  ;;  %v2243_v49 = vld [vmem:[#allocation11 + $0x70] sm:$0xff] }
 0x247   :  { %1904 = vmatpush1.msra.mxu0 %v3636_v21  ;;  %v3871_v60 = vpop.f32.mrf.mxu1  ;;  %v2131_v21 = vld [vmem:[%s6396_s7 + $0x78] sm:$0xff] }
 0x248   :  { %v3872_v33 = vadd.f32 %v3871_v60, %v3870_v8  ;;  %1905 = vmatprep.subr.mxu0 %v3635_v22  ;;  %1631 = vmatmul.mubr.f32.gmra.mxu0 %v1507_v53  ;;  %v2244_v8 = vld [vmem:[#allocation11 + $0x78] sm:$0xff]  ;;  %v2129_v22 = vld [vmem:[%s6396_s7 + $0x68] sm:$0xff]  ;;  %v2241_v60 = vld [vmem:[#allocation11 + $0x60] sm:$0xff] }
 0x249   :  { %1790 = vmatmul.mubr.f32.vlgmr.msra.gmra.mxu1 %v1507_v53  ;;  %1906 = vmatpush1.msra.mxu0 %v3634_v40  ;;  %v3873_v23 = vpop.f32.mrf.mxu1  ;;  %v2242_v53 = vld [vmem:[#allocation11 + $0x68] sm:$0xff] }
 0x24a   :  { %v5194_v39 = vmax.f32 %v3816_v31, %v3872_v33  ;;  %1907 = vmatprep.subr.mxu0 %v3633_v18  ;;  %1636 = vmatprep.mubr.f32.mxu0 %v6413_v52  ;;  %v2128_v40 = vld [vmem:[%s6396_s7 + $0x60] sm:$0xff]  ;;  %v2127_v18 = vld [vmem:[%s6396_s7 + $0x58] sm:$0xff]  ;;  %v2240_v31 = vld [vmem:[#allocation11 + $0x58] sm:$0xff] }
 0x24b   :  { %1908 = vmatpush1.msra.mxu0 %v3632_v41  ;;  %v3874_v27 = vpop.f32.mrf.mxu1  ;;  %1795 = vmatprep.mubr.f32.mxu1 %v6413_v52  ;;  %v2126_v33 = vld [vmem:[%s6396_s7 + $0x50] sm:$0xff]  ;;  %v2239_v41 = vld [vmem:[#allocation11 + $0x50] sm:$0xff] }
 0x24c   :  { %v3875_v32 = vadd.f32 %v3874_v27, %v3873_v23  ;;  %1909 = vmatprep.subr.mxu0 %v3631_v57  ;;  %1637 = vmatmul.mubr.f32.gmra.mxu0 %v5194_v39  ;;  %v2125_v23 = vld [vmem:[%s6396_s7 + $0x48] sm:$0xff]  ;;  %v2238_v57 = vld [vmem:[#allocation11 + $0x48] sm:$0xff]  ;;  %v2123_v27 = vld [vmem:[%s6396_s7 + $0x38] sm:$0xff] }
 0x24d   :  { %1796 = vmatmul.mubr.f32.gmra.mxu1 %v5194_v39  ;;  %1910 = vmatpush1.msra.mxu0 %v3630_v14  ;;  %v3876_v50 = vpop.f32.mrf.mxu1  ;;  %v2237_v14 = vld [vmem:[#allocation11 + $0x40] sm:$0xff] }
 0x24e   :  { %v5212_v25 = vmax.f32 %v3819_v62, %v3875_v32  ;;  %1911 = vmatprep.subr.mxu0 %v3629_v42  ;;  %1642 = vmatprep.mubr.f32.mxu0 %v6413_v52  ;;  %v2236_v42 = vld [vmem:[#allocation11 + $0x38] sm:$0xff]  ;;  %v2235_v32 = vld [vmem:[#allocation11 + $0x30] sm:$0xff] }
 0x24f   :  { %1912 = vmatpush1.msra.mxu0 %v3628_v43  ;;  %v3877_v51 = vpop.f32.mrf.mxu1  ;;  %1801 = vmatprep.mubr.f32.mxu1 %v6413_v52  ;;  %v2122_v62 = vld [vmem:[%s6396_s7 + $0x30] sm:$0xff]  ;;  %v2121_v43 = vld [vmem:[%s6396_s7 + $0x28] sm:$0xff] }
 0x250   :  { %v3878_v63 = vadd.f32 %v3877_v51, %v3876_v50  ;;  %1913 = vmatprep.subr.mxu0 %v3627_v9  ;;  %1643 = vmatmul.mubr.f32.gmra.mxu0 %v5212_v25  ;;  %v2234_v50 = vld [vmem:[#allocation11 + $0x28] sm:$0xff]  ;;  %v2232_v51 = vld [vmem:[#allocation11 + $0x18] sm:$0xff] }
 0x251   :  { %1802 = vmatmul.mubr.f32.gmra.mxu1 %v5212_v25  ;;  %1914 = vmatpush1.msra.mxu0 %v3626_v30  ;;  %v3879_v16 = vpop.f32.mrf.mxu1  ;;  %v2120_v9 = vld [vmem:[%s6396_s7 + $0x20] sm:$0xff]  ;;  %v2119_v30 = vld [vmem:[%s6396_s7 + $0x18] sm:$0xff] }
 0x252   :  { %v1510_v45 = vmax.f32 %v3822_v44, %v3878_v63  ;;  %1915 = vmatprep.subr.mxu0 %v3625_v59  ;;  %1648 = vmatprep.mubr.f32.mxu0 %v6413_v52  ;;  %v2118_v59 = vld [vmem:[%s6396_s7 + $0x10] sm:$0xff]  ;;  %v2231_v44 = vld [vmem:[#allocation11 + $0x10] sm:$0xff] }
 0x253   :  { %1916 = vmatpush1.msra.mxu0 %v3624_v10  ;;  %v3880_v2 = vpop.f32.mrf.mxu1  ;;  %1807 = vmatprep.mubr.f32.mxu1 %v6413_v52  ;;  %v2117_v63 = vld [vmem:[%s6396_s7 + $0x8] sm:$0xff]  ;;  %v2230_v10 = vld [vmem:[#allocation11 + $0x8] sm:$0xff] }
 0x254   :  { %v3881_v55 = vadd.f32 %v3880_v2, %v3879_v16  ;;  %1917 = vmatprep.subr.mxu0 %v3623_v34  ;;  %1649 = vmatmul.mubr.f32.gmra.mxu0 %v1510_v45  ;;  %v2116_v16 = vld [vmem:[%s6396_s7] sm:$0xff]  ;;  %v2229_v34 = vld [vmem:[#allocation11] sm:$0xff]  ;;  %v2138_v2 = vld [vmem:[%s6396_s7 + $0xb0] sm:$0xff] }
 0x255   :  { %1808 = vmatmul.mubr.f32.gmra.mxu1 %v1510_v45  ;;  %1918 = vmatpush1.msra.mxu0 %v3622_v26  ;;  %v3882_v13 = vpop.f32.mrf.mxu1  ;;  %v2252_v26 = vld [vmem:[#allocation11 + $0xb8] sm:$0xff] }
 0x256   :  { %v1511_v36 = vmax.f32 %v3825_v56, %v3881_v55  ;;  %1919 = vmatprep.subr.mxu0 %v3621_v48  ;;  %1654 = vmatprep.mubr.f32.mxu0 %v6413_v52  ;;  %v2251_v48 = vld [vmem:[#allocation11 + $0xb0] sm:$0xff]  ;;  %v2250_v55 = vld [vmem:[#allocation11 + $0xa8] sm:$0xff] }
 0x257   :  { %1920 = vmatpush1.msra.mxu0 %v3620_v6  ;;  %v3883_v4 = vpop.f32.mrf.mxu1  ;;  %1813 = vmatprep.mubr.f32.mxu1 %v6413_v52  ;;  %v2137_v56 = vld [vmem:[%s6396_s7 + $0xa8] sm:$0xff]  ;;  %v2136_v6 = vld [vmem:[%s6396_s7 + $0xa0] sm:$0xff] }
 0x258   :  { %v3884_v35 = vadd.f32 %v3883_v4, %v3882_v13  ;;  %1921 = vmatprep.subr.mxu0 %v3619_v11  ;;  %1655 = vmatmul.mubr.f32.gmra.mxu0 %v1511_v36  ;;  %v2249_v13 = vld [vmem:[#allocation11 + $0xa0] sm:$0xff]  ;;  %v2247_v4 = vld [vmem:[#allocation11 + $0x90] sm:$0xff] }
 0x259   :  { %1814 = vmatmul.mubr.f32.gmra.mxu1 %v1511_v36  ;;  %1922 = vmatpush1.msra.mxu0 %v3618_v20  ;;  %v3885_v58 = vpop.f32.mrf.mxu1  ;;  %v2135_v11 = vld [vmem:[%s6396_s7 + $0x98] sm:$0xff]  ;;  %v2134_v20 = vld [vmem:[%s6396_s7 + $0x90] sm:$0xff] }
 0x25a   :  { %v1512_v28 = vmax.f32 %v3828_v15, %v3884_v35  ;;  %1923 = vmatprep.subr.mxu0 %v3617_v19  ;;  %1819 = vmatprep.mubr.f32.mxu1 %v6413_v52  ;;  %v2133_v19 = vld [vmem:[%s6396_s7 + $0x88] sm:$0xff]  ;;  %v2246_v15 = vld [vmem:[#allocation11 + $0x88] sm:$0xff] }
 0x25b   :  { %1924 = vmatpush1.msra.mxu0 %v3616_v24  ;;  %1965 = vmatprep.mubr.f32.mxu0 %v6413_v52  ;;  %v3886_v29 = vpop.f32.mrf.mxu1  ;;  %v2132_v35 = vld [vmem:[%s6396_s7 + $0x80] sm:$0xff]  ;;  %v2245_v24 = vld [vmem:[#allocation11 + $0x80] sm:$0xff] }
 0x25c   :  { %1925 = vmatprep.subr.mxu0 %v3615_v54  ;;  %v3887_v47 = vadd.f32 %v3886_v29, %v3885_v58  ;;  %2150 = vmatpush1.msra.mxu1 %v2131_v21  ;;  %v3702_v54 = vld [vmem:[%s6398_s9 + $0x3a0] sm:$0xff] }
 0x25d   :  { %1820 = vmatmul.mubr.f32.gmra.mxu1 %v1512_v28  ;;  %1926 = vmatpush1.msra.mxu0 %v3614_v0 }
 0x25e   :  { %1927 = vmatprep.subr.mxu0 %v3613_v5  ;;  %v1513_v38 = vmax.f32 %v3831_v7, %v3887_v47  ;;  %2151 = vmatprep.subr.mxu1 %v6413_v52 }
 0x25f   :  { %1928 = vmatpush1.msra.mxu0 %v3612_v1  ;;  %2152 = vmatpush1.msra.mxu1 %v2130_v46 }
 0x260   :  { %1929 = vmatprep.subr.mxu0 %v3611_v12  ;;  %2153 = vmatprep.subr.mxu1 %v6413_v52 }
 0x261   :  { %1930 = vmatpush1.msra.mxu0 %v3610_v37  ;;  %2154 = vmatpush1.msra.mxu1 %v2129_v22 }
 0x262   :  { %1931 = vmatprep.subr.mxu0 %v3609_v3  ;;  %2155 = vmatprep.subr.mxu1 %v6413_v52 }
 0x263   :  { %1932 = vmatpush1.msra.mxu0 %v3608_v17  ;;  %2156 = vmatpush1.msra.mxu1 %v2128_v40 }
 0x264   :  { %1966 = vmatmul.mubr.f32.vlgmr.msra.gmra.mxu0 %v5194_v39  ;;  %2253 = vmatprep.subr.mxu0 %v6413_v52  ;;  %v2124_v39 = vld [vmem:[%s6396_s7 + $0x40] sm:$0xff] }
 0x265   :  { %1971 = vmatprep.mubr.f32.mxu0 %v6413_v52  ;;  %2254 = vmatpush1.msra.mxu0 %v2244_v8 }
 0x266   :  { %2255 = vmatprep.subr.mxu0 %v6413_v52  ;;  %2157 = vmatprep.subr.mxu1 %v6413_v52 }
 0x267   :  { %2256 = vmatpush1.msra.mxu0 %v2243_v49  ;;  %2158 = vmatpush1.msra.mxu1 %v2127_v18 }
 0x268   :  { %1972 = vmatmul.mubr.f32.gmra.mxu0 %v5212_v25  ;;  %2257 = vmatprep.subr.mxu0 %v6413_v52  ;;  %v2233_v25 = vld [vmem:[#allocation11 + $0x20] sm:$0xff] }
 0x269   :  { %1977 = vmatprep.mubr.f32.mxu0 %v6413_v52  ;;  %2258 = vmatpush1.msra.mxu0 %v2242_v53 }
 0x26a   :  { %2259 = vmatprep.subr.mxu0 %v6413_v52  ;;  %2159 = vmatprep.subr.mxu1 %v6413_v52 }
 0x26b   :  { %2260 = vmatpush1.msra.mxu0 %v2241_v60  ;;  %2160 = vmatpush1.msra.mxu1 %v2126_v33 }
 0x26c   :  { %1978 = vmatmul.mubr.f32.gmra.mxu0 %v1510_v45  ;;  %2261 = vmatprep.subr.mxu0 %v6413_v52  ;;  %v2139_v45 = vld [vmem:[%s6396_s7 + $0xb8] sm:$0xff] }
 0x26d   :  { %1983 = vmatprep.mubr.f32.mxu0 %v6413_v52  ;;  %2262 = vmatpush1.msra.mxu0 %v2240_v31 }
 0x26e   :  { %2263 = vmatprep.subr.mxu0 %v6413_v52  ;;  %2161 = vmatprep.subr.mxu1 %v6413_v52 }
 0x26f   :  { %2264 = vmatpush1.msra.mxu0 %v2239_v41  ;;  %2162 = vmatpush1.msra.mxu1 %v2125_v23 }
 0x270   :  { %1984 = vmatmul.mubr.f32.gmra.mxu0 %v1511_v36  ;;  %2265 = vmatprep.subr.mxu0 %v6413_v52  ;;  %v2248_v36 = vld [vmem:[#allocation11 + $0x98] sm:$0xff] }
 0x271   :  { %1989 = vmatprep.mubr.f32.mxu0 %v6413_v52  ;;  %2266 = vmatpush1.msra.mxu0 %v2238_v57 }
 0x272   :  { %2163 = vmatprep.subr.mxu1 %v6413_v52  ;;  %2267 = vmatprep.subr.mxu0 %v6413_v52 }
 0x273   :  { %2164 = vmatpush1.msra.mxu1 %v2124_v39  ;;  %2268 = vmatpush1.msra.mxu0 %v2237_v14 }
 0x274   :  { %1990 = vmatmul.mubr.f32.gmra.mxu0 %v1512_v28  ;;  %2165 = vmatprep.subr.mxu1 %v6413_v52 }
 0x275   :  { %1995 = vmatprep.mubr.f32.mxu0 %v6413_v52  ;;  %2269 = vmatprep.subr.mxu0 %v6413_v52 }
 0x276   :  { %2166 = vmatpush1.msra.mxu1 %v2123_v27  ;;  %2270 = vmatpush1.msra.mxu0 %v2236_v42 }
 0x277   :  { %2167 = vmatprep.subr.mxu1 %v6413_v52  ;;  %2271 = vmatprep.subr.mxu0 %v6413_v52 }
 0x278   :  { %1996 = vmatmul.mubr.f32.gmra.mxu0 %v1513_v38  ;;  %2168 = vmatpush1.msra.mxu1 %v2122_v62 }
 0x279   :  { %2272 = vmatpush1.msra.mxu0 %v2235_v32  ;;  %2169 = vmatprep.subr.mxu1 %v6413_v52 }
 0x27a   :  { %2273 = vmatprep.subr.mxu0 %v6413_v52  ;;  %2170 = vmatpush1.msra.mxu1 %v2121_v43  ;;  %v2038_v43 = vld [vmem:[%s6393_s4] sm:$0x3] }
 0x27b   :  { %2274 = vmatpush1.msra.mxu0 %v2234_v50  ;;  %2171 = vmatprep.subr.mxu1 %v6413_v52 }
 0x27c   :  { %2275 = vmatprep.subr.mxu0 %v6413_v52  ;;  %2172 = vmatpush1.msra.mxu1 %v2120_v9 }
 0x27d   :  { %2276 = vmatpush1.msra.mxu0 %v2233_v25  ;;  %2173 = vmatprep.subr.mxu1 %v6413_v52 }
 0x27e   :  { %2277 = vmatprep.subr.mxu0 %v6413_v52  ;;  %2174 = vmatpush1.msra.mxu1 %v2119_v30 }
 0x27f   :  { %2278 = vmatpush1.msra.mxu0 %v2232_v51  ;;  %2175 = vmatprep.subr.mxu1 %v6413_v52  ;;  %v6414_v51 = vld [vmem:[#allocation19_spill] sm:$0xff] }
 0x280   :  { %2279 = vmatprep.subr.mxu0 %v6413_v52  ;;  %2176 = vmatpush1.msra.mxu1 %v2118_v59  ;;  %v5438_v59 = vrot.slane %v2038_v43, %v6414_v51 }
 0x281   :  { %2280 = vmatpush1.msra.mxu0 %v2231_v44  ;;  %2177 = vmatprep.subr.mxu1 %v6413_v52 }
 0x282   :  { %2281 = vmatprep.subr.mxu0 %v6413_v52  ;;  %2178 = vmatpush1.msra.mxu1 %v2117_v63 }
 0x283   :  { %2282 = vmatpush1.msra.mxu0 %v2230_v10  ;;  %2179 = vmatprep.subr.mxu1 %v6413_v52 }
 0x284   :  { %2283 = vmatprep.subr.mxu0 %v6413_v52  ;;  %2180 = vmatpush1.msra.mxu1 %v2116_v16 }
 0x285   :  { %2284 = vmatpush1.msra.mxu0 %v2229_v34  ;;  %2197 = vmatprep.subr.mxu1 %v6413_v52 }
 0x286   :  { %2301 = vmatprep.subr.mxu0 %v6413_v52  ;;  %2198 = vmatpush2.msra.mxu1 %v2139_v45 }
 0x287   :  { %2302 = vmatpush2.msra.mxu0 %v2252_v26  ;;  %2199 = vmatprep.subr.mxu1 %v6413_v52 }
 0x288   :  { %2303 = vmatprep.subr.mxu0 %v6413_v52  ;;  %2200 = vmatpush2.msra.mxu1 %v2138_v2 }
 0x289   :  { %2304 = vmatpush2.msra.mxu0 %v2251_v48  ;;  %2201 = vmatprep.subr.mxu1 %v6413_v52 }
 0x28a   :  { %2305 = vmatprep.subr.mxu0 %v6413_v52  ;;  %2202 = vmatpush2.msra.mxu1 %v2137_v56 }
 0x28b   :  { %2306 = vmatpush2.msra.mxu0 %v2250_v55  ;;  %2203 = vmatprep.subr.mxu1 %v6413_v52 }
 0x28c   :  { %2307 = vmatprep.subr.mxu0 %v6413_v52  ;;  %2204 = vmatpush2.msra.mxu1 %v2136_v6 }
 0x28d   :  { %2308 = vmatpush2.msra.mxu0 %v2249_v13  ;;  %2205 = vmatprep.subr.mxu1 %v6413_v52 }
 0x28e   :  { %2309 = vmatprep.subr.mxu0 %v6413_v52  ;;  %2206 = vmatpush2.msra.mxu1 %v2135_v11 }
 0x28f   :  { %2310 = vmatpush2.msra.mxu0 %v2248_v36  ;;  %2207 = vmatprep.subr.mxu1 %v6413_v52 }
 0x290   :  { %2311 = vmatprep.subr.mxu0 %v6413_v52  ;;  %2208 = vmatpush2.msra.mxu1 %v2134_v20 }
 0x291   :  { %2312 = vmatpush2.msra.mxu0 %v2247_v4  ;;  %2209 = vmatprep.subr.mxu1 %v6413_v52  ;;  %v5445_v4 = vrot.slane %v2038_v43, %v4709_v61 }
 0x292   :  { %2313 = vmatprep.subr.mxu0 %v6413_v52  ;;  %2210 = vmatpush2.msra.mxu1 %v2133_v19 }
 0x293   :  { %2314 = vmatpush2.msra.mxu0 %v2246_v15  ;;  %2211 = vmatprep.subr.mxu1 %v6413_v52 }
 0x294   :  { %2315 = vmatprep.subr.mxu0 %v6413_v52  ;;  %2212 = vmatpush2.msra.mxu1 %v2132_v35 }
 0x295   :  { %2316 = vmatpush2.msra.mxu0 %v2245_v24  ;;  %2474 = vmatprep.subr.mxu1 %v3702_v54 }
 0x296   :  { %4014 = vmatprep.subr.mxu0 %v6413_v52 }
 0x304   :  { %v1626_v28 = vpop.f32.mrf.mxu0 }
 0x306   :  { %v1628_v0 = vpop.f32.mrf.mxu0 }
 0x307   :  { %1663 = vst.msk [vmem:[#allocation5 + $0x8] sm:$0xff] %vm1662_vm2, %v1628_v0 }
 0x308   :  { %v1632_v5 = vpop.f32.mrf.mxu0 }
 0x309   :  { %v1791_v1 = vpop.f32.mrf.mxu1 }
 0x30a   :  { %v1634_v12 = vpop.f32.mrf.mxu0  ;;  %v1826_v25 = vadd.f32 %v1791_v1, %v1626_v28 }
 0x30b   :  { %1665 = vst.msk [vmem:[#allocation5 + $0x18] sm:$0xff] %vm1662_vm2, %v1634_v12  ;;  %v1793_v37 = vpop.f32.mrf.mxu1 }
 0x30c   :  { %v1638_v3 = vpop.f32.mrf.mxu0 }
 0x30d   :  { %v1797_v17 = vpop.f32.mrf.mxu1 }
 0x30e   :  { %v1675_v58 = vld [vmem:[#allocation5 + $0x8] sm:$0xff]  ;;  %v1640_v29 = vpop.f32.mrf.mxu0  ;;  %v1828_v34 = vadd.f32 %v1797_v17, %v1632_v5 }
 0x30f   :  { %v1827_v47 = vadd.f32 %v1793_v37, %v1675_v58  ;;  %1667 = vst.msk [vmem:[#allocation5 + $0x28] sm:$0xff] %vm1662_vm2, %v1640_v29  ;;  %v1799_v7 = vpop.f32.mrf.mxu1 }
 0x310   :  { %v1644_v38 = vpop.f32.mrf.mxu0 }
 0x311   :  { %1839 = vst.msk [vmem:[#allocation5 + $0x8] sm:$0xff] %vm1662_vm2, %v1827_v47  ;;  %v1803_v21 = vpop.f32.mrf.mxu1 }
 0x312   :  { %v1677_v8 = vld [vmem:[#allocation5 + $0x18] sm:$0xff]  ;;  %v1646_v46 = vpop.f32.mrf.mxu0  ;;  %v1830_v13 = vadd.f32 %v1803_v21, %v1638_v3 }
 0x313   :  { %v1829_v49 = vadd.f32 %v1799_v7, %v1677_v8  ;;  %1669 = vst.msk [vmem:[#allocation5 + $0x38] sm:$0xff] %vm1662_vm2, %v1646_v46  ;;  %v1805_v22 = vpop.f32.mrf.mxu1 }
 0x314   :  { %v5424_v53 = vpop.f32.mrf.mxu0 }
 0x315   :  { %1841 = vst.msk [vmem:[#allocation5 + $0x18] sm:$0xff] %vm1662_vm2, %v1829_v49  ;;  %v1809_v40 = vpop.f32.mrf.mxu1 }
 0x316   :  { %v1679_v60 = vld [vmem:[#allocation5 + $0x28] sm:$0xff]  ;;  %v1652_v18 = vpop.f32.mrf.mxu0  ;;  %v1832_v54 = vadd.f32 %v1809_v40, %v1644_v38 }
 0x317   :  { %v1831_v31 = vadd.f32 %v1805_v22, %v1679_v60  ;;  %1671 = vst.msk [vmem:[#allocation5 + $0x48] sm:$0xff] %vm1662_vm2, %v1652_v18  ;;  %v1811_v33 = vpop.f32.mrf.mxu1 }
 0x318   :  { %v5428_v41 = vpop.f32.mrf.mxu0  ;;  %v1851_v10 = vld [vmem:[#allocation5 + $0x8] sm:$0xff] }
 0x319   :  { %1843 = vst.msk [vmem:[#allocation5 + $0x28] sm:$0xff] %vm1662_vm2, %v1831_v31  ;;  %v1815_v23 = vpop.f32.mrf.mxu1 }
 0x31a   :  { %v1681_v57 = vld [vmem:[#allocation5 + $0x38] sm:$0xff]  ;;  %v1658_v39 = vpop.f32.mrf.mxu0  ;;  %v1834_v47 = vadd.f32 %v1815_v23, %v5424_v53 }
 0x31b   :  { %v1833_v14 = vadd.f32 %v1811_v33, %v1681_v57  ;;  %1673 = vst.msk [vmem:[#allocation5 + $0x58] sm:$0xff] %vm1662_vm2, %v1658_v39  ;;  %v1817_v27 = vpop.f32.mrf.mxu1 }
 0x31c   :  { %v1853_v55 = vld [vmem:[#allocation5 + $0x18] sm:$0xff] }
 0x31d   :  { %1845 = vst.msk [vmem:[#allocation5 + $0x38] sm:$0xff] %vm1662_vm2, %v1833_v14  ;;  %v1821_v62 = vpop.f32.mrf.mxu1 }
 0x31e   :  { %v1683_v42 = vld [vmem:[#allocation5 + $0x48] sm:$0xff]  ;;  %v1836_v60 = vadd.f32 %v1821_v62, %v5428_v41 }
 0x31f   :  { %v1835_v32 = vadd.f32 %v1817_v27, %v1683_v42  ;;  %v1823_v9 = vpop.f32.mrf.mxu1 }
 0x320   :  { %v1855_v35 = vld [vmem:[#allocation5 + $0x28] sm:$0xff] }
 0x321   :  { %1847 = vst.msk [vmem:[#allocation5 + $0x48] sm:$0xff] %vm1662_vm2, %v1835_v32 }
 0x322   :  { %v1685_v50 = vld [vmem:[#allocation5 + $0x58] sm:$0xff] }
 0x323   :  { %v1837_v30 = vadd.f32 %v1823_v9, %v1685_v50 }
 0x324   :  { %v1967_v44 = vpop.f32.mrf.mxu0  ;;  %v1857_v58 = vld [vmem:[#allocation5 + $0x38] sm:$0xff] }
 0x325   :  { %1849 = vst.msk [vmem:[#allocation5 + $0x58] sm:$0xff] %vm1662_vm2, %v1837_v30  ;;  %v2002_v63 = vadd.f32 %v1967_v44, %v1826_v25 }
 0x326   :  { %v1969_v16 = vpop.f32.mrf.mxu0 }
 0x327   :  { %v2050_v45 = vadd.f32 %v5438_v59, %v2002_v63  ;;  %v2003_v26 = vadd.f32 %v1969_v16, %v1851_v10 }
 0x328   :  { %v1973_v2 = vpop.f32.mrf.mxu0  ;;  %v1859_v18 = vld [vmem:[#allocation5 + $0x48] sm:$0xff] }
 0x329   :  { %v2062_v48 = vmax.f32 %v2050_v45, 0.0  ;;  %2015 = vst.msk [vmem:[#allocation5 + $0x8] sm:$0xff] %vm1662_vm2, %v2003_v26  ;;  %v2004_v56 = vadd.f32 %v1973_v2, %v1828_v34 }
 0x32a   :  { %v1975_v6 = vpop.f32.mrf.mxu0 }
 0x32b   :  { %v2052_v11 = vadd.f32 %v5438_v59, %v2004_v56  ;;  %v2005_v36 = vadd.f32 %v1975_v6, %v1853_v55 }
 0x32c   :  { %v1979_v20 = vpop.f32.mrf.mxu0  ;;  %v1861_v43 = vld [vmem:[#allocation5 + $0x58] sm:$0xff] }
 0x32d   :  { %v2064_v19 = vmax.f32 %v2052_v11, 0.0  ;;  %2017 = vst.msk [vmem:[#allocation5 + $0x18] sm:$0xff] %vm1662_vm2, %v2005_v36  ;;  %v2006_v15 = vadd.f32 %v1979_v20, %v1830_v13  ;;  %v3701_v20 = vld [vmem:[%s6398_s9 + $0x398] sm:$0xff] }
 0x32e   :  { %v1981_v24 = vpop.f32.mrf.mxu0 }
 0x32f   :  { %v2054_v28 = vadd.f32 %v5438_v59, %v2006_v15  ;;  %v2007_v0 = vadd.f32 %v1981_v24, %v1855_v35  ;;  %v5449_v5 = vmax.f32 %v2062_v48, %v2064_v19  ;;  %v3705_v19 = vld [vmem:[%s6398_s9 + $0x3b8] sm:$0xff]  ;;  %v3696_v15 = vld [vmem:[%s6398_s9 + $0x370] sm:$0xff] }
 0x330   :  { %v2027_v1 = vld [vmem:[#allocation5 + $0x8] sm:$0xff]  ;;  %v1985_v12 = vpop.f32.mrf.mxu0  ;;  %v3700_v35 = vld [vmem:[%s6398_s9 + $0x390] sm:$0xff] }
 0x331   :  { %v2051_v37 = vadd.f32 %v5445_v4, %v2027_v1  ;;  %v2066_v3 = vmax.f32 %v2054_v28, 0.0  ;;  %2019 = vst.msk [vmem:[#allocation5 + $0x28] sm:$0xff] %vm1662_vm2, %v2007_v0  ;;  %v2008_v17 = vadd.f32 %v1985_v12, %v1832_v54  ;;  %v3692_v24 = vld [vmem:[%s6398_s9 + $0x350] sm:$0xff]  ;;  %v3691_v54 = vld [vmem:[%s6398_s9 + $0x348] sm:$0xff] }
 0x332   :  { %v1987_v29 = vpop.f32.mrf.mxu0  ;;  %v3695_v28 = vld [vmem:[%s6398_s9 + $0x368] sm:$0xff] }
 0x333   :  { %v2063_v7 = vmax.f32 %v2051_v37, 0.0  ;;  %v2056_v38 = vadd.f32 %v5438_v59, %v2008_v17  ;;  %v2009_v21 = vadd.f32 %v1987_v29, %v1857_v58  ;;  %v3686_v17 = vld [vmem:[%s6398_s9 + $0x320] sm:$0xff] }
 0x334   :  { %v2029_v8 = vld [vmem:[#allocation5 + $0x18] sm:$0xff]  ;;  %v1991_v46 = vpop.f32.mrf.mxu0  ;;  %v3690_v58 = vld [vmem:[%s6398_s9 + $0x340] sm:$0xff] }
 0x335   :  { %2075 = vst.msk [vmem:[#allocation5 + $0x8] sm:$0xff] %vm1662_vm2, %v2063_v7  ;;  %v2053_v49 = vadd.f32 %v5445_v4, %v2029_v8  ;;  %v2068_v22 = vmax.f32 %v2056_v38, 0.0  ;;  %2021 = vst.msk [vmem:[#allocation5 + $0x38] sm:$0xff] %vm1662_vm2, %v2009_v21  ;;  %v2010_v40 = vadd.f32 %v1991_v46, %v1834_v47  ;;  %v3682_v29 = vld [vmem:[%s6398_s9 + $0x300] sm:$0xff]  ;;  %v3681_v47 = vld [vmem:[%s6398_s9 + $0x2f8] sm:$0xff] }
 0x336   :  { %v1993_v31 = vpop.f32.mrf.mxu0  ;;  %v3685_v7 = vld [vmem:[%s6398_s9 + $0x318] sm:$0xff]  ;;  %v3676_v21 = vld [vmem:[%s6398_s9 + $0x2d0] sm:$0xff] }
 0x337   :  { %v2065_v33 = vmax.f32 %v2053_v49, 0.0  ;;  %v2058_v53 = vadd.f32 %v5438_v59, %v2010_v40  ;;  %v2011_v23 = vadd.f32 %v1993_v31, %v1859_v18  ;;  %v5460_v57 = vmax.f32 %v2066_v3, %v2068_v22  ;;  %v3687_v3 = vld [vmem:[%s6398_s9 + $0x328] sm:$0xff]  ;;  %v3677_v38 = vld [vmem:[%s6398_s9 + $0x2d8] sm:$0xff]  ;;  %v3680_v8 = vld [vmem:[%s6398_s9 + $0x2f0] sm:$0xff] }
 0x338   :  { %v2031_v39 = vld [vmem:[#allocation5 + $0x28] sm:$0xff]  ;;  %v1997_v14 = vpop.f32.mrf.mxu0  ;;  %v3672_v46 = vld [vmem:[%s6398_s9 + $0x2b0] sm:$0xff]  ;;  %v3670_v18 = vld [vmem:[%s6398_s9 + $0x2a0] sm:$0xff] }
 0x339   :  { %2077 = vst.msk [vmem:[#allocation5 + $0x18] sm:$0xff] %vm1662_vm2, %v2065_v33  ;;  %v2055_v27 = vadd.f32 %v5445_v4, %v2031_v39  ;;  %v2070_v42 = vmax.f32 %v2058_v53, 0.0  ;;  %2023 = vst.msk [vmem:[#allocation5 + $0x48] sm:$0xff] %vm1662_vm2, %v2011_v23  ;;  %v2012_v32 = vadd.f32 %v1997_v14, %v1836_v60  ;;  %v3671_v49 = vld [vmem:[%s6398_s9 + $0x2a8] sm:$0xff]  ;;  %v3666_v60 = vld [vmem:[%s6398_s9 + $0x280] sm:$0xff] }
 0x33a   :  { %v1999_v41 = vpop.f32.mrf.mxu0  ;;  %v3675_v22 = vld [vmem:[%s6398_s9 + $0x2c8] sm:$0xff]  ;;  %v3662_v31 = vld [vmem:[%s6398_s9 + $0x260] sm:$0xff]  ;;  %v3661_v33 = vld [vmem:[%s6398_s9 + $0x258] sm:$0xff] }
 0x33b   :  { %v2067_v62 = vmax.f32 %v2055_v27, 0.0  ;;  %v2060_v50 = vadd.f32 %v5438_v59, %v2012_v32  ;;  %v2013_v9 = vadd.f32 %v1999_v41, %v1861_v43  ;;  %v3667_v40 = vld [vmem:[%s6398_s9 + $0x288] sm:$0xff]  ;;  %v3665_v53 = vld [vmem:[%s6398_s9 + $0x278] sm:$0xff]  ;;  %v3660_v39 = vld [vmem:[%s6398_s9 + $0x250] sm:$0xff] }
 0x33c   :  { %v2033_v25 = vld [vmem:[#allocation5 + $0x38] sm:$0xff]  ;;  %v2087_v34 = vld [vmem:[#allocation5 + $0x8] sm:$0xff]  ;;  %v3652_v14 = vld [vmem:[%s6398_s9 + $0x210] sm:$0xff] }
 0x33d   :  { %2079 = vst.msk [vmem:[#allocation5 + $0x28] sm:$0xff] %vm1662_vm2, %v2067_v62  ;;  %v2057_v30 = vadd.f32 %v5445_v4, %v2033_v25  ;;  %v2072_v44 = vmax.f32 %v2060_v50, 0.0  ;;  %2025 = vst.msk [vmem:[#allocation5 + $0x58] sm:$0xff] %vm1662_vm2, %v2013_v9  ;;  %v3657_v23 = vld [vmem:[%s6398_s9 + $0x238] sm:$0xff]  ;;  %v3651_v27 = vld [vmem:[%s6398_s9 + $0x208] sm:$0xff] }
 0x33e   :  { %v3647_v32 = vld [vmem:[%s6398_s9 + $0x1e8] sm:$0xff]  ;;  %v3646_v43 = vld [vmem:[%s6398_s9 + $0x1e0] sm:$0xff]  ;;  %v3704_v62 = vld [vmem:[%s6398_s9 + $0x3b0] sm:$0xff] }
 0x33f   :  { %v2069_v63 = vmax.f32 %v2057_v30, 0.0  ;;  %v2106_v10 = vmax.f32 %v2070_v42, %v2072_v44  ;;  %v3655_v42 = vld [vmem:[%s6398_s9 + $0x228] sm:$0xff]  ;;  %v3650_v41 = vld [vmem:[%s6398_s9 + $0x200] sm:$0xff]  ;;  %v2399_v50 = vld [vmem:[%s6398_s9 + $0x1d0] sm:$0xff] }
 0x340   :  { %v2035_v16 = vld [vmem:[#allocation5 + $0x48] sm:$0xff]  ;;  %v2089_v45 = vld [vmem:[#allocation5 + $0x18] sm:$0xff] }
 0x341   :  { %2081 = vst.msk [vmem:[#allocation5 + $0x38] sm:$0xff] %vm1662_vm2, %v2069_v63  ;;  %v2059_v26 = vadd.f32 %v5445_v4, %v2035_v16  ;;  %v2091_v2 = vmax.f32 %v2087_v34, %v2089_v45 }
 0x343   :  { %v2071_v59 = vmax.f32 %v2059_v26, 0.0  ;;  %2093 = vst.msk [vmem:[#allocation6 + $0x8] sm:$0xff] %vm1662_vm2, %v2091_v2 }
 0x344   :  { %v2037_v48 = vld [vmem:[#allocation5 + $0x58] sm:$0xff]  ;;  %v2095_v6 = vld [vmem:[#allocation5 + $0x28] sm:$0xff] }
 0x345   :  { %2083 = vst.msk [vmem:[#allocation5 + $0x48] sm:$0xff] %vm1662_vm2, %v2071_v59  ;;  %v2061_v56 = vadd.f32 %v5445_v4, %v2037_v48  ;;  %v3697_v4 = vld [vmem:[%s6398_s9 + $0x378] sm:$0xff] }
 0x347   :  { %v2073_v55 = vmax.f32 %v2061_v56, 0.0  ;;  %v3703_v56 = vld [vmem:[%s6398_s9 + $0x3a8] sm:$0xff] }
 0x348   :  { %v2097_v13 = vld [vmem:[#allocation5 + $0x38] sm:$0xff] }
 0x349   :  { %2085 = vst.msk [vmem:[#allocation5 + $0x58] sm:$0xff] %vm1662_vm2, %v2073_v55  ;;  %v2099_v11 = vmax.f32 %v2095_v6, %v2097_v13  ;;  %v2398_v55 = vld [vmem:[%s6398_s9 + $0x1c8] sm:$0xff] }
 0x34a   :  { %v2111_v36 = vld [vmem:[#allocation6 + $0x8] sm:$0xff] }
 0x34b   :  { %3640 = vmatprep.mubr.msk.f32.mxu1 %vm1662_vm2, %v2111_v36  ;;  %3643 = vmatprep.mubr.msk.f32.mxu0 %vm1662_vm2, %v2111_v36  ;;  %2101 = vst.msk [vmem:[#allocation6 + $0x18] sm:$0xff] %vm1662_vm2, %v2099_v11  ;;  %v3699_v36 = vld [vmem:[%s6398_s9 + $0x388] sm:$0xff] }
 0x34c   :  { %2214 = vmatmul.mubr.f32.vlgmr.msra.gmra.mxu1 %v5449_v5  ;;  %2318 = vmatmul.mubr.f32.vlgmr.msra.gmra.mxu0 %v5449_v5  ;;  %v2103_v0 = vld [vmem:[#allocation5 + $0x48] sm:$0xff] }
 0x34d   :  { %2475 = vmatpush1.msra.mxu1 %v3701_v20  ;;  %4015 = vmatpush3.msra.mxu0 %v3705_v19  ;;  %v2394_v20 = vld [vmem:[%s6398_s9 + $0x1a8] sm:$0xff]  ;;  %v3698_v19 = vld [vmem:[%s6398_s9 + $0x380] sm:$0xff] }
 0x34e   :  { %2476 = vmatprep.subr.mxu1 %v3697_v4  ;;  %4016 = vmatprep.subr.mxu0 %v6413_v52  ;;  %v2393_v4 = vld [vmem:[%s6398_s9 + $0x1a0] sm:$0xff] }
 0x34f   :  { %2477 = vmatpush1.msra.mxu1 %v3696_v15  ;;  %4017 = vmatpush3.msra.mxu0 %v3700_v35  ;;  %v3694_v15 = vld [vmem:[%s6398_s9 + $0x360] sm:$0xff] }
 0x350   :  { %v2105_v5 = vld [vmem:[#allocation5 + $0x58] sm:$0xff]  ;;  %2478 = vmatprep.subr.mxu1 %v3692_v24  ;;  %4018 = vmatprep.subr.mxu0 %v6413_v52  ;;  %v2389_v35 = vld [vmem:[%s6398_s9 + $0x180] sm:$0xff] }
 0x351   :  { %v2107_v1 = vmax.f32 %v2103_v0, %v2105_v5  ;;  %2479 = vmatpush1.msra.mxu1 %v3691_v54  ;;  %4019 = vmatpush3.msra.mxu0 %v3695_v28  ;;  %v3693_v24 = vld [vmem:[%s6398_s9 + $0x358] sm:$0xff]  ;;  %v3688_v5 = vld [vmem:[%s6398_s9 + $0x330] sm:$0xff] }
 0x352   :  { %v2113_v12 = vld [vmem:[#allocation6 + $0x18] sm:$0xff]  ;;  %4020 = vmatprep.subr.mxu0 %v6413_v52  ;;  %2480 = vmatprep.subr.mxu1 %v3687_v3  ;;  %v3683_v3 = vld [vmem:[%s6398_s9 + $0x308] sm:$0xff] }
 0x353   :  { %3641 = vmatprep.mubr.msk.f32.mxu1 %vm1662_vm2, %v2113_v12  ;;  %3644 = vmatprep.mubr.msk.f32.mxu0 %vm1662_vm2, %v2113_v12  ;;  %2109 = vst.msk [vmem:[#allocation6 + $0x28] sm:$0xff] %vm1662_vm2, %v2107_v1  ;;  %v2388_v54 = vld [vmem:[%s6398_s9 + $0x178] sm:$0xff]  ;;  %v2383_v1 = vld [vmem:[%s6398_s9 + $0x150] sm:$0xff] }
 0x354   :  { %2219 = vmatmul.mubr.f32.gmra.mxu1 %v5460_v57  ;;  %2323 = vmatmul.mubr.f32.gmra.mxu0 %v5460_v57  ;;  %v3656_v57 = vld [vmem:[%s6398_s9 + $0x230] sm:$0xff]  ;;  %v3689_v28 = vld [vmem:[%s6398_s9 + $0x338] sm:$0xff] }
 0x355   :  { %2481 = vmatpush1.msra.mxu1 %v3686_v17  ;;  %4021 = vmatpush3.msra.mxu0 %v3690_v58  ;;  %v2384_v0 = vld [vmem:[%s6398_s9 + $0x158] sm:$0xff]  ;;  %v3684_v12 = vld [vmem:[%s6398_s9 + $0x310] sm:$0xff]  ;;  %v2378_v17 = vld [vmem:[%s6398_s9 + $0x128] sm:$0xff] }
 0x356   :  { %2482 = vmatprep.subr.mxu1 %v3682_v29  ;;  %4022 = vmatprep.subr.mxu0 %v6413_v52  ;;  %v3679_v58 = vld [vmem:[%s6398_s9 + $0x2e8] sm:$0xff] }
 0x357   :  { %2483 = vmatpush1.msra.mxu1 %v3681_v47  ;;  %4023 = vmatpush3.msra.mxu0 %v3685_v7  ;;  %v2374_v29 = vld [vmem:[%s6398_s9 + $0x108] sm:$0xff]  ;;  %v3678_v47 = vld [vmem:[%s6398_s9 + $0x2e0] sm:$0xff] }
 0x358   :  { %2484 = vmatprep.subr.mxu1 %v3677_v38  ;;  %4024 = vmatprep.subr.mxu0 %v6413_v52  ;;  %v2373_v7 = vld [vmem:[%s6398_s9 + $0x100] sm:$0xff] }
 0x359   :  { %2485 = vmatpush1.msra.mxu1 %v3676_v21  ;;  %4025 = vmatpush3.msra.mxu0 %v3680_v8  ;;  %v3674_v38 = vld [vmem:[%s6398_s9 + $0x2c0] sm:$0xff]  ;;  %v3673_v8 = vld [vmem:[%s6398_s9 + $0x2b8] sm:$0xff] }
 0x35a   :  { %v2115_v37 = vld [vmem:[#allocation6 + $0x28] sm:$0xff]  ;;  %2486 = vmatprep.subr.mxu1 %v3672_v46  ;;  %4026 = vmatprep.subr.mxu0 %v6413_v52  ;;  %v2369_v21 = vld [vmem:[%s6398_s9 + $0xe0] sm:$0xff]  ;;  %v2368_v46 = vld [vmem:[%s6398_s9 + $0xd8] sm:$0xff] }
 0x35b   :  { %3642 = vmatprep.mubr.msk.f32.mxu1 %vm1662_vm2, %v2115_v37  ;;  %3645 = vmatprep.mubr.msk.f32.mxu0 %vm1662_vm2, %v2115_v37  ;;  %v2379_v37 = vld [vmem:[%s6398_s9 + $0x130] sm:$0xff] }
 0x35c   :  { %2224 = vmatmul.mubr.f32.gmra.mxu1 %v2106_v10  ;;  %2328 = vmatmul.mubr.f32.gmra.mxu0 %v2106_v10 }
 0x35d   :  { %2530 = vmatprep.mubr.f32.mxu1 %v6413_v52  ;;  %2487 = vmatpush1.msra.mxu1 %v3671_v49  ;;  %v3669_v49 = vld [vmem:[%s6398_s9 + $0x298] sm:$0xff] }
 0x35e   :  { %4027 = vmatpush3.msra.mxu0 %v3675_v22  ;;  %2488 = vmatprep.subr.mxu1 %v3667_v40  ;;  %v2364_v22 = vld [vmem:[%s6398_s9 + $0xb8] sm:$0xff]  ;;  %v3668_v40 = vld [vmem:[%s6398_s9 + $0x290] sm:$0xff] }
 0x35f   :  { %4028 = vmatprep.subr.mxu0 %v6413_v52  ;;  %2489 = vmatpush1.msra.mxu1 %v3666_v60  ;;  %v2363_v60 = vld [vmem:[%s6398_s9 + $0xb0] sm:$0xff] }
 0x360   :  { %4029 = vmatpush3.msra.mxu0 %v3670_v18  ;;  %2490 = vmatprep.subr.mxu1 %v3662_v31  ;;  %v3664_v18 = vld [vmem:[%s6398_s9 + $0x270] sm:$0xff] }
 0x361   :  { %4030 = vmatprep.subr.mxu0 %v6413_v52  ;;  %2491 = vmatpush1.msra.mxu1 %v3661_v33  ;;  %v2359_v31 = vld [vmem:[%s6398_s9 + $0x90] sm:$0xff]  ;;  %v3663_v33 = vld [vmem:[%s6398_s9 + $0x268] sm:$0xff] }
 0x362   :  { %4031 = vmatpush3.msra.mxu0 %v3665_v53  ;;  %2492 = vmatprep.subr.mxu1 %v3657_v23  ;;  %v2358_v53 = vld [vmem:[%s6398_s9 + $0x88] sm:$0xff] }
 0x363   :  { %4032 = vmatprep.subr.mxu0 %v6413_v52  ;;  %2493 = vmatpush1.msra.mxu1 %v3656_v57  ;;  %v3659_v23 = vld [vmem:[%s6398_s9 + $0x248] sm:$0xff] }
 0x364   :  { %4033 = vmatpush3.msra.mxu0 %v3660_v39  ;;  %2494 = vmatprep.subr.mxu1 %v3652_v14  ;;  %v2354_v57 = vld [vmem:[%s6398_s9 + $0x68] sm:$0xff]  ;;  %v3658_v39 = vld [vmem:[%s6398_s9 + $0x240] sm:$0xff] }
 0x365   :  { %4034 = vmatprep.subr.mxu0 %v6413_v52  ;;  %2495 = vmatpush1.msra.mxu1 %v3651_v27  ;;  %v2353_v14 = vld [vmem:[%s6398_s9 + $0x60] sm:$0xff] }
 0x366   :  { %4035 = vmatpush3.msra.mxu0 %v3655_v42  ;;  %2496 = vmatprep.subr.mxu1 %v3647_v32  ;;  %v3654_v27 = vld [vmem:[%s6398_s9 + $0x220] sm:$0xff]  ;;  %v3653_v32 = vld [vmem:[%s6398_s9 + $0x218] sm:$0xff] }
 0x367   :  { %4036 = vmatprep.subr.mxu0 %v6413_v52  ;;  %2497 = vmatpush1.msra.mxu1 %v3646_v43  ;;  %v2349_v42 = vld [vmem:[%s6398_s9 + $0x40] sm:$0xff]  ;;  %v2348_v43 = vld [vmem:[%s6398_s9 + $0x38] sm:$0xff] }
 0x368   :  { %4037 = vmatpush3.msra.mxu0 %v3650_v41  ;;  %2545 = vmatprep.subr.mxu1 %v3704_v62  ;;  %v3649_v41 = vld [vmem:[%s6398_s9 + $0x1f8] sm:$0xff] }
 0x369   :  { %4038 = vmatprep.mubr.msk.f32.mxu0 %vm4218_vm3, %v6413_v52  ;;  %2760 = vmatprep.subr.mxu0 %v2399_v50  ;;  %v2344_v62 = vld [vmem:[%s6398_s9 + $0x18] sm:$0xff]  ;;  %v3648_v50 = vld [vmem:[%s6398_s9 + $0x1f0] sm:$0xff] }
 0x40c   :  { %v2215_v9 = vpop.f32.mrf.mxu1  ;;  %v2319_v25 = vpop.f32.mrf.mxu0 }
 0x40d   :  { %v2333_v30 = vmax.f32 %v2215_v9, %v2319_v25  ;;  %v2343_v9 = vld [vmem:[%s6398_s9 + $0x10] sm:$0xff]  ;;  %v2397_v25 = vld [vmem:[%s6398_s9 + $0x1c0] sm:$0xff] }
 0x40e   :  { %v2217_v44 = vpop.f32.mrf.mxu1  ;;  %v2321_v63 = vpop.f32.mrf.mxu0 }
 0x40f   :  { %2337 = vst.msk [vmem:[#allocation7] sm:$0xff] %vm2336_vm4, %v2333_v30  ;;  %v3768_v30 = vld [vmem:[%s6398_s9 + $0x580] sm:$0xff]  ;;  %v2396_v44 = vld [vmem:[%s6398_s9 + $0x1b8] sm:$0xff] }
 0x410   :  { %v3767_v63 = vld [vmem:[%s6398_s9 + $0x578] sm:$0xff] }
 0x414   :  { %v2220_v10 = vpop.f32.mrf.mxu1  ;;  %v2324_v16 = vpop.f32.mrf.mxu0 }
 0x415   :  { %v2334_v34 = vmax.f32 %v2220_v10, %v2324_v16  ;;  %v2392_v16 = vld [vmem:[%s6398_s9 + $0x198] sm:$0xff] }
 0x416   :  { %v2222_v45 = vpop.f32.mrf.mxu1  ;;  %v2326_v26 = vpop.f32.mrf.mxu0  ;;  %v5775_v10 = vld [vmem:[#allocation7] sm:$0xff] }
 0x417   :  { %2338 = vst.msk [vmem:[#allocation7 + $0x8] sm:$0xff] %vm2336_vm4, %v2334_v34  ;;  %v3763_v34 = vld [vmem:[%s6398_s9 + $0x558] sm:$0xff]  ;;  %v2391_v45 = vld [vmem:[%s6398_s9 + $0x190] sm:$0xff] }
 0x418   :  { %v3762_v26 = vld [vmem:[%s6398_s9 + $0x550] sm:$0xff] }
 0x41c   :  { %v2225_v2 = vpop.f32.mrf.mxu1  ;;  %v2329_v59 = vpop.f32.mrf.mxu0 }
 0x41d   :  { %v2335_v48 = vmax.f32 %v2225_v2, %v2329_v59  ;;  %v2387_v2 = vld [vmem:[%s6398_s9 + $0x170] sm:$0xff] }
 0x41e   :  { %v2227_v6 = vpop.f32.mrf.mxu1  ;;  %v2331_v13 = vpop.f32.mrf.mxu0  ;;  %v5620_v11 = vld [vmem:[#allocation7 + $0x8] sm:$0xff]  ;;  %v3758_v59 = vld [vmem:[%s6398_s9 + $0x530] sm:$0xff] }
 0x41f   :  { %2339 = vst.msk [vmem:[#allocation7 + $0x10] sm:$0xff] %vm2336_vm4, %v2335_v48  ;;  %3706 = vmatmul.mubr.msk.f32.vlgmr.msra.gmra.mxu1 %vm2336_vm4, %v5620_v11  ;;  %4039 = vmatmul.mubr.msk.f32.vlgmr.msra.gmra.mxu0 %vm2336_vm4, %v5620_v11  ;;  %v2386_v48 = vld [vmem:[%s6398_s9 + $0x168] sm:$0xff]  ;;  %v2381_v13 = vld [vmem:[%s6398_s9 + $0x140] sm:$0xff] }
 0x420   :  { %2546 = vmatpush1.msra.mxu1 %v3703_v56  ;;  %2761 = vmatpush1.msra.mxu0 %v2398_v55  ;;  %v3757_v56 = vld [vmem:[%s6398_s9 + $0x528] sm:$0xff] }
 0x421   :  { %2547 = vmatprep.subr.mxu1 %v3699_v36  ;;  %2762 = vmatprep.subr.mxu0 %v2394_v20  ;;  %v2382_v55 = vld [vmem:[%s6398_s9 + $0x148] sm:$0xff]  ;;  %v2377_v36 = vld [vmem:[%s6398_s9 + $0x120] sm:$0xff] }
 0x422   :  { %2548 = vmatpush1.msra.mxu1 %v3698_v19  ;;  %2763 = vmatpush1.msra.mxu0 %v2393_v4  ;;  %v3753_v6 = vld [vmem:[%s6398_s9 + $0x508] sm:$0xff]  ;;  %v3748_v20 = vld [vmem:[%s6398_s9 + $0x4e0] sm:$0xff]  ;;  %v2376_v19 = vld [vmem:[%s6398_s9 + $0x118] sm:$0xff] }
 0x423   :  { %2549 = vmatprep.subr.mxu1 %v3694_v15  ;;  %2764 = vmatprep.subr.mxu0 %v2389_v35  ;;  %v3747_v4 = vld [vmem:[%s6398_s9 + $0x4d8] sm:$0xff] }
 0x424   :  { %2550 = vmatpush1.msra.mxu1 %v3693_v24  ;;  %2765 = vmatpush1.msra.mxu0 %v2388_v54  ;;  %v2372_v15 = vld [vmem:[%s6398_s9 + $0xf8] sm:$0xff]  ;;  %v2371_v24 = vld [vmem:[%s6398_s9 + $0xf0] sm:$0xff] }
 0x425   :  { %2551 = vmatprep.subr.mxu1 %v3689_v28  ;;  %2766 = vmatprep.subr.mxu0 %v2384_v0  ;;  %v3743_v35 = vld [vmem:[%s6398_s9 + $0x4b8] sm:$0xff]  ;;  %v3742_v54 = vld [vmem:[%s6398_s9 + $0x4b0] sm:$0xff] }
 0x426   :  { %2552 = vmatpush1.msra.mxu1 %v3688_v5  ;;  %2767 = vmatpush1.msra.mxu0 %v2383_v1  ;;  %v2367_v28 = vld [vmem:[%s6398_s9 + $0xd0] sm:$0xff]  ;;  %v2366_v5 = vld [vmem:[%s6398_s9 + $0xc8] sm:$0xff] }
 0x427   :  { %2553 = vmatprep.subr.mxu1 %v3684_v12  ;;  %2768 = vmatprep.subr.mxu0 %v2379_v37  ;;  %v3738_v0 = vld [vmem:[%s6398_s9 + $0x490] sm:$0xff]  ;;  %v3737_v1 = vld [vmem:[%s6398_s9 + $0x488] sm:$0xff] }
 0x428   :  { %2554 = vmatpush1.msra.mxu1 %v3683_v3  ;;  %2769 = vmatpush1.msra.mxu0 %v2378_v17  ;;  %v2362_v12 = vld [vmem:[%s6398_s9 + $0xa8] sm:$0xff]  ;;  %v2361_v3 = vld [vmem:[%s6398_s9 + $0xa0] sm:$0xff] }
 0x429   :  { %2555 = vmatprep.subr.mxu1 %v3679_v58  ;;  %2770 = vmatprep.subr.mxu0 %v2374_v29  ;;  %v3733_v37 = vld [vmem:[%s6398_s9 + $0x468] sm:$0xff]  ;;  %v3732_v17 = vld [vmem:[%s6398_s9 + $0x460] sm:$0xff] }
 0x42a   :  { %2556 = vmatpush1.msra.mxu1 %v3678_v47  ;;  %2771 = vmatpush1.msra.mxu0 %v2373_v7  ;;  %v2357_v58 = vld [vmem:[%s6398_s9 + $0x80] sm:$0xff]  ;;  %v2356_v47 = vld [vmem:[%s6398_s9 + $0x78] sm:$0xff] }
 0x42b   :  { %2557 = vmatprep.subr.mxu1 %v3674_v38  ;;  %2772 = vmatprep.subr.mxu0 %v2369_v21  ;;  %v3728_v29 = vld [vmem:[%s6398_s9 + $0x440] sm:$0xff]  ;;  %v3727_v7 = vld [vmem:[%s6398_s9 + $0x438] sm:$0xff] }
 0x42c   :  { %2558 = vmatpush1.msra.mxu1 %v3673_v8  ;;  %2773 = vmatpush1.msra.mxu0 %v2368_v46  ;;  %v2352_v38 = vld [vmem:[%s6398_s9 + $0x58] sm:$0xff]  ;;  %v2351_v8 = vld [vmem:[%s6398_s9 + $0x50] sm:$0xff] }
 0x42d   :  { %2559 = vmatprep.subr.mxu1 %v3669_v49  ;;  %2774 = vmatprep.subr.mxu0 %v2364_v22  ;;  %v3723_v21 = vld [vmem:[%s6398_s9 + $0x418] sm:$0xff]  ;;  %v3722_v46 = vld [vmem:[%s6398_s9 + $0x410] sm:$0xff] }
 0x42e   :  { %2560 = vmatpush1.msra.mxu1 %v3668_v40  ;;  %2775 = vmatpush1.msra.mxu0 %v2363_v60  ;;  %v2347_v49 = vld [vmem:[%s6398_s9 + $0x30] sm:$0xff]  ;;  %v2346_v40 = vld [vmem:[%s6398_s9 + $0x28] sm:$0xff] }
 0x42f   :  { %2561 = vmatprep.subr.mxu1 %v3664_v18  ;;  %2776 = vmatprep.subr.mxu0 %v2359_v31  ;;  %v3718_v22 = vld [vmem:[%s6398_s9 + $0x3f0] sm:$0xff]  ;;  %v3717_v60 = vld [vmem:[%s6398_s9 + $0x3e8] sm:$0xff] }
 0x430   :  { %2562 = vmatpush1.msra.mxu1 %v3663_v33  ;;  %2777 = vmatpush1.msra.mxu0 %v2358_v53  ;;  %v2342_v18 = vld [vmem:[%s6398_s9 + $0x8] sm:$0xff]  ;;  %v2341_v33 = vld [vmem:[%s6398_s9] sm:$0xff] }
 0x431   :  { %2563 = vmatprep.subr.mxu1 %v3659_v23  ;;  %2778 = vmatprep.subr.mxu0 %v2354_v57  ;;  %v3713_v31 = vld [vmem:[%s6398_s9 + $0x3c8] sm:$0xff]  ;;  %v3712_v53 = vld [vmem:[%s6398_s9 + $0x3c0] sm:$0xff]  ;;  %v2400_v23 = vld [vmem:[%s6398_s9 + $0x1d8] sm:$0xff] }
 0x432   :  { %2564 = vmatpush1.msra.mxu1 %v3658_v39  ;;  %2779 = vmatpush1.msra.mxu0 %v2353_v14  ;;  %v3771_v57 = vld [vmem:[%s6398_s9 + $0x598] sm:$0xff]  ;;  %v5922_v39 = vld [vmem:[#allocation7 + $0x10] sm:$0xff]  ;;  %v2395_v14 = vld [vmem:[%s6398_s9 + $0x1b0] sm:$0xff] }
 0x433   :  { %2565 = vmatprep.subr.mxu1 %v3654_v27  ;;  %2780 = vmatprep.subr.mxu0 %v2349_v42  ;;  %v3766_v27 = vld [vmem:[%s6398_s9 + $0x570] sm:$0xff]  ;;  %v2390_v42 = vld [vmem:[%s6398_s9 + $0x188] sm:$0xff] }
 0x434   :  { %2566 = vmatpush1.msra.mxu1 %v3653_v32  ;;  %2781 = vmatpush1.msra.mxu0 %v2348_v43  ;;  %v3761_v32 = vld [vmem:[%s6398_s9 + $0x548] sm:$0xff]  ;;  %v2385_v43 = vld [vmem:[%s6398_s9 + $0x160] sm:$0xff] }
 0x435   :  { %2567 = vmatprep.subr.mxu1 %v3649_v41  ;;  %2782 = vmatprep.subr.mxu0 %v2344_v62  ;;  %v3756_v41 = vld [vmem:[%s6398_s9 + $0x520] sm:$0xff]  ;;  %v2380_v62 = vld [vmem:[%s6398_s9 + $0x138] sm:$0xff] }
 0x436   :  { %2568 = vmatpush1.msra.mxu1 %v3648_v50  ;;  %2601 = vmatprep.mubr.f32.mxu1 %v6413_v52  ;;  %v3751_v50 = vld [vmem:[%s6398_s9 + $0x4f8] sm:$0xff] }
 0x437   :  { %2783 = vmatpush1.msra.mxu0 %v2343_v9  ;;  %2816 = vmatprep.mubr.f32.mxu0 %v6413_v52  ;;  %v2375_v9 = vld [vmem:[%s6398_s9 + $0x110] sm:$0xff] }
 0x438   :  { %3707 = vmatmul.mubr.msk.f32.vlgmr.msra.gmra.mxu1 %vm2336_vm4, %v5620_v11  ;;  %2689 = vmatprep.subr.mxu1 %v2397_v25  ;;  %v3752_v11 = vld [vmem:[%s6398_s9 + $0x500] sm:$0xff]  ;;  %v3746_v25 = vld [vmem:[%s6398_s9 + $0x4d0] sm:$0xff] }
 0x439   :  { %3710 = vmatmul.mubr.msk.f32.vlgmr.msra.gmra.mxu0 %vm2336_vm4, %v5775_v10  ;;  %2966 = vmatprep.subr.mxu0 %v3768_v30  ;;  %v2370_v30 = vld [vmem:[%s6398_s9 + $0xe8] sm:$0xff] }
 0x43a   :  { %2690 = vmatpush1.msra.mxu1 %v2396_v44  ;;  %2967 = vmatpush1.msra.mxu0 %v3767_v63  ;;  %v3741_v44 = vld [vmem:[%s6398_s9 + $0x4a8] sm:$0xff]  ;;  %v2365_v63 = vld [vmem:[%s6398_s9 + $0xc0] sm:$0xff] }
 0x43b   :  { %2691 = vmatprep.subr.mxu1 %v2392_v16  ;;  %2968 = vmatprep.subr.mxu0 %v3763_v34  ;;  %v3736_v16 = vld [vmem:[%s6398_s9 + $0x480] sm:$0xff]  ;;  %v2360_v34 = vld [vmem:[%s6398_s9 + $0x98] sm:$0xff] }
 0x43c   :  { %2692 = vmatpush1.msra.mxu1 %v2391_v45  ;;  %2969 = vmatpush1.msra.mxu0 %v3762_v26  ;;  %v3731_v45 = vld [vmem:[%s6398_s9 + $0x458] sm:$0xff]  ;;  %v2355_v26 = vld [vmem:[%s6398_s9 + $0x70] sm:$0xff] }
 0x43d   :  { %2693 = vmatprep.subr.mxu1 %v2387_v2  ;;  %2970 = vmatprep.subr.mxu0 %v3758_v59  ;;  %v3726_v2 = vld [vmem:[%s6398_s9 + $0x430] sm:$0xff]  ;;  %v2350_v59 = vld [vmem:[%s6398_s9 + $0x48] sm:$0xff] }
 0x43e   :  { %2694 = vmatpush1.msra.mxu1 %v2386_v48  ;;  %2971 = vmatpush1.msra.mxu0 %v3757_v56  ;;  %v3721_v48 = vld [vmem:[%s6398_s9 + $0x408] sm:$0xff]  ;;  %v2345_v56 = vld [vmem:[%s6398_s9 + $0x20] sm:$0xff] }
 0x43f   :  { %2695 = vmatprep.subr.mxu1 %v2382_v55  ;;  %2972 = vmatprep.subr.mxu0 %v3753_v6  ;;  %v3716_v55 = vld [vmem:[%s6398_s9 + $0x3e0] sm:$0xff]  ;;  %v3770_v6 = vld [vmem:[%s6398_s9 + $0x590] sm:$0xff] }
 0x440   :  { %2696 = vmatpush1.msra.mxu1 %v2381_v13  ;;  %2973 = vmatpush1.msra.mxu0 %v3752_v11  ;;  %v3769_v13 = vld [vmem:[%s6398_s9 + $0x588] sm:$0xff] }
 0x441   :  { %2697 = vmatprep.subr.mxu1 %v2377_v36  ;;  %2974 = vmatprep.subr.mxu0 %v3748_v20  ;;  %v3765_v11 = vld [vmem:[%s6398_s9 + $0x568] sm:$0xff]  ;;  %v3764_v36 = vld [vmem:[%s6398_s9 + $0x560] sm:$0xff] }
 0x442   :  { %2698 = vmatpush1.msra.mxu1 %v2376_v19  ;;  %2975 = vmatpush1.msra.mxu0 %v3747_v4  ;;  %v3760_v20 = vld [vmem:[%s6398_s9 + $0x540] sm:$0xff]  ;;  %v3759_v19 = vld [vmem:[%s6398_s9 + $0x538] sm:$0xff]  ;;  %v3754_v4 = vld [vmem:[%s6398_s9 + $0x510] sm:$0xff] }
 0x443   :  { %2699 = vmatprep.subr.mxu1 %v2372_v15  ;;  %2976 = vmatprep.subr.mxu0 %v3743_v35  ;;  %v3750_v15 = vld [vmem:[%s6398_s9 + $0x4f0] sm:$0xff]  ;;  %v3749_v35 = vld [vmem:[%s6398_s9 + $0x4e8] sm:$0xff] }
 0x444   :  { %2700 = vmatpush1.msra.mxu1 %v2371_v24  ;;  %2977 = vmatpush1.msra.mxu0 %v3742_v54  ;;  %v3745_v24 = vld [vmem:[%s6398_s9 + $0x4c8] sm:$0xff]  ;;  %v3744_v54 = vld [vmem:[%s6398_s9 + $0x4c0] sm:$0xff] }
 0x445   :  { %2701 = vmatprep.subr.mxu1 %v2367_v28  ;;  %2978 = vmatprep.subr.mxu0 %v3738_v0  ;;  %v3740_v28 = vld [vmem:[%s6398_s9 + $0x4a0] sm:$0xff]  ;;  %v3739_v0 = vld [vmem:[%s6398_s9 + $0x498] sm:$0xff] }
 0x446   :  { %2702 = vmatpush1.msra.mxu1 %v2366_v5  ;;  %2979 = vmatpush1.msra.mxu0 %v3737_v1  ;;  %v3735_v5 = vld [vmem:[%s6398_s9 + $0x478] sm:$0xff]  ;;  %v3734_v1 = vld [vmem:[%s6398_s9 + $0x470] sm:$0xff] }
 0x447   :  { %2703 = vmatprep.subr.mxu1 %v2362_v12  ;;  %2980 = vmatprep.subr.mxu0 %v3733_v37  ;;  %v3730_v12 = vld [vmem:[%s6398_s9 + $0x450] sm:$0xff]  ;;  %v3729_v37 = vld [vmem:[%s6398_s9 + $0x448] sm:$0xff] }
 0x448   :  { %2704 = vmatpush1.msra.mxu1 %v2361_v3  ;;  %2981 = vmatpush1.msra.mxu0 %v3732_v17  ;;  %v3725_v3 = vld [vmem:[%s6398_s9 + $0x428] sm:$0xff]  ;;  %v3724_v17 = vld [vmem:[%s6398_s9 + $0x420] sm:$0xff] }
 0x449   :  { %2705 = vmatprep.subr.mxu1 %v2357_v58  ;;  %2982 = vmatprep.subr.mxu0 %v3728_v29  ;;  %v3720_v58 = vld [vmem:[%s6398_s9 + $0x400] sm:$0xff]  ;;  %v3719_v29 = vld [vmem:[%s6398_s9 + $0x3f8] sm:$0xff] }
 0x44a   :  { %2706 = vmatpush1.msra.mxu1 %v2356_v47  ;;  %2983 = vmatpush1.msra.mxu0 %v3727_v7  ;;  %v3715_v47 = vld [vmem:[%s6398_s9 + $0x3d8] sm:$0xff]  ;;  %v3714_v7 = vld [vmem:[%s6398_s9 + $0x3d0] sm:$0xff] }
 0x44b   :  { %2707 = vmatprep.subr.mxu1 %v2352_v38  ;;  %2984 = vmatprep.subr.mxu0 %v3723_v21  ;;  %v3238_v38 = vld [vmem:[%s6400_s11 + $0xf8] sm:$0xff] }
 0x44c   :  { %2708 = vmatpush1.msra.mxu1 %v2351_v8  ;;  %2985 = vmatpush1.msra.mxu0 %v3722_v46  ;;  %v3222_v21 = vld [vmem:[%s6400_s11 + $0x78] sm:$0xff]  ;;  %v3237_v8 = vld [vmem:[%s6400_s11 + $0xf0] sm:$0xff] }
 0x44d   :  { %2709 = vmatprep.subr.mxu1 %v2347_v49  ;;  %2986 = vmatprep.subr.mxu0 %v3718_v22  ;;  %v3221_v46 = vld [vmem:[%s6400_s11 + $0x70] sm:$0xff]  ;;  %v3236_v49 = vld [vmem:[%s6400_s11 + $0xe8] sm:$0xff] }
 0x44e   :  { %2710 = vmatpush1.msra.mxu1 %v2346_v40  ;;  %2987 = vmatpush1.msra.mxu0 %v3717_v60  ;;  %v3220_v22 = vld [vmem:[%s6400_s11 + $0x68] sm:$0xff]  ;;  %v3235_v40 = vld [vmem:[%s6400_s11 + $0xe0] sm:$0xff] }
 0x44f   :  { %2711 = vmatprep.subr.mxu1 %v2342_v18  ;;  %2988 = vmatprep.subr.mxu0 %v3713_v31  ;;  %v3219_v60 = vld [vmem:[%s6400_s11 + $0x60] sm:$0xff]  ;;  %v3234_v18 = vld [vmem:[%s6400_s11 + $0xd8] sm:$0xff] }
 0x450   :  { %2712 = vmatpush1.msra.mxu1 %v2341_v33  ;;  %2745 = vmatprep.mubr.f32.mxu1 %v6413_v52  ;;  %v3218_v31 = vld [vmem:[%s6400_s11 + $0x58] sm:$0xff]  ;;  %v3233_v33 = vld [vmem:[%s6400_s11 + $0xd0] sm:$0xff] }
 0x451   :  { %2989 = vmatpush1.msra.mxu0 %v3712_v53  ;;  %3022 = vmatprep.mubr.f32.mxu0 %v6413_v52  ;;  %v3217_v53 = vld [vmem:[%s6400_s11 + $0x50] sm:$0xff] }
 0x452   :  { %3709 = vmatmul.mubr.msk.f32.vlgmr.msra.gmra.mxu1 %vm2336_vm4, %v5775_v10  ;;  %4041 = vmatprep.subr.mxu1 %v6413_v52 }
 0x453   :  { %3772 = vmatmul.mubr.msk.f32.vlgmr.msra.gmra.mxu0 %vm2336_vm4, %v5922_v39  ;;  %4068 = vmatprep.subr.mxu0 %v6413_v52 }
 0x454   :  { %4042 = vmatpush3.msra.mxu1 %v2400_v23  ;;  %4069 = vmatpush3.msra.mxu0 %v3771_v57  ;;  %v3232_v23 = vld [vmem:[%s6400_s11 + $0xc8] sm:$0xff] }
 0x455   :  { %4043 = vmatprep.subr.mxu1 %v6413_v52  ;;  %4070 = vmatprep.subr.mxu0 %v6413_v52  ;;  %v3216_v57 = vld [vmem:[%s6400_s11 + $0x48] sm:$0xff] }
 0x456   :  { %4044 = vmatpush3.msra.mxu1 %v2395_v14  ;;  %4071 = vmatpush3.msra.mxu0 %v3766_v27  ;;  %v3215_v14 = vld [vmem:[%s6400_s11 + $0x40] sm:$0xff]  ;;  %v3230_v27 = vld [vmem:[%s6400_s11 + $0xb8] sm:$0xff] }
 0x457   :  { %4045 = vmatprep.subr.mxu1 %v6413_v52  ;;  %4072 = vmatprep.subr.mxu0 %v6413_v52 }
 0x458   :  { %4046 = vmatpush3.msra.mxu1 %v2390_v42  ;;  %4073 = vmatpush3.msra.mxu0 %v3761_v32  ;;  %v3214_v42 = vld [vmem:[%s6400_s11 + $0x38] sm:$0xff]  ;;  %v3229_v32 = vld [vmem:[%s6400_s11 + $0xb0] sm:$0xff] }
 0x459   :  { %4047 = vmatprep.subr.mxu1 %v6413_v52  ;;  %4074 = vmatprep.subr.mxu0 %v6413_v52 }
 0x45a   :  { %4048 = vmatpush3.msra.mxu1 %v2385_v43  ;;  %4075 = vmatpush3.msra.mxu0 %v3756_v41  ;;  %v3213_v43 = vld [vmem:[%s6400_s11 + $0x30] sm:$0xff]  ;;  %v3228_v41 = vld [vmem:[%s6400_s11 + $0xa8] sm:$0xff] }
 0x45b   :  { %4049 = vmatprep.subr.mxu1 %v6413_v52  ;;  %4076 = vmatprep.subr.mxu0 %v6413_v52 }
 0x45c   :  { %4050 = vmatpush3.msra.mxu1 %v2380_v62  ;;  %4077 = vmatpush3.msra.mxu0 %v3751_v50  ;;  %v3212_v62 = vld [vmem:[%s6400_s11 + $0x28] sm:$0xff]  ;;  %v3227_v50 = vld [vmem:[%s6400_s11 + $0xa0] sm:$0xff] }
 0x45d   :  { %4051 = vmatprep.subr.mxu1 %v6413_v52  ;;  %4078 = vmatprep.subr.mxu0 %v6413_v52 }
 0x45e   :  { %4052 = vmatpush3.msra.mxu1 %v2375_v9  ;;  %4079 = vmatpush3.msra.mxu0 %v3746_v25  ;;  %v3211_v9 = vld [vmem:[%s6400_s11 + $0x20] sm:$0xff]  ;;  %v3226_v25 = vld [vmem:[%s6400_s11 + $0x98] sm:$0xff] }
 0x45f   :  { %4053 = vmatprep.subr.mxu1 %v6413_v52  ;;  %4080 = vmatprep.subr.mxu0 %v6413_v52 }
 0x460   :  { %4054 = vmatpush3.msra.mxu1 %v2370_v30  ;;  %4081 = vmatpush3.msra.mxu0 %v3741_v44  ;;  %v3210_v30 = vld [vmem:[%s6400_s11 + $0x18] sm:$0xff]  ;;  %v3225_v44 = vld [vmem:[%s6400_s11 + $0x90] sm:$0xff] }
 0x461   :  { %4055 = vmatprep.subr.mxu1 %v6413_v52  ;;  %4082 = vmatprep.subr.mxu0 %v6413_v52 }
 0x462   :  { %4056 = vmatpush3.msra.mxu1 %v2365_v63  ;;  %4083 = vmatpush3.msra.mxu0 %v3736_v16  ;;  %v3209_v63 = vld [vmem:[%s6400_s11 + $0x10] sm:$0xff]  ;;  %v3224_v16 = vld [vmem:[%s6400_s11 + $0x88] sm:$0xff] }
 0x463   :  { %4057 = vmatprep.subr.mxu1 %v6413_v52  ;;  %4084 = vmatprep.subr.mxu0 %v6413_v52 }
 0x464   :  { %4058 = vmatpush3.msra.mxu1 %v2360_v34  ;;  %4085 = vmatpush3.msra.mxu0 %v3731_v45  ;;  %v3208_v34 = vld [vmem:[%s6400_s11 + $0x8] sm:$0xff]  ;;  %v3223_v45 = vld [vmem:[%s6400_s11 + $0x80] sm:$0xff] }
 0x465   :  { %4059 = vmatprep.subr.mxu1 %v6413_v52  ;;  %4086 = vmatprep.subr.mxu0 %v6413_v52 }
 0x466   :  { %4060 = vmatpush3.msra.mxu1 %v2355_v26  ;;  %4087 = vmatpush3.msra.mxu0 %v3726_v2  ;;  %v3207_v26 = vld [vmem:[%s6400_s11] sm:$0xff]  ;;  %v3270_v2 = vld [vmem:[%s6400_s11 + $0x1f8] sm:$0xff] }
 0x467   :  { %4061 = vmatprep.subr.mxu1 %v6413_v52  ;;  %4088 = vmatprep.subr.mxu0 %v6413_v52 }
 0x468   :  { %4062 = vmatpush3.msra.mxu1 %v2350_v59  ;;  %4089 = vmatpush3.msra.mxu0 %v3721_v48  ;;  %v3254_v59 = vld [vmem:[%s6400_s11 + $0x178] sm:$0xff]  ;;  %v3269_v48 = vld [vmem:[%s6400_s11 + $0x1f0] sm:$0xff] }
 0x469   :  { %4063 = vmatprep.subr.mxu1 %v6413_v52  ;;  %4090 = vmatprep.subr.mxu0 %v6413_v52 }
 0x46a   :  { %4064 = vmatpush3.msra.mxu1 %v2345_v56  ;;  %4065 = vmatprep.mubr.msk.f32.mxu1 %vm4218_vm3, %v6413_v52  ;;  %v3253_v56 = vld [vmem:[%s6400_s11 + $0x170] sm:$0xff] }
 0x46b   :  { %4091 = vmatpush3.msra.mxu0 %v3716_v55  ;;  %4092 = vmatprep.mubr.msk.f32.mxu0 %vm4218_vm3, %v6413_v52  ;;  %v3268_v55 = vld [vmem:[%s6400_s11 + $0x1e8] sm:$0xff] }
 0x46c   :  { %4066 = vmatmul.mubr.msk.f32.vlgmr.msra.gmra.mxu1 %vm2336_vm4, %v5775_v10  ;;  %3037 = vmatprep.subr.mxu1 %v3770_v6  ;;  %v3755_v10 = vld [vmem:[%s6398_s9 + $0x518] sm:$0xff]  ;;  %v3252_v6 = vld [vmem:[%s6400_s11 + $0x168] sm:$0xff] }
 0x46d   :  { %4093 = vmatmul.mubr.msk.f32.vlgmr.msra.gmra.mxu0 %vm2336_vm4, %v5922_v39  ;;  %3038 = vmatpush1.msra.mxu1 %v3769_v13  ;;  %v3267_v13 = vld [vmem:[%s6400_s11 + $0x1e0] sm:$0xff] }
 0x46e   :  { %3039 = vmatprep.subr.mxu1 %v3765_v11  ;;  %3093 = vmatprep.mubr.f32.mxu1 %v6413_v52  ;;  %v3251_v11 = vld [vmem:[%s6400_s11 + $0x160] sm:$0xff] }
 0x46f   :  { %3040 = vmatpush1.msra.mxu1 %v3764_v36  ;;  %3962 = vmatprep.subr.mxu0 %v3270_v2  ;;  %v3266_v36 = vld [vmem:[%s6400_s11 + $0x1d8] sm:$0xff]  ;;  %v3277_v2 = vld [vmem:[%s6400_s11 + $0x230] sm:$0xff] }
 0x470   :  { %3041 = vmatprep.subr.mxu1 %v3760_v20  ;;  %3963 = vmatpush3.msra.mxu0 %v3254_v59  ;;  %v3250_v20 = vld [vmem:[%s6400_s11 + $0x158] sm:$0xff] }
 0x471   :  { %3042 = vmatpush1.msra.mxu1 %v3759_v19  ;;  %3964 = vmatprep.subr.mxu0 %v3269_v48  ;;  %v3265_v19 = vld [vmem:[%s6400_s11 + $0x1d0] sm:$0xff] }
 0x472   :  { %3043 = vmatprep.subr.mxu1 %v3755_v10  ;;  %3965 = vmatpush3.msra.mxu0 %v3253_v56  ;;  %v3249_v10 = vld [vmem:[%s6400_s11 + $0x150] sm:$0xff]  ;;  %v3276_v56 = vld [vmem:[%s6400_s11 + $0x228] sm:$0xff] }
 0x473   :  { %3044 = vmatpush1.msra.mxu1 %v3754_v4  ;;  %3966 = vmatprep.subr.mxu0 %v3268_v55  ;;  %v3264_v4 = vld [vmem:[%s6400_s11 + $0x1c8] sm:$0xff] }
 0x474   :  { %3045 = vmatprep.subr.mxu1 %v3750_v15  ;;  %3967 = vmatpush3.msra.mxu0 %v3252_v6  ;;  %v3248_v15 = vld [vmem:[%s6400_s11 + $0x148] sm:$0xff]  ;;  %v3275_v6 = vld [vmem:[%s6400_s11 + $0x220] sm:$0xff] }
 0x475   :  { %3046 = vmatpush1.msra.mxu1 %v3749_v35  ;;  %3968 = vmatprep.subr.mxu0 %v3267_v13  ;;  %v3263_v35 = vld [vmem:[%s6400_s11 + $0x1c0] sm:$0xff] }
 0x476   :  { %3047 = vmatprep.subr.mxu1 %v3745_v24  ;;  %3969 = vmatpush3.msra.mxu0 %v3251_v11  ;;  %v3247_v24 = vld [vmem:[%s6400_s11 + $0x140] sm:$0xff]  ;;  %v6415_v11 = vld [vmem:[#allocation18_spill] sm:$0xff] }
 0x477   :  { %3048 = vmatpush1.msra.mxu1 %v3744_v54  ;;  %3970 = vmatprep.subr.mxu0 %v3266_v36  ;;  %v3262_v54 = vld [vmem:[%s6400_s11 + $0x1b8] sm:$0xff]  ;;  %v3195_v36 = vsub.s32 4, %v6415_v11 }
 0x478   :  { %3049 = vmatprep.subr.mxu1 %v3740_v28  ;;  %3971 = vmatpush3.msra.mxu0 %v3250_v20  ;;  %v3246_v28 = vld [vmem:[%s6400_s11 + $0x138] sm:$0xff] }
 0x479   :  { %3050 = vmatpush1.msra.mxu1 %v3739_v0  ;;  %3972 = vmatprep.subr.mxu0 %v3265_v19  ;;  %v3261_v0 = vld [vmem:[%s6400_s11 + $0x1b0] sm:$0xff]  ;;  %v3274_v20 = vld [vmem:[%s6400_s11 + $0x218] sm:$0xff] }
 0x47a   :  { %3051 = vmatprep.subr.mxu1 %v3735_v5  ;;  %3973 = vmatpush3.msra.mxu0 %v3249_v10  ;;  %v3245_v5 = vld [vmem:[%s6400_s11 + $0x130] sm:$0xff] }
 0x47b   :  { %3052 = vmatpush1.msra.mxu1 %v3734_v1  ;;  %3974 = vmatprep.subr.mxu0 %v3264_v4  ;;  %v3260_v1 = vld [vmem:[%s6400_s11 + $0x1a8] sm:$0xff]  ;;  %v3273_v19 = vld [vmem:[%s6400_s11 + $0x210] sm:$0xff] }
 0x47c   :  { %3053 = vmatprep.subr.mxu1 %v3730_v12  ;;  %3975 = vmatpush3.msra.mxu0 %v3248_v15  ;;  %v3244_v12 = vld [vmem:[%s6400_s11 + $0x128] sm:$0xff] }
 0x47d   :  { %3054 = vmatpush1.msra.mxu1 %v3729_v37  ;;  %3976 = vmatprep.subr.mxu0 %v3263_v35  ;;  %v3259_v37 = vld [vmem:[%s6400_s11 + $0x1a0] sm:$0xff]  ;;  %v3272_v15 = vld [vmem:[%s6400_s11 + $0x208] sm:$0xff] }
 0x47e   :  { %3055 = vmatprep.subr.mxu1 %v3725_v3  ;;  %3977 = vmatpush3.msra.mxu0 %v3247_v24  ;;  %v3243_v3 = vld [vmem:[%s6400_s11 + $0x120] sm:$0xff] }
 0x47f   :  { %3056 = vmatpush1.msra.mxu1 %v3724_v17  ;;  %3978 = vmatprep.subr.mxu0 %v3262_v54  ;;  %v3258_v17 = vld [vmem:[%s6400_s11 + $0x198] sm:$0xff]  ;;  %v3271_v35 = vld [vmem:[%s6400_s11 + $0x200] sm:$0xff]  ;;  %v3191_v54 = vsub.s32 3, %v6415_v11 }
 0x480   :  { %3057 = vmatprep.subr.mxu1 %v3720_v58  ;;  %3979 = vmatpush3.msra.mxu0 %v3246_v28  ;;  %v3242_v58 = vld [vmem:[%s6400_s11 + $0x118] sm:$0xff]  ;;  %v3187_v28 = vsub.s32 2, %v6415_v11 }
 0x481   :  { %3058 = vmatpush1.msra.mxu1 %v3719_v29  ;;  %3980 = vmatprep.subr.mxu0 %v3261_v0  ;;  %v3257_v29 = vld [vmem:[%s6400_s11 + $0x190] sm:$0xff] }
 0x482   :  { %3059 = vmatprep.subr.mxu1 %v3715_v47  ;;  %3981 = vmatpush3.msra.mxu0 %v3245_v5  ;;  %v3241_v47 = vld [vmem:[%s6400_s11 + $0x110] sm:$0xff] }
 0x483   :  { %3060 = vmatpush1.msra.mxu1 %v3714_v7  ;;  %3982 = vmatprep.subr.mxu0 %v3260_v1  ;;  %v3256_v7 = vld [vmem:[%s6400_s11 + $0x188] sm:$0xff] }
 0x484   :  { %3773 = vmatmul.mubr.msk.f32.vlgmr.msra.gmra.mxu1 %vm2336_vm4, %v5922_v39  ;;  %3927 = vmatprep.subr.mxu1 %v3238_v38  ;;  %v3231_v39 = vld [vmem:[%s6400_s11 + $0xc0] sm:$0xff]  ;;  %v3240_v38 = vld [vmem:[%s6400_s11 + $0x108] sm:$0xff] }
 0x485   :  { %3928 = vmatpush3.msra.mxu1 %v3222_v21  ;;  %3983 = vmatpush3.msra.mxu0 %v3244_v12  ;;  %v3255_v21 = vld [vmem:[%s6400_s11 + $0x180] sm:$0xff] }
 0x486   :  { %3929 = vmatprep.subr.mxu1 %v3237_v8  ;;  %3984 = vmatprep.subr.mxu0 %v3259_v37  ;;  %v3239_v8 = vld [vmem:[%s6400_s11 + $0x100] sm:$0xff] }
 0x487   :  { %3930 = vmatpush3.msra.mxu1 %v3221_v46  ;;  %3985 = vmatpush3.msra.mxu0 %v3243_v3 }
 0x488   :  { %3931 = vmatprep.subr.mxu1 %v3236_v49  ;;  %3986 = vmatprep.subr.mxu0 %v3258_v17 }
 0x489   :  { %3932 = vmatpush3.msra.mxu1 %v3220_v22  ;;  %3987 = vmatpush3.msra.mxu0 %v3242_v58 }
 0x48a   :  { %3933 = vmatprep.subr.mxu1 %v3235_v40  ;;  %3988 = vmatprep.subr.mxu0 %v3257_v29 }
 0x48b   :  { %3934 = vmatpush3.msra.mxu1 %v3219_v60  ;;  %3989 = vmatpush3.msra.mxu0 %v3241_v47 }
 0x48c   :  { %3935 = vmatprep.subr.mxu1 %v3234_v18  ;;  %3990 = vmatprep.subr.mxu0 %v3256_v7 }
 0x48d   :  { %3936 = vmatpush3.msra.mxu1 %v3218_v31  ;;  %3991 = vmatpush3.msra.mxu0 %v3240_v38 }
 0x48e   :  { %3937 = vmatprep.subr.mxu1 %v3233_v33  ;;  %3992 = vmatprep.subr.mxu0 %v3255_v21 }
 0x48f   :  { %3938 = vmatpush3.msra.mxu1 %v3217_v53  ;;  %3993 = vmatpush3.msra.mxu0 %v3239_v8 }
 0x490   :  { %3939 = vmatprep.subr.mxu1 %v3232_v23 }
 0x491   :  { %3940 = vmatpush3.msra.mxu1 %v3216_v57 }
 0x492   :  { %3941 = vmatprep.subr.mxu1 %v3231_v39  ;;  %v6302_v39 = vld [vmem:[%s6399_s10] sm:$0x1f] }
 0x493   :  { %3942 = vmatpush3.msra.mxu1 %v3215_v14  ;;  %v3196_v4 = vrot.slane %v6302_v39, %v3195_v36  ;;  %v3192_v12 = vrot.slane %v6302_v39, %v3191_v54  ;;  %v3188_v3 = vrot.slane %v6302_v39, %v3187_v28 }
 0x494   :  { %3943 = vmatprep.subr.mxu1 %v3230_v27 }
 0x495   :  { %3944 = vmatpush3.msra.mxu1 %v3214_v42  ;;  %v3184_v42 = vrot.slane %v6302_v39, %v4709_v61  ;;  %v3284_v61 = vld [vmem:[%s6400_s11 + $0x268] sm:$0xff] }
 0x496   :  { %3945 = vmatprep.subr.mxu1 %v3229_v32 }
 0x497   :  { %3946 = vmatpush3.msra.mxu1 %v3213_v43  ;;  %v3180_v43 = vrot.slane %v6302_v39, %v6414_v51  ;;  %v3283_v51 = vld [vmem:[%s6400_s11 + $0x260] sm:$0xff] }
 0x498   :  { %3947 = vmatprep.subr.mxu1 %v3228_v41 }
 0x499   :  { %3948 = vmatpush3.msra.mxu1 %v3212_v62 }
 0x49a   :  { %3949 = vmatprep.subr.mxu1 %v3227_v50 }
 0x49b   :  { %3950 = vmatpush3.msra.mxu1 %v3211_v9 }
 0x49c   :  { %3951 = vmatprep.subr.mxu1 %v3226_v25  ;;  %v3286_v25 = vld [vmem:[%s6400_s11 + $0x278] sm:$0xff] }
 0x49d   :  { %3952 = vmatpush3.msra.mxu1 %v3210_v30  ;;  %v3285_v30 = vld [vmem:[%s6400_s11 + $0x270] sm:$0xff] }
 0x49e   :  { %3953 = vmatprep.subr.mxu1 %v3225_v44  ;;  %v3282_v44 = vld [vmem:[%s6400_s11 + $0x258] sm:$0xff] }
 0x49f   :  { %3954 = vmatpush3.msra.mxu1 %v3209_v63  ;;  %v3281_v63 = vld [vmem:[%s6400_s11 + $0x250] sm:$0xff] }
 0x4a0   :  { %3955 = vmatprep.subr.mxu1 %v3224_v16  ;;  %v3280_v16 = vld [vmem:[%s6400_s11 + $0x248] sm:$0xff] }
 0x4a1   :  { %3956 = vmatpush3.msra.mxu1 %v3208_v34  ;;  %v3279_v34 = vld [vmem:[%s6400_s11 + $0x240] sm:$0xff] }
 0x4a2   :  { %3957 = vmatprep.subr.mxu1 %v3223_v45  ;;  %v3278_v45 = vld [vmem:[%s6400_s11 + $0x238] sm:$0xff] }
 0x4a3   :  { %3958 = vmatpush3.msra.mxu1 %v3207_v26 }
 0x4a4   :  { %4095 = vmatprep.subr.mxu1 %v6413_v52 }
 0x4df   :  { %v2674_v46 = vpop.f32.mrf.mxu0  ;;  %v2532_v22 = vpop.f32.mrf.mxu1 }
 0x4e1   :  { %v4040_v49 = vpop.f32.mrf.mxu0  ;;  %v2534_v40 = vpop.f32.mrf.mxu1 }
 0x4f8   :  { %v6291_v60 = vpop.f32.mrf.mxu1 }
 0x4f9   :  { %v6293_v18 = vpop.f32.mrf.mxu0 }
 0x4fa   :  { %v6295_v31 = vpop.f32.mrf.mxu1  ;;  %v2819_v0 = vadd.f32 %v6293_v18, %v6291_v60 }
 0x4fb   :  { %v6297_v33 = vpop.f32.mrf.mxu0 }
 0x4fc   :  { %v2821_v1 = vadd.f32 %v6297_v33, %v6295_v31 }
 0x512   :  { %v2747_v53 = vpop.f32.mrf.mxu1 }
 0x513   :  { %v2748_v23 = vadd.f32 %v2747_v53, %v2532_v22  ;;  %v3024_v57 = vpop.f32.mrf.mxu0 }
 0x514   :  { %v2749_v14 = vpop.f32.mrf.mxu1 }
 0x515   :  { %v2750_v27 = vadd.f32 %v2749_v14, %v2534_v40  ;;  %v3170_v32 = vadd.f32 %v3024_v57, %v2748_v23  ;;  %v3026_v41 = vpop.f32.mrf.mxu0 }
 0x517   :  { %v3171_v62 = vadd.f32 %v3026_v41, %v2750_v27  ;;  %v3202_v9 = vadd.f32 %v3180_v43, %v3170_v32 }
 0x519   :  { %v3203_v50 = vadd.f32 %v3184_v42, %v3171_v62 }
 0x51b   :  { %3358 = vmatprep.mubr.f32.mxu1 %v3203_v50 }
 0x51c   :  { %3359 = vmatmul.mubr.f32.vlgmr.msra.gmra.mxu1 %v3202_v9 }
 0x51d   :  { %4096 = vmatpush3.msra.mxu1 %v3286_v25  ;;  %4127 = vmatprep.mubr.msk.f32.mxu1 %vm4218_vm3, %v6413_v52 }
 0x51e   :  { %4097 = vmatprep.subr.mxu1 %v6413_v52 }
 0x51f   :  { %4098 = vmatpush3.msra.mxu1 %v3285_v30 }
 0x520   :  { %4099 = vmatprep.subr.mxu1 %v6413_v52 }
 0x521   :  { %4100 = vmatpush3.msra.mxu1 %v3284_v61 }
 0x522   :  { %4101 = vmatprep.subr.mxu1 %v6413_v52 }
 0x523   :  { %4102 = vmatpush3.msra.mxu1 %v3283_v51 }
 0x524   :  { %4103 = vmatprep.subr.mxu1 %v6413_v52 }
 0x525   :  { %4104 = vmatpush3.msra.mxu1 %v3282_v44 }
 0x526   :  { %4105 = vmatprep.subr.mxu1 %v6413_v52 }
 0x527   :  { %4106 = vmatpush3.msra.mxu1 %v3281_v63 }
 0x528   :  { %4107 = vmatprep.subr.mxu1 %v6413_v52 }
 0x529   :  { %4108 = vmatpush3.msra.mxu1 %v3280_v16 }
 0x52a   :  { %4109 = vmatprep.subr.mxu1 %v6413_v52 }
 0x52b   :  { %4110 = vmatpush3.msra.mxu1 %v3279_v34 }
 0x52c   :  { %v2889_v26 = vpop.f32.mrf.mxu1  ;;  %4111 = vmatprep.subr.mxu1 %v6413_v52 }
 0x52d   :  { %v3166_v59 = vpop.f32.mrf.mxu0  ;;  %4112 = vmatpush3.msra.mxu1 %v3278_v45  ;;  %v2890_v13 = vadd.f32 %v2889_v26, %v2674_v46  ;;  %v3775_v46 = vld [vmem:[%s6401_s12] ss:$0 sm:$0xff] }
 0x52e   :  { %v4067_v48 = vpop.f32.mrf.mxu1  ;;  %4113 = vmatprep.subr.mxu1 %v6413_v52 }
 0x52f   :  { %v4094_v55 = vpop.f32.mrf.mxu0  ;;  %4114 = vmatpush3.msra.mxu1 %v3277_v2  ;;  %v3174_v10 = vadd.f32 %v3166_v59, %v2890_v13 }
 0x530   :  { %4115 = vmatprep.subr.mxu1 %v6413_v52 }
 0x531   :  { %4116 = vmatpush3.msra.mxu1 %v3276_v56  ;;  %v3206_v24 = vadd.f32 %v3196_v4, %v3174_v10 }
 0x532   :  { %4117 = vmatprep.subr.mxu1 %v6413_v52 }
 0x533   :  { %4118 = vmatpush3.msra.mxu1 %v3275_v6 }
 0x534   :  { %4119 = vmatprep.subr.mxu1 %v6413_v52 }
 0x535   :  { %4120 = vmatpush3.msra.mxu1 %v3274_v20 }
 0x536   :  { %4121 = vmatprep.subr.mxu1 %v6413_v52 }
 0x537   :  { %4122 = vmatpush3.msra.mxu1 %v3273_v19 }
 0x538   :  { %4123 = vmatprep.subr.mxu1 %v6413_v52 }
 0x539   :  { %4124 = vmatpush3.msra.mxu1 %v3272_v15 }
 0x53a   :  { %4125 = vmatprep.subr.mxu1 %v6413_v52 }
 0x53b   :  { %4126 = vmatpush3.msra.mxu1 %v3271_v35 }
 0x53c   :  { %4128 = vmatmul.mubr.f32.vlgmr.msra.gmra.mxu1 %v3206_v24 }
 0x544   :  { %v3095_v5 = vpop.f32.mrf.mxu1 }
 0x545   :  { %v3172_v37 = vadd.f32 %v3095_v5, %v2819_v0 }
 0x546   :  { %v3097_v17 = vpop.f32.mrf.mxu1 }
 0x547   :  { %v3173_v52 = vadd.f32 %v3097_v17, %v2821_v1  ;;  %v3204_v29 = vadd.f32 %v3188_v3, %v3172_v37 }
 0x549   :  { %v3205_v58 = vadd.f32 %v3192_v12, %v3173_v52 }
 0x54b   :  { %3428 = vmatprep.mubr.f32.mxu0 %v3205_v58 }
 0x54c   :  { %3429 = vmatmul.mubr.f32.vlgmr.msra.gmra.mxu0 %v3204_v29 }
 0x5dc   :  { %v3959_v47 = vpop.f32.mrf.mxu1 }
 0x5de   :  { %v3960_v7 = vpop.f32.mrf.mxu1 }
 0x5df   :  { %v3961_v8 = vadd.f32 %v3960_v7, %v3959_v47 }
 0x5e1   :  { %v3361_v40 = vadd.f32 %v3961_v8, %v3775_v46 }
 0x5fc   :  { %v3500_v38 = vpop.f32.mrf.mxu1 }
 0x5fe   :  { %v4129_v21 = vpop.f32.mrf.mxu1 }
 0x60c   :  { %v3994_v49 = vpop.f32.mrf.mxu0 }
 0x60e   :  { %v3995_v22 = vpop.f32.mrf.mxu0 }
 0x60f   :  { %v3996_v60 = vadd.f32 %v3995_v22, %v3994_v49 }
 0x611   :  { %v3431_v18 = vadd.f32 %v3996_v60, %v3361_v40 }
 0x613   :  { %v3501_v31 = vadd.f32 %v3500_v38, %v3431_v18 }
 0x615   :  { %3505 = vst.msk [vmem:[#allocation13] sm:$0xff] %vm3504_vm5, %v3501_v31 }
 0x616   :  { %4196 = shalt.err (!%p4193_p0)
}
 0x617   :  { %3515 = dma.vmem_to_hbm [thread:$0]  %s3513_s0, 128, %s6402_s13, [#allocation10]  }
 0x618   :  { %4209 = dma.done.wait [#allocation10], 128  }
 0x619   :  { %4210 = vsyncadd [#allocation10], 4294967168 }
 0x61a   :  { %3519 = vsyncpa [#allocation9], 1 }
 0x61b   :  { %3520 = vsyncpa [#allocation12], 1 }
 0x61c   :  { %3521 = vsyncpa [#allocation10], 1 }

</bundles_post_ra>
